<compile_context>
chip_gen: v7x
topology: tpu7x:2x2x1
jax: 0.10.0
libtpu: 0.0.40
codegen_flags: <defaults>
</compile_context>

<pallas_src>
import functools
import math

import jax
import jax.numpy as jnp
from jax.experimental import pallas as pl
from jax.experimental.pallas import tpu as pltpu


# ----------------------------------------------------------------------------
# Fused kernel: qkv projection + per-head softmax attention + output projection
# ----------------------------------------------------------------------------
def _window_attention_kernel(x_ref, wqkv_ref, bqkv_ref, wproj_ref, bproj_ref,
                             o_ref, *, num_heads, head_dim, mxu_dtype):
    BW, N, C = x_ref.shape                     # block of BW windows, resident in VMEM
    M = BW * N

    # ---- Stage 1: fused qkv projection -- one (M, C) @ (C, 3C) MXU pass. ----
    x2 = x_ref[...].reshape(M, C).astype(mxu_dtype)
    qkv = jnp.dot(x2, wqkv_ref[...],
                  preferred_element_type=jnp.float32) + bqkv_ref[...]
    # qk scale is already folded into the query columns of wqkv / bqkv.
    q = qkv[:, 0 * C:1 * C].reshape(BW, N, C)
    k = qkv[:, 1 * C:2 * C].reshape(BW, N, C)
    v = qkv[:, 2 * C:3 * C].reshape(BW, N, C)

    # ---- Stage 2: per-head attention (static unroll; num_heads is small). ---
    head_outs = []
    for h in range(num_heads):
        lo, hi = h * head_dim, (h + 1) * head_dim
        qh = q[:, :, lo:hi].astype(mxu_dtype)              # (BW, N, hd)
        kh = k[:, :, lo:hi].astype(mxu_dtype)
        vh = v[:, :, lo:hi].astype(mxu_dtype)
        s = jnp.einsum("bnd,bmd->bnm", qh, kh,
                       preferred_element_type=jnp.float32)  # (BW, N, N)
        s = s - jnp.max(s, axis=-1, keepdims=True)           # f32 softmax (VPU/EUP)
        p = jnp.exp(s)
        p = p * (1.0 / jnp.sum(p, axis=-1, keepdims=True))
        head_outs.append(jnp.einsum("bnm,bmd->bnd", p.astype(mxu_dtype), vh,
                                    preferred_element_type=jnp.float32))

    attn_out = jnp.concatenate(head_outs, axis=-1)            # (BW, N, C), head order

    # ---- Stage 3: output projection -- one (M, C) @ (C, C) MXU pass. --------
    y = jnp.dot(attn_out.reshape(M, C).astype(mxu_dtype), wproj_ref[...],
                preferred_element_type=jnp.float32) + bproj_ref[...]

    # Single full-block store (no per-row masked stores).
    o_ref[...] = y.reshape(BW, N, C).astype(o_ref.dtype)


def _full_spec(arr):
    nd = arr.ndim
    return pl.BlockSpec(arr.shape, lambda i, _nd=nd: (0,) * _nd)


# ----------------------------------------------------------------------------
# Parameter preparation (host-side, zero runtime cost)
# ----------------------------------------------------------------------------
def prep_window_attention_params(qkv_w, qkv_b, proj_w, proj_b, num_heads,
                                 mxu_dtype=jnp.bfloat16):
    """Transpose PyTorch Linear weights, fold the qk scale into the query
    weights/bias, and cast MXU operands to `mxu_dtype` (bf16 for v6e/v7x,
    float32 for strict-f32 / v5e-style runs).  Biases stay float32."""
    C = proj_w.shape[0]
    head_dim = C // num_heads
    scale = head_dim ** (-0.5)

    wqkv_t = jnp.asarray(qkv_w, jnp.float32).T               # (C, 3C)
    bqkv = jnp.asarray(qkv_b, jnp.float32)                   # (3C,)
    scale_vec = jnp.concatenate([jnp.full((C,), scale, jnp.float32),
                                 jnp.ones((2 * C,), jnp.float32)])
    wqkv_t = wqkv_t * scale_vec[None, :]
    bqkv = bqkv * scale_vec

    return {
        "wqkv": wqkv_t.astype(mxu_dtype),                    # (C, 3C)
        "bqkv": bqkv.reshape(1, 3 * C),                      # f32
        "wproj": jnp.asarray(proj_w, jnp.float32).T.astype(mxu_dtype),  # (C, C)
        "bproj": jnp.asarray(proj_b, jnp.float32).reshape(1, C),
    }


# ----------------------------------------------------------------------------
# Public wrapper
# ----------------------------------------------------------------------------
@functools.partial(jax.jit, static_argnames=("num_heads", "block_windows"))
def window_attention(x, params, *, num_heads, block_windows=None):
    """x: (B_, N, C) float32 — B_ windows of N tokens each."""
    B_, N, C = x.shape
    head_dim = C // num_heads

    # Choose a window-block size so each grid step feeds the MXU with
    # M = bw*N >= ~256 rows (and bw divides B_ so no padding is needed).
    bw = block_windows
    if bw is None:
        bw = max(1, min(B_, 256 // max(N, 1)))
        while B_ % bw:
            bw -= 1
    grid = (B_ // bw,)

    mxu_dtype = params["wqkv"].dtype
    kernel = functools.partial(_window_attention_kernel, num_heads=num_heads,
                               head_dim=head_dim, mxu_dtype=mxu_dtype)

    flops = int(2 * B_ * N * C * (3 * C)                 # qkv projection
                + 4 * B_ * num_heads * N * N * head_dim  # q@k^T and attn@v
                + 2 * B_ * N * C * C)                    # output projection
    transcendentals = int(B_ * num_heads * N * N)        # softmax exp
    w_bytes = int((params["wqkv"].size + params["wproj"].size)
                  * jnp.dtype(mxu_dtype).itemsize
                  + (params["bqkv"].size + params["bproj"].size) * 4)
    bytes_accessed = int(2 * B_ * N * C * 4 + w_bytes)

    return pl.pallas_call(
        kernel,
        out_shape=jax.ShapeDtypeStruct((B_, N, C), jnp.float32),
        grid=grid,
        in_specs=[
            pl.BlockSpec((bw, N, C), lambda i: (i, 0, 0)),
            _full_spec(params["wqkv"]),
            _full_spec(params["bqkv"]),
            _full_spec(params["wproj"]),
            _full_spec(params["bproj"]),
        ],
        out_specs=pl.BlockSpec((bw, N, C), lambda i: (i, 0, 0)),
        compiler_params=pltpu.CompilerParams(
            dimension_semantics=("parallel",)),
        cost_estimate=pl.CostEstimate(flops=flops,
                                      transcendentals=transcendentals,
                                      bytes_accessed=bytes_accessed),
    )(x, params["wqkv"], params["bqkv"], params["wproj"], params["bproj"])


# ----------------------------------------------------------------------------
# Pure-JAX references
# ----------------------------------------------------------------------------
def window_attention_torch_ref(x, qkv_w, qkv_b, proj_w, proj_b, num_heads):
    """Direct float32 port of the PyTorch WindowAttention.forward (inference)."""
    B_, N, C = x.shape
    hd = C // num_heads
    scale = hd ** (-0.5)
    hi = jax.lax.Precision.HIGHEST
    qkv = jnp.einsum("bnc,dc->bnd", x, qkv_w, precision=hi) + qkv_b
    qkv = qkv.reshape(B_, N, 3, num_heads, hd).transpose(2, 0, 3, 1, 4)
    q, k, v = qkv[0] * scale, qkv[1], qkv[2]
    attn = jnp.einsum("bhnd,bhmd->bhnm", q, k, precision=hi)
    attn = jax.nn.softmax(attn, axis=-1)
    out = jnp.einsum("bhnm,bhmd->bhnd", attn, v, precision=hi)
    out = out.transpose(0, 2, 1, 3).reshape(B_, N, C)
    return jnp.einsum("bnc,dc->bnd", out, proj_w, precision=hi) + proj_b


def window_attention_params_ref(x, params, *, num_heads):
    """Plain-JAX replica of the fused kernel's math / mixed precision."""
    B_, N, C = x.shape
    hd = C // num_heads
    mxu = params["wqkv"].dtype
    hi = jax.lax.Precision.HIGHEST
    x2 = x.reshape(B_ * N, C).astype(mxu)
    qkv = jnp.dot(x2, params["wqkv"], precision=hi,
                  preferred_element_type=jnp.float32) + params["bqkv"]
    q = qkv[:, :C].reshape(B_, N, C)
    k = qkv[:, C:2 * C].reshape(B_, N, C)
    v = qkv[:, 2 * C:].reshape(B_, N, C)
    outs = []
    for h in range(num_heads):
        lo, hi_c = h * hd, (h + 1) * hd
        qh = q[:, :, lo:hi_c].astype(mxu)
        kh = k[:, :, lo:hi_c].astype(mxu)
        vh = v[:, :, lo:hi_c].astype(mxu)
        s = jnp.einsum("bnd,bmd->bnm", qh, kh, precision=hi,
                       preferred_element_type=jnp.float32)
        s = s - jnp.max(s, axis=-1, keepdims=True)
        p = jnp.exp(s)
        p = p * (1.0 / jnp.sum(p, axis=-1, keepdims=True))
        outs.append(jnp.einsum("bnm,bmd->bnd", p.astype(mxu), vh, precision=hi,
                               preferred_element_type=jnp.float32))
    attn_out = jnp.concatenate(outs, axis=-1).reshape(B_ * N, C)
    y = jnp.dot(attn_out.astype(mxu), params["wproj"], precision=hi,
                preferred_element_type=jnp.float32) + params["bproj"]
    return y.reshape(B_, N, C)


# ----------------------------------------------------------------------------
if __name__ == "__main__":
    key = jax.random.PRNGKey(0)
    k_x, k_qw, k_qb, k_pw, k_pb = jax.random.split(key, 5)

    # 8 windows of 8x8 tokens, dim=32, 4 heads (head_dim=8), like a small W-MSA.
    B_, N, C, num_heads = 8, 64, 32, 4
    x = jax.random.normal(k_x, (B_, N, C), jnp.float32)
    qkv_w = jax.random.normal(k_qw, (3 * C, C), jnp.float32) / math.sqrt(C)
    qkv_b = 0.02 * jax.random.normal(k_qb, (3 * C,), jnp.float32)
    proj_w = jax.random.normal(k_pw, (C, C), jnp.float32) / math.sqrt(C)
    proj_b = 0.02 * jax.random.normal(k_pb, (C,), jnp.float32)

    # 1) Validate the param-prep + kernel math structure (pure JAX, f32) against
    #    the exact PyTorch forward semantics.
    torch_ref = window_attention_torch_ref(x, qkv_w, qkv_b, proj_w, proj_b,
                                           num_heads)
    p_f32 = prep_window_attention_params(qkv_w, qkv_b, proj_w, proj_b,
                                         num_heads, mxu_dtype=jnp.float32)
    struct_ref = window_attention_params_ref(x, p_f32, num_heads=num_heads)
    assert bool(jnp.allclose(struct_ref, torch_ref, atol=1e-4, rtol=1e-4))

    # 2) Run the fused Pallas kernel (bf16 MXU operands, f32 accumulation) and
    #    validate it against the precision-matched plain-JAX replica.
    p_bf16 = prep_window_attention_params(qkv_w, qkv_b, proj_w, proj_b,
                                          num_heads, mxu_dtype=jnp.bfloat16)
    out = window_attention(x, p_bf16, num_heads=num_heads)
    jax.block_until_ready(out)
    ref_bf16 = window_attention_params_ref(x, p_bf16, num_heads=num_heads)

    assert out.shape == (B_, N, C)
    assert bool(jnp.all(jnp.isfinite(out)))
    assert bool(jnp.allclose(out, ref_bf16, atol=2e-3, rtol=2e-3))

    print("KERNEL_OK")
</pallas_src>

<mosaic_0001>
module attributes {stable_mosaic.version = 11 : i64} {
  func.func @_window_attention_kernel(%arg0: i32, %arg1: memref<4x64x32xf32, #tpu.memory_space<vmem>>, %arg2: memref<32x96xbf16, #tpu.memory_space<vmem>>, %arg3: memref<1x96xf32, #tpu.memory_space<vmem>>, %arg4: memref<32x32xbf16, #tpu.memory_space<vmem>>, %arg5: memref<1x32xf32, #tpu.memory_space<vmem>>, %arg6: memref<4x64x32xf32, #tpu.memory_space<vmem>>) attributes {dimension_semantics = [#tpu.dimension_semantics<parallel>], iteration_bounds = array<i64: 2>, scalar_prefetch = 0 : i64, scratch_operands = 0 : i64, tpu.core_type = #tpu.core_type<tc>, window_params = [{transform_indices = @transform_0, window_bounds = array<i64: 4, 64, 32>}, {pipeline_mode = #tpu.pipeline_mode<synchronous>, transform_indices = @transform_1, window_bounds = array<i64: 32, 96>}, {pipeline_mode = #tpu.pipeline_mode<synchronous>, transform_indices = @transform_2, window_bounds = array<i64: 1, 96>}, {pipeline_mode = #tpu.pipeline_mode<synchronous>, transform_indices = @transform_3, window_bounds = array<i64: 32, 32>}, {pipeline_mode = #tpu.pipeline_mode<synchronous>, transform_indices = @transform_4, window_bounds = array<i64: 1, 32>}, {transform_indices = @transform_5, window_bounds = array<i64: 4, 64, 32>}]} {
    %c0 = arith.constant 0 : index
    %c0_0 = arith.constant 0 : index
    %c0_1 = arith.constant 0 : index
    %0 = vector.load %arg1[%c0, %c0_0, %c0_1] : memref<4x64x32xf32, #tpu.memory_space<vmem>>, vector<4x64x32xf32>
    %1 = vector.shape_cast %0 : vector<4x64x32xf32> to vector<256x32xf32>
    %2 = arith.truncf %1 : vector<256x32xf32> to vector<256x32xbf16>
    %c0_2 = arith.constant 0 : index
    %c0_3 = arith.constant 0 : index
    %3 = vector.load %arg2[%c0_2, %c0_3] : memref<32x96xbf16, #tpu.memory_space<vmem>>, vector<32x96xbf16>
    %cst = arith.constant dense<0.000000e+00> : vector<256x96xf32>
    %4 = tpu.matmul %2, %3, %cst {dimension_numbers = #tpu.dot_dimension_numbers<[1], [0], [0], [1], [0, 0, 1, 1], [], []>} : vector<256x32xbf16>, vector<32x96xbf16>, vector<256x96xf32> -> vector<256x96xf32>
    %c0_4 = arith.constant 0 : index
    %c0_5 = arith.constant 0 : index
    %5 = vector.load %arg3[%c0_4, %c0_5] : memref<1x96xf32, #tpu.memory_space<vmem>>, vector<1x96xf32>
    %6 = vector.broadcast %5 : vector<1x96xf32> to vector<256x96xf32>
    %7 = arith.addf %4, %6 : vector<256x96xf32>
    %8 = vector.extract_strided_slice %7 {offsets = [0, 0], sizes = [256, 32], strides = [1, 1]} : vector<256x96xf32> to vector<256x32xf32>
    %9 = vector.shape_cast %8 : vector<256x32xf32> to vector<4x64x32xf32>
    %10 = vector.extract_strided_slice %7 {offsets = [0, 32], sizes = [256, 32], strides = [1, 1]} : vector<256x96xf32> to vector<256x32xf32>
    %11 = vector.shape_cast %10 : vector<256x32xf32> to vector<4x64x32xf32>
    %12 = vector.extract_strided_slice %7 {offsets = [0, 64], sizes = [256, 32], strides = [1, 1]} : vector<256x96xf32> to vector<256x32xf32>
    %13 = vector.shape_cast %12 : vector<256x32xf32> to vector<4x64x32xf32>
    %14 = vector.extract_strided_slice %9 {offsets = [0, 0, 0], sizes = [4, 64, 8], strides = [1, 1, 1]} : vector<4x64x32xf32> to vector<4x64x8xf32>
    %15 = arith.truncf %14 : vector<4x64x8xf32> to vector<4x64x8xbf16>
    %16 = vector.extract_strided_slice %11 {offsets = [0, 0, 0], sizes = [4, 64, 8], strides = [1, 1, 1]} : vector<4x64x32xf32> to vector<4x64x8xf32>
    %17 = arith.truncf %16 : vector<4x64x8xf32> to vector<4x64x8xbf16>
    %18 = vector.extract_strided_slice %13 {offsets = [0, 0, 0], sizes = [4, 64, 8], strides = [1, 1, 1]} : vector<4x64x32xf32> to vector<4x64x8xf32>
    %19 = arith.truncf %18 : vector<4x64x8xf32> to vector<4x64x8xbf16>
    "tpu.trace_start"() <{level = 10 : i32, message = "bnd,bmd->bnm"}> : () -> ()
    %cst_6 = arith.constant dense<0.000000e+00> : vector<4x64x64xf32>
    %20 = tpu.matmul %15, %17, %cst_6 {dimension_numbers = #tpu.dot_dimension_numbers<[2], [2], [1], [1], [0, 0, 0, 1, 1, 1], [0], [0]>} : vector<4x64x8xbf16>, vector<4x64x8xbf16>, vector<4x64x64xf32> -> vector<4x64x64xf32>
    "tpu.trace_stop"() : () -> ()
    %cst_7 = arith.constant dense<0xFF800000> : vector<4x64xf32>
    %21 = vector.multi_reduction <maximumf>, %20, %cst_7 [2] : vector<4x64x64xf32> to vector<4x64xf32>
    %22 = vector.shape_cast %21 : vector<4x64xf32> to vector<4x64x1xf32>
    %23 = vector.broadcast %22 : vector<4x64x1xf32> to vector<4x64x64xf32>
    %24 = arith.subf %20, %23 : vector<4x64x64xf32>
    %25 = math.exp %24 : vector<4x64x64xf32>
    %cst_8 = arith.constant dense<0.000000e+00> : vector<4x64xf32>
    %26 = vector.multi_reduction <add>, %25, %cst_8 [2] : vector<4x64x64xf32> to vector<4x64xf32>
    %27 = vector.shape_cast %26 : vector<4x64xf32> to vector<4x64x1xf32>
    %cst_9 = arith.constant 1.000000e+00 : f32
    %28 = vector.broadcast %cst_9 : f32 to vector<4x64x1xf32>
    %29 = arith.divf %28, %27 : vector<4x64x1xf32>
    %30 = vector.broadcast %29 : vector<4x64x1xf32> to vector<4x64x64xf32>
    %31 = arith.mulf %25, %30 : vector<4x64x64xf32>
    %32 = arith.truncf %31 : vector<4x64x64xf32> to vector<4x64x64xbf16>
    "tpu.trace_start"() <{level = 10 : i32, message = "bnm,bmd->bnd"}> : () -> ()
    %cst_10 = arith.constant dense<0.000000e+00> : vector<4x64x8xf32>
    %33 = tpu.matmul %32, %19, %cst_10 {dimension_numbers = #tpu.dot_dimension_numbers<[2], [1], [1], [2], [0, 0, 0, 1, 1, 2], [0], [0]>} : vector<4x64x64xbf16>, vector<4x64x8xbf16>, vector<4x64x8xf32> -> vector<4x64x8xf32>
    "tpu.trace_stop"() : () -> ()
    %34 = vector.extract_strided_slice %9 {offsets = [0, 0, 8], sizes = [4, 64, 8], strides = [1, 1, 1]} : vector<4x64x32xf32> to vector<4x64x8xf32>
    %35 = arith.truncf %34 : vector<4x64x8xf32> to vector<4x64x8xbf16>
    %36 = vector.extract_strided_slice %11 {offsets = [0, 0, 8], sizes = [4, 64, 8], strides = [1, 1, 1]} : vector<4x64x32xf32> to vector<4x64x8xf32>
    %37 = arith.truncf %36 : vector<4x64x8xf32> to vector<4x64x8xbf16>
    %38 = vector.extract_strided_slice %13 {offsets = [0, 0, 8], sizes = [4, 64, 8], strides = [1, 1, 1]} : vector<4x64x32xf32> to vector<4x64x8xf32>
    %39 = arith.truncf %38 : vector<4x64x8xf32> to vector<4x64x8xbf16>
    "tpu.trace_start"() <{level = 10 : i32, message = "bnd,bmd->bnm"}> : () -> ()
    %cst_11 = arith.constant dense<0.000000e+00> : vector<4x64x64xf32>
    %40 = tpu.matmul %35, %37, %cst_11 {dimension_numbers = #tpu.dot_dimension_numbers<[2], [2], [1], [1], [0, 0, 0, 1, 1, 1], [0], [0]>} : vector<4x64x8xbf16>, vector<4x64x8xbf16>, vector<4x64x64xf32> -> vector<4x64x64xf32>
    "tpu.trace_stop"() : () -> ()
    %cst_12 = arith.constant dense<0xFF800000> : vector<4x64xf32>
    %41 = vector.multi_reduction <maximumf>, %40, %cst_12 [2] : vector<4x64x64xf32> to vector<4x64xf32>
    %42 = vector.shape_cast %41 : vector<4x64xf32> to vector<4x64x1xf32>
    %43 = vector.broadcast %42 : vector<4x64x1xf32> to vector<4x64x64xf32>
    %44 = arith.subf %40, %43 : vector<4x64x64xf32>
    %45 = math.exp %44 : vector<4x64x64xf32>
    %cst_13 = arith.constant dense<0.000000e+00> : vector<4x64xf32>
    %46 = vector.multi_reduction <add>, %45, %cst_13 [2] : vector<4x64x64xf32> to vector<4x64xf32>
    %47 = vector.shape_cast %46 : vector<4x64xf32> to vector<4x64x1xf32>
    %cst_14 = arith.constant 1.000000e+00 : f32
    %48 = vector.broadcast %cst_14 : f32 to vector<4x64x1xf32>
    %49 = arith.divf %48, %47 : vector<4x64x1xf32>
    %50 = vector.broadcast %49 : vector<4x64x1xf32> to vector<4x64x64xf32>
    %51 = arith.mulf %45, %50 : vector<4x64x64xf32>
    %52 = arith.truncf %51 : vector<4x64x64xf32> to vector<4x64x64xbf16>
    "tpu.trace_start"() <{level = 10 : i32, message = "bnm,bmd->bnd"}> : () -> ()
    %cst_15 = arith.constant dense<0.000000e+00> : vector<4x64x8xf32>
    %53 = tpu.matmul %52, %39, %cst_15 {dimension_numbers = #tpu.dot_dimension_numbers<[2], [1], [1], [2], [0, 0, 0, 1, 1, 2], [0], [0]>} : vector<4x64x64xbf16>, vector<4x64x8xbf16>, vector<4x64x8xf32> -> vector<4x64x8xf32>
    "tpu.trace_stop"() : () -> ()
    %54 = vector.extract_strided_slice %9 {offsets = [0, 0, 16], sizes = [4, 64, 8], strides = [1, 1, 1]} : vector<4x64x32xf32> to vector<4x64x8xf32>
    %55 = arith.truncf %54 : vector<4x64x8xf32> to vector<4x64x8xbf16>
    %56 = vector.extract_strided_slice %11 {offsets = [0, 0, 16], sizes = [4, 64, 8], strides = [1, 1, 1]} : vector<4x64x32xf32> to vector<4x64x8xf32>
    %57 = arith.truncf %56 : vector<4x64x8xf32> to vector<4x64x8xbf16>
    %58 = vector.extract_strided_slice %13 {offsets = [0, 0, 16], sizes = [4, 64, 8], strides = [1, 1, 1]} : vector<4x64x32xf32> to vector<4x64x8xf32>
    %59 = arith.truncf %58 : vector<4x64x8xf32> to vector<4x64x8xbf16>
    "tpu.trace_start"() <{level = 10 : i32, message = "bnd,bmd->bnm"}> : () -> ()
    %cst_16 = arith.constant dense<0.000000e+00> : vector<4x64x64xf32>
    %60 = tpu.matmul %55, %57, %cst_16 {dimension_numbers = #tpu.dot_dimension_numbers<[2], [2], [1], [1], [0, 0, 0, 1, 1, 1], [0], [0]>} : vector<4x64x8xbf16>, vector<4x64x8xbf16>, vector<4x64x64xf32> -> vector<4x64x64xf32>
    "tpu.trace_stop"() : () -> ()
    %cst_17 = arith.constant dense<0xFF800000> : vector<4x64xf32>
    %61 = vector.multi_reduction <maximumf>, %60, %cst_17 [2] : vector<4x64x64xf32> to vector<4x64xf32>
    %62 = vector.shape_cast %61 : vector<4x64xf32> to vector<4x64x1xf32>
    %63 = vector.broadcast %62 : vector<4x64x1xf32> to vector<4x64x64xf32>
    %64 = arith.subf %60, %63 : vector<4x64x64xf32>
    %65 = math.exp %64 : vector<4x64x64xf32>
    %cst_18 = arith.constant dense<0.000000e+00> : vector<4x64xf32>
    %66 = vector.multi_reduction <add>, %65, %cst_18 [2] : vector<4x64x64xf32> to vector<4x64xf32>
    %67 = vector.shape_cast %66 : vector<4x64xf32> to vector<4x64x1xf32>
    %cst_19 = arith.constant 1.000000e+00 : f32
    %68 = vector.broadcast %cst_19 : f32 to vector<4x64x1xf32>
    %69 = arith.divf %68, %67 : vector<4x64x1xf32>
    %70 = vector.broadcast %69 : vector<4x64x1xf32> to vector<4x64x64xf32>
    %71 = arith.mulf %65, %70 : vector<4x64x64xf32>
    %72 = arith.truncf %71 : vector<4x64x64xf32> to vector<4x64x64xbf16>
    "tpu.trace_start"() <{level = 10 : i32, message = "bnm,bmd->bnd"}> : () -> ()
    %cst_20 = arith.constant dense<0.000000e+00> : vector<4x64x8xf32>
    %73 = tpu.matmul %72, %59, %cst_20 {dimension_numbers = #tpu.dot_dimension_numbers<[2], [1], [1], [2], [0, 0, 0, 1, 1, 2], [0], [0]>} : vector<4x64x64xbf16>, vector<4x64x8xbf16>, vector<4x64x8xf32> -> vector<4x64x8xf32>
    "tpu.trace_stop"() : () -> ()
    %74 = vector.extract_strided_slice %9 {offsets = [0, 0, 24], sizes = [4, 64, 8], strides = [1, 1, 1]} : vector<4x64x32xf32> to vector<4x64x8xf32>
    %75 = arith.truncf %74 : vector<4x64x8xf32> to vector<4x64x8xbf16>
    %76 = vector.extract_strided_slice %11 {offsets = [0, 0, 24], sizes = [4, 64, 8], strides = [1, 1, 1]} : vector<4x64x32xf32> to vector<4x64x8xf32>
    %77 = arith.truncf %76 : vector<4x64x8xf32> to vector<4x64x8xbf16>
    %78 = vector.extract_strided_slice %13 {offsets = [0, 0, 24], sizes = [4, 64, 8], strides = [1, 1, 1]} : vector<4x64x32xf32> to vector<4x64x8xf32>
    %79 = arith.truncf %78 : vector<4x64x8xf32> to vector<4x64x8xbf16>
    "tpu.trace_start"() <{level = 10 : i32, message = "bnd,bmd->bnm"}> : () -> ()
    %cst_21 = arith.constant dense<0.000000e+00> : vector<4x64x64xf32>
    %80 = tpu.matmul %75, %77, %cst_21 {dimension_numbers = #tpu.dot_dimension_numbers<[2], [2], [1], [1], [0, 0, 0, 1, 1, 1], [0], [0]>} : vector<4x64x8xbf16>, vector<4x64x8xbf16>, vector<4x64x64xf32> -> vector<4x64x64xf32>
    "tpu.trace_stop"() : () -> ()
    %cst_22 = arith.constant dense<0xFF800000> : vector<4x64xf32>
    %81 = vector.multi_reduction <maximumf>, %80, %cst_22 [2] : vector<4x64x64xf32> to vector<4x64xf32>
    %82 = vector.shape_cast %81 : vector<4x64xf32> to vector<4x64x1xf32>
    %83 = vector.broadcast %82 : vector<4x64x1xf32> to vector<4x64x64xf32>
    %84 = arith.subf %80, %83 : vector<4x64x64xf32>
    %85 = math.exp %84 : vector<4x64x64xf32>
    %cst_23 = arith.constant dense<0.000000e+00> : vector<4x64xf32>
    %86 = vector.multi_reduction <add>, %85, %cst_23 [2] : vector<4x64x64xf32> to vector<4x64xf32>
    %87 = vector.shape_cast %86 : vector<4x64xf32> to vector<4x64x1xf32>
    %cst_24 = arith.constant 1.000000e+00 : f32
    %88 = vector.broadcast %cst_24 : f32 to vector<4x64x1xf32>
    %89 = arith.divf %88, %87 : vector<4x64x1xf32>
    %90 = vector.broadcast %89 : vector<4x64x1xf32> to vector<4x64x64xf32>
    %91 = arith.mulf %85, %90 : vector<4x64x64xf32>
    %92 = arith.truncf %91 : vector<4x64x64xf32> to vector<4x64x64xbf16>
    "tpu.trace_start"() <{level = 10 : i32, message = "bnm,bmd->bnd"}> : () -> ()
    %cst_25 = arith.constant dense<0.000000e+00> : vector<4x64x8xf32>
    %93 = tpu.matmul %92, %79, %cst_25 {dimension_numbers = #tpu.dot_dimension_numbers<[2], [1], [1], [2], [0, 0, 0, 1, 1, 2], [0], [0]>} : vector<4x64x64xbf16>, vector<4x64x8xbf16>, vector<4x64x8xf32> -> vector<4x64x8xf32>
    "tpu.trace_stop"() : () -> ()
    %94 = tpu.concatenate %33, %53, %73, %93 in 2 : vector<4x64x8xf32>, vector<4x64x8xf32>, vector<4x64x8xf32>, vector<4x64x8xf32> -> vector<4x64x32xf32>
    %95 = vector.shape_cast %94 : vector<4x64x32xf32> to vector<256x32xf32>
    %96 = arith.truncf %95 : vector<256x32xf32> to vector<256x32xbf16>
    %c0_26 = arith.constant 0 : index
    %c0_27 = arith.constant 0 : index
    %97 = vector.load %arg4[%c0_26, %c0_27] : memref<32x32xbf16, #tpu.memory_space<vmem>>, vector<32x32xbf16>
    %cst_28 = arith.constant dense<0.000000e+00> : vector<256x32xf32>
    %98 = tpu.matmul %96, %97, %cst_28 {dimension_numbers = #tpu.dot_dimension_numbers<[1], [0], [0], [1], [0, 0, 1, 1], [], []>} : vector<256x32xbf16>, vector<32x32xbf16>, vector<256x32xf32> -> vector<256x32xf32>
    %c0_29 = arith.constant 0 : index
    %c0_30 = arith.constant 0 : index
    %99 = vector.load %arg5[%c0_29, %c0_30] : memref<1x32xf32, #tpu.memory_space<vmem>>, vector<1x32xf32>
    %100 = vector.broadcast %99 : vector<1x32xf32> to vector<256x32xf32>
    %101 = arith.addf %98, %100 : vector<256x32xf32>
    %102 = vector.shape_cast %101 : vector<256x32xf32> to vector<4x64x32xf32>
    %c0_31 = arith.constant 0 : index
    %c0_32 = arith.constant 0 : index
    %c0_33 = arith.constant 0 : index
    %103 = vector.load %arg6[%c0_31, %c0_32, %c0_33] : memref<4x64x32xf32, #tpu.memory_space<vmem>>, vector<4x64x32xf32>
    tpu.vector_store %arg6[%c0_31, %c0_32, %c0_33], %102 {strides = array<i32>} : memref<4x64x32xf32, #tpu.memory_space<vmem>>, vector<4x64x32xf32>,
    return
  }
  func.func @transform_0(%arg0: i32) -> (i32, i32, i32) {
    %c0_i32 = arith.constant 0 : i32
    %c0_i32_0 = arith.constant 0 : i32
    %c0_i32_1 = arith.constant 0 : i32
    return %arg0, %c0_i32, %c0_i32_0 : i32, i32, i32
  }
  func.func @transform_1(%arg0: i32) -> (i32, i32) {
    %c0_i32 = arith.constant 0 : i32
    %c0_i32_0 = arith.constant 0 : i32
    %c0_i32_1 = arith.constant 0 : i32
    return %c0_i32, %c0_i32_0 : i32, i32
  }
  func.func @transform_2(%arg0: i32) -> (i32, i32) {
    %c0_i32 = arith.constant 0 : i32
    %c0_i32_0 = arith.constant 0 : i32
    %c0_i32_1 = arith.constant 0 : i32
    return %c0_i32, %c0_i32_0 : i32, i32
  }
  func.func @transform_3(%arg0: i32) -> (i32, i32) {
    %c0_i32 = arith.constant 0 : i32
    %c0_i32_0 = arith.constant 0 : i32
    %c0_i32_1 = arith.constant 0 : i32
    return %c0_i32, %c0_i32_0 : i32, i32
  }
  func.func @transform_4(%arg0: i32) -> (i32, i32) {
    %c0_i32 = arith.constant 0 : i32
    %c0_i32_0 = arith.constant 0 : i32
    %c0_i32_1 = arith.constant 0 : i32
    return %c0_i32, %c0_i32_0 : i32, i32
  }
  func.func @transform_5(%arg0: i32) -> (i32, i32, i32) {
    %c0_i32 = arith.constant 0 : i32
    %c0_i32_0 = arith.constant 0 : i32
    %c0_i32_1 = arith.constant 0 : i32
    return %arg0, %c0_i32, %c0_i32_0 : i32, i32, i32
  }
}

</mosaic_0001>

<bundles_post_ra>
// kernel: window_attention.1
= control target key start
LH: loop header
LB: loop body
LE: loop exit
PB: predicated region body
PF: predicated region fallthrough
CT: control target
= control target key end

     0   :  { %s7992_s18 = smov 0   ;;  %s11005_s0 = inlined_call_operand.vmem [shape: f32[8,64,32], index: 0, kind: input, shape index: {}]   ;;  %s11006_s1 = inlined_call_operand.vmem [shape: bf16[32,96], index: 1, kind: input, shape index: {}]   ;;  %s11007_s2 = inlined_call_operand.vmem [shape: f32[1,96], index: 2, kind: input, shape index: {}]   ;;  %s11008_s3 = inlined_call_operand.vmem [shape: bf16[32,32], index: 3, kind: input, shape index: {}]   ;;  %s11009_s4 = inlined_call_operand.vmem [shape: f32[1,32], index: 4, kind: input, shape index: {}]   ;;  %s11010_s5 = inlined_call_operand.vmem [shape: f32[8,64,32], index: 5, kind: output, shape index: {}]  }
   0x1 LB: > { %s6041_s19 = sadd.s32 4294967295, %s7946_s18   ;;  %p6045_p0 = scmp.ge.s32.totalorder %s7946_s18, 1  ;;  %s7946_s18 = sphi %s7992_s18, %s15_s18  }
   0x2   : > { %p189_p1 = scmp.lt.s32.totalorder %s7946_s18, 3 }
   0x4   : > { %p190_p2 = pnand %p6045_p0, %p189_p1 }
   0x6   : > { %193 = sbr.rel (%p190_p2) target bundleno = 3467 (0xd8b), region = 40 }
   0xd   : > { %v7424_v0 = vld [vmem:[%s11006_s1] sm:$0xff]   ;;  %s6046_s22 = sshll.u32 %s6041_s19, 2  ;;  %v7425_v1 = vld [vmem:[%s11006_s1 + $0x8] sm:$0xff]   ;;  %vm305_vm0 = vcmask 261120   ;;  %vm543_vm1 = vcmask 64512   ;;  %s7948_s6 = smov 96  }
   0xe   : > { %p220_p3 = scmp.lt.s32.totalorder %s6046_s22, 7  ;;  %6514 = vmatprep.subr.bf16.mxu0 %v7424_v0  ;;  %v8067_v51 = vld [vmem:[%s11007_s2] ss:$0 sm:$0xff]  ;;  %s7949_s7 = smov 64   ;;  %vm936_vm2 = vcmask 523264   ;;  %vm5637_vm3 = vcmask 130048  }
   0xf   : > { %6515 = vmatpush3.bf16.msra.mxu0 %v7424_v0  ;;  %s7950_s8 = smov 88   ;;  %s7951_s9 = smov 120   ;;  %vm5670_vm4 = vcmask 195584  }
  0x10   : > { %s11404_s22 = smov (!%p220_p3, %s6046_s22), 7  ;;  %6516 = vmatprep.subr.bf16.mxu0 %v7425_v1  ;;  %s7952_s10 = smov 56  }
  0x11   : > { %s6220_s25 = sshll.u32 %s11404_s22, 6  ;;  %s7953_s11 = smov 80  }
  0x12   : > { %s8014_s28 = scalar_lea.vmem %s11005_s0, %s6220_s25  ;;  %s7954_s12 = smov 112  }
  0x13   : > { %6517 = vmatpush3.bf16.msra.mxu0 %v7425_v1  ;;  %v234_v2 = vld [vmem:[%s8014_s28] sm:$0xff]  ;;  %v235_v3 = vld [vmem:[%s8014_s28 + $0x8] sm:$0xff]  ;;  %v236_v4 = vld [vmem:[%s8014_s28 + $0x10] sm:$0xff]  ;;  %s7955_s13 = smov 48   ;;  %s7956_s14 = smov 72  }
  0x14   : > { %v266_v5 = vpack.c.bf16 %v235_v3, %v234_v2  ;;  %v237_v6 = vld [vmem:[%s8014_s28 + $0x18] sm:$0xff]  ;;  %v238_v7 = vld [vmem:[%s8014_s28 + $0x20] sm:$0xff]  ;;  %v239_v8 = vld [vmem:[%s8014_s28 + $0x28] sm:$0xff]  ;;  %s7957_s15 = smov 104   ;;  %s7958_s16 = smov 40  }
  0x15   : > { %v267_v9 = vpack.c.bf16 %v237_v6, %v236_v4  ;;  %v268_v10 = vpack.c.bf16 %v239_v8, %v238_v7  ;;  %v240_v11 = vld [vmem:[%s8014_s28 + $0x30] sm:$0xff]  ;;  %v241_v12 = vld [vmem:[%s8014_s28 + $0x38] sm:$0xff]  ;;  %v242_v13 = vld [vmem:[%s8014_s28 + $0x40] sm:$0xff]  ;;  %s7959_s17 = smov 8   ;;  %s7960_s19 = smov 16  }
  0x16   : > { %6518 = vmatprep.mubr.msk.bf16.mxu0 %vm305_vm0, %v266_v5  ;;  %v243_v14 = vld [vmem:[%s8014_s28 + $0x48] sm:$0xff]  ;;  %v269_v15 = vpack.c.bf16 %v241_v12, %v240_v11  ;;  %v244_v17 = vld [vmem:[%s8014_s28 + $0x50] sm:$0xff]  ;;  %v245_v18 = vld [vmem:[%s8014_s28 + $0x58] sm:$0xff]  ;;  %s7961_s26 = smov 24  }
  0x17   : > { %6519 = vmatmul.mubr.msk.bf16.vlgmr.msra.gmra.mrb[0].mxu0 %vm305_vm0, %v267_v9  ;;  %v270_v16 = vpack.c.bf16 %v243_v14, %v242_v13  ;;  %v246_v19 = vld [vmem:[%s8014_s28 + $0x60] sm:$0xff]  ;;  %v247_v20 = vld [vmem:[%s8014_s28 + $0x68] sm:$0xff]  ;;  %v271_v21 = vpack.c.bf16 %v245_v18, %v244_v17  ;;  %v248_v23 = vld [vmem:[%s8014_s28 + $0x70] sm:$0xff] }
  0x18   : > { %6522 = vmatprep.mubr.msk.bf16.mxu0 %vm305_vm0, %v268_v10  ;;  %v272_v22 = vpack.c.bf16 %v247_v20, %v246_v19  ;;  %v249_v24 = vld [vmem:[%s8014_s28 + $0x78] sm:$0xff]  ;;  %v250_v25 = vld [vmem:[%s8014_s28 + $0x80] sm:$0xff]  ;;  %v251_v26 = vld [vmem:[%s8014_s28 + $0x88] sm:$0xff] }
  0x19   : > { %v273_v27 = vpack.c.bf16 %v249_v24, %v248_v23  ;;  %v274_v28 = vpack.c.bf16 %v251_v26, %v250_v25  ;;  %v252_v29 = vld [vmem:[%s8014_s28 + $0x90] sm:$0xff]  ;;  %v253_v30 = vld [vmem:[%s8014_s28 + $0x98] sm:$0xff]  ;;  %v254_v31 = vld [vmem:[%s8014_s28 + $0xa0] sm:$0xff] }
  0x1a   : > { %v255_v32 = vld [vmem:[%s8014_s28 + $0xa8] sm:$0xff]  ;;  %v275_v33 = vpack.c.bf16 %v253_v30, %v252_v29  ;;  %v256_v35 = vld [vmem:[%s8014_s28 + $0xb0] sm:$0xff]  ;;  %v257_v36 = vld [vmem:[%s8014_s28 + $0xb8] sm:$0xff] }
  0x1b   : > { %v276_v34 = vpack.c.bf16 %v255_v32, %v254_v31  ;;  %v258_v37 = vld [vmem:[%s8014_s28 + $0xc0] sm:$0xff]  ;;  %v259_v38 = vld [vmem:[%s8014_s28 + $0xc8] sm:$0xff]  ;;  %v277_v39 = vpack.c.bf16 %v257_v36, %v256_v35  ;;  %v260_v41 = vld [vmem:[%s8014_s28 + $0xd0] sm:$0xff] }
  0x1c   : > { %v278_v40 = vpack.c.bf16 %v259_v38, %v258_v37  ;;  %v261_v42 = vld [vmem:[%s8014_s28 + $0xd8] sm:$0xff]  ;;  %v262_v43 = vld [vmem:[%s8014_s28 + $0xe0] sm:$0xff]  ;;  %v263_v44 = vld [vmem:[%s8014_s28 + $0xe8] sm:$0xff] }
  0x1d   : > { %v279_v45 = vpack.c.bf16 %v261_v42, %v260_v41  ;;  %v280_v46 = vpack.c.bf16 %v263_v44, %v262_v43  ;;  %v264_v47 = vld [vmem:[%s8014_s28 + $0xf0] sm:$0xff]  ;;  %v265_v48 = vld [vmem:[%s8014_s28 + $0xf8] sm:$0xff] }
  0x1e   : > { %v281_v49 = vpack.c.bf16 %v265_v48, %v264_v47 }
  0x1f   : > { %6523 = vmatmul.mubr.msk.bf16.gmra.mrb[4].mxu0 %vm305_vm0, %v269_v15 }
  0x20   : > { %6526 = vmatprep.mubr.msk.bf16.mxu0 %vm305_vm0, %v270_v16 }
  0x27   : > { %6527 = vmatmul.mubr.msk.bf16.gmra.mrb[8].mxu0 %vm305_vm0, %v271_v21 }
  0x28   : > { %6530 = vmatprep.mubr.msk.bf16.mxu0 %vm305_vm0, %v272_v22 }
  0x2f   : > { %6531 = vmatmul.mubr.msk.bf16.gmra.mrb[12].mxu0 %vm305_vm0, %v273_v27 }
  0x30   : > { %6534 = vmatprep.mubr.msk.bf16.mxu0 %vm305_vm0, %v274_v28 }
  0x37   : > { %6535 = vmatmul.mubr.msk.bf16.gmra.mrb[16].mxu0 %vm305_vm0, %v275_v33 }
  0x38   : > { %6538 = vmatprep.mubr.msk.bf16.mxu0 %vm305_vm0, %v276_v34 }
  0x3f   : > { %6539 = vmatmul.mubr.msk.bf16.gmra.mrb[20].mxu0 %vm305_vm0, %v277_v39 }
  0x40   : > { %6542 = vmatprep.mubr.msk.bf16.mxu0 %vm305_vm0, %v278_v40 }
  0x47   : > { %6543 = vmatmul.mubr.msk.bf16.gmra.mrb[24].mxu0 %vm305_vm0, %v279_v45 }
  0x48   : > { %6546 = vmatprep.mubr.msk.bf16.mxu0 %vm305_vm0, %v280_v46 }
  0x4f   : > { %6547 = vmatmul.mubr.msk.bf16.gmra.mrb[28].mxu0 %vm305_vm0, %v281_v49 }
  0xea   : > { %v6520_v50 = vpop.f32.mrb[0].mxu0 }
  0xeb   : > { %v388_v52 = vpop.f32.mrb[1].mxu0  ;;  %v397_v54 = vadd.f32 %v6520_v50, %v8067_v51 }
  0xec   : > { %v6521_v53 = vpop.f32.mrb[2].mxu0  ;;  %v389_v57 = vadd.f32 %v8067_v51, %v388_v52 }
  0xed   : > { %v400_v55 = vadd.f32 %v6521_v53, %v8067_v51  ;;  %v391_v56 = vpop.f32.mrb[3].mxu0 }
  0xee   : > { %v392_v58 = vadd.f32 %v8067_v51, %v391_v56 }
  0xef   : > { %v8073_v59 = vpack.c.bf16 %v400_v55, %v397_v54 }
  0xf0   : > { %v8075_v60 = vpack.c.bf16 %v392_v58, %v389_v57 }
  0xf1   : > { %11109 = vst [vmem:[#allocation2_spill] sm:$0xff] %v8073_v59 }
  0xf2   : > { %11110 = vst [vmem:[#allocation3_spill] sm:$0xff] %v8075_v60  ;;  %535 = vrot.lane.b32.xlu0 %v8075_v60, %s7948_s6  ;;  %6558 = vmatprep.mubr.msk.bf16.mxu0 %vm543_vm1, %v8075_v60  ;;  %v6524_v61 = vpop.f32.mrb[4].mxu0 }
  0xf3   : > { %v413_v62 = vadd.f32 %v6524_v61, %v8067_v51  ;;  %v404_v63 = vpop.f32.mrb[5].mxu0 }
  0xf4   : > { %v405_v0 = vadd.f32 %v8067_v51, %v404_v63  ;;  %v6525_v1 = vpop.f32.mrb[6].mxu0 }
  0xf5   : > { %v416_v2 = vadd.f32 %v6525_v1, %v8067_v51  ;;  %v407_v3 = vpop.f32.mrb[7].mxu0 }
  0xf6   : > { %537 = vrot.lane.b32.xlu0 %v8073_v59, %s7948_s6  ;;  %v408_v4 = vadd.f32 %v8067_v51, %v407_v3 }
  0xf7   : > { %v8087_v5 = vpack.c.bf16 %v416_v2, %v413_v62 }
  0xf8   : > { %v8089_v6 = vpack.c.bf16 %v408_v4, %v405_v0 }
  0xfa   : > { %11111 = vst [vmem:[#allocation4_spill] sm:$0xff] %v8089_v6  ;;  %v6528_v7 = vpop.f32.mrb[8].mxu0  ;;  %539 = vrot.lane.b32.xlu1 %v8089_v6, %s7948_s6  ;;  %541 = vrot.lane.b32.xlu0 %v8087_v5, %s7948_s6 }
  0xfb   : > { %v429_v8 = vadd.f32 %v6528_v7, %v8067_v51  ;;  %v420_v9 = vpop.f32.mrb[9].mxu0 }
  0xfc   : > { %v421_v10 = vadd.f32 %v8067_v51, %v420_v9  ;;  %v6529_v11 = vpop.f32.mrb[10].mxu0 }
  0xfd   : > { %v432_v12 = vadd.f32 %v6529_v11, %v8067_v51  ;;  %v423_v13 = vpop.f32.mrb[11].mxu0 }
  0xfe   : > { %v424_v14 = vadd.f32 %v8067_v51, %v423_v13 }
  0xff   : > { %v8099_v15 = vpack.c.bf16 %v432_v12, %v429_v8 }
 0x100   : > { %v8101_v16 = vpack.c.bf16 %v424_v14, %v421_v10 }
 0x102   : > { %637 = vrot.lane.b32.xlu1 %v8101_v16, %s7948_s6  ;;  %v6532_v17 = vpop.f32.mrb[12].mxu0  ;;  %6574 = vmatprep.mubr.msk.bf16.mxu1 %vm543_vm1, %v8101_v16 }
 0x103   : > { %v445_v18 = vadd.f32 %v6532_v17, %v8067_v51  ;;  %v436_v19 = vpop.f32.mrb[13].mxu0 }
 0x104   : > { %v437_v20 = vadd.f32 %v8067_v51, %v436_v19  ;;  %v6533_v21 = vpop.f32.mrb[14].mxu0 }
 0x105   : > { %v448_v22 = vadd.f32 %v6533_v21, %v8067_v51  ;;  %v439_v23 = vpop.f32.mrb[15].mxu0 }
 0x106   : > { %v440_v24 = vadd.f32 %v8067_v51, %v439_v23  ;;  %639 = vrot.lane.b32.xlu1 %v8099_v15, %s7948_s6 }
 0x107   : > { %v8113_v25 = vpack.c.bf16 %v448_v22, %v445_v18 }
 0x108   : > { %v8115_v26 = vpack.c.bf16 %v440_v24, %v437_v20 }
 0x10a   : > { %11112 = vst [vmem:[#allocation5_spill] sm:$0xff] %v8115_v26  ;;  %v6536_v27 = vpop.f32.mrb[16].mxu0  ;;  %641 = vrot.lane.b32.xlu0 %v8115_v26, %s7948_s6 }
 0x10b   : > { %v461_v28 = vadd.f32 %v6536_v27, %v8067_v51  ;;  %v452_v29 = vpop.f32.mrb[17].mxu0 }
 0x10c   : > { %v453_v30 = vadd.f32 %v8067_v51, %v452_v29  ;;  %v6537_v31 = vpop.f32.mrb[18].mxu0 }
 0x10d   : > { %v464_v32 = vadd.f32 %v6537_v31, %v8067_v51  ;;  %v455_v33 = vpop.f32.mrb[19].mxu0 }
 0x10e   : > { %v456_v34 = vadd.f32 %v8067_v51, %v455_v33  ;;  %643 = vrot.lane.b32.xlu0 %v8113_v25, %s7948_s6 }
 0x10f   : > { %v8125_v35 = vpack.c.bf16 %v464_v32, %v461_v28 }
 0x110   : > { %v8127_v36 = vpack.c.bf16 %v456_v34, %v453_v30 }
 0x112   : > { %738 = vrot.lane.b32.xlu1 %v8127_v36, %s7948_s6  ;;  %v6540_v37 = vpop.f32.mrb[20].mxu0 }
 0x113   : > { %v477_v38 = vadd.f32 %v6540_v37, %v8067_v51  ;;  %v468_v39 = vpop.f32.mrb[21].mxu0 }
 0x114   : > { %v469_v40 = vadd.f32 %v8067_v51, %v468_v39  ;;  %v6541_v41 = vpop.f32.mrb[22].mxu0 }
 0x115   : > { %v480_v42 = vadd.f32 %v6541_v41, %v8067_v51  ;;  %v471_v43 = vpop.f32.mrb[23].mxu0 }
 0x116   : > { %v472_v44 = vadd.f32 %v8067_v51, %v471_v43  ;;  %740 = vrot.lane.b32.xlu1 %v8125_v35, %s7948_s6 }
 0x117   : > { %v8137_v45 = vpack.c.bf16 %v480_v42, %v477_v38 }
 0x118   : > { %v8139_v46 = vpack.c.bf16 %v472_v44, %v469_v40 }
 0x11a   : > { %v6544_v47 = vpop.f32.mrb[24].mxu0  ;;  %742 = vrot.lane.b32.xlu0 %v8139_v46, %s7948_s6 }
 0x11b   : > { %v493_v48 = vadd.f32 %v6544_v47, %v8067_v51  ;;  %v484_v49 = vpop.f32.mrb[25].mxu0 }
 0x11c   : > { %v485_v50 = vadd.f32 %v8067_v51, %v484_v49  ;;  %v6545_v52 = vpop.f32.mrb[26].mxu0 }
 0x11d   : > { %v496_v53 = vadd.f32 %v6545_v52, %v8067_v51  ;;  %v487_v54 = vpop.f32.mrb[27].mxu0 }
 0x11e   : > { %v488_v55 = vadd.f32 %v8067_v51, %v487_v54  ;;  %744 = vrot.lane.b32.xlu0 %v8137_v45, %s7948_s6 }
 0x11f   : > { %v8149_v56 = vpack.c.bf16 %v496_v53, %v493_v48 }
 0x120   : > { %v8151_v57 = vpack.c.bf16 %v488_v55, %v485_v50 }
 0x122   : > { %v6548_v58 = vpop.f32.mrb[28].mxu0  ;;  %839 = vrot.lane.b32.xlu1 %v8151_v57, %s7948_s6 }
 0x123   : > { %v509_v61 = vadd.f32 %v6548_v58, %v8067_v51  ;;  %v500_v62 = vpop.f32.mrb[29].mxu0 }
 0x124   : > { %v501_v63 = vadd.f32 %v8067_v51, %v500_v62  ;;  %v6549_v0 = vpop.f32.mrb[30].mxu0 }
 0x125   : > { %v512_v1 = vadd.f32 %v6549_v0, %v8067_v51  ;;  %v503_v2 = vpop.f32.mrb[31].mxu0 }
 0x126   : > { %v504_v3 = vadd.f32 %v8067_v51, %v503_v2  ;;  %841 = vrot.lane.b32.xlu1 %v8149_v56, %s7948_s6 }
 0x127   : > { %v8161_v4 = vpack.c.bf16 %v512_v1, %v509_v61 }
 0x128   : > { %v8163_v7 = vpack.c.bf16 %v504_v3, %v501_v63 }
 0x129   : > { %11113 = vst [vmem:[#allocation6_spill] sm:$0xff] %v8161_v4 }
 0x12a   : > { %845 = vrot.lane.b32.xlu1 %v8161_v4, %s7948_s6  ;;  %843 = vrot.lane.b32.xlu0 %v8163_v7, %s7948_s6  ;;  %s10904_s6 = scalar_lea.vmem %s11010_s5, %s6220_s25 }
 0x12e   : > { %1337 = vrot.lane.b32.xlu1 %v8075_v60, %s7949_s7  ;;  %1341 = vrot.lane.b32.xlu0 %v8089_v6, %s7949_s7 }
 0x132   : > { %1339 = vrot.lane.b32.xlu1 %v8073_v59, %s7949_s7  ;;  %1426 = vrot.lane.b32.xlu0 %v8101_v16, %s7949_s7 }
 0x136   : > { %1343 = vrot.lane.b32.xlu1 %v8087_v5, %s7949_s7  ;;  %1515 = vrot.lane.b32.xlu0 %v8127_v36, %s7949_s7 }
 0x13a   : > { %1428 = vrot.lane.b32.xlu1 %v8099_v15, %s7949_s7  ;;  %1430 = vrot.lane.b32.xlu0 %v8115_v26, %s7949_s7 }
 0x13e   : > { %1517 = vrot.lane.b32.xlu1 %v8125_v35, %s7949_s7  ;;  %1519 = vrot.lane.b32.xlu0 %v8139_v46, %s7949_s7 }
 0x142   : > { %1432 = vrot.lane.b32.xlu1 %v8113_v25, %s7949_s7  ;;  %1604 = vrot.lane.b32.xlu0 %v8151_v57, %s7949_s7 }
 0x146   : > { %1521 = vrot.lane.b32.xlu1 %v8137_v45, %s7949_s7  ;;  %1701 = vrot.lane.b32.xlu0 %v8075_v60, %s7950_s8 }
 0x14a   : > { %1606 = vrot.lane.b32.xlu1 %v8149_v56, %s7949_s7  ;;  %1806 = vrot.lane.b32.xlu0 %v8101_v16, %s7950_s8 }
 0x14e   : > { %1610 = vrot.lane.b32.xlu1 %v8161_v4, %s7949_s7  ;;  %1693 = vrot.lane.b32.xlu0 %v8075_v60, %s7951_s9 }
 0x152   : > { %1703 = vrot.lane.b32.xlu1 %v8073_v59, %s7950_s8 }
 0x156   : > { %1705 = vrot.lane.b32.xlu1 %v8089_v6, %s7950_s8 }
 0x15a   : > { %1707 = vrot.lane.b32.xlu1 %v8087_v5, %s7950_s8 }
 0x15e   : > { %1808 = vrot.lane.b32.xlu1 %v8099_v15, %s7950_s8 }
 0x162   : > { %1810 = vrot.lane.b32.xlu1 %v8115_v26, %s7950_s8 }
 0x164   : > { %v536_v51 = vpop.permute.xlu0 %535 }
 0x165   : > { %7098 = vmatprep.subr.msk.bf16.mxu0 %vm543_vm1, %v536_v51  ;;  %v557_v8 = vsel %vm543_vm1, %v536_v51, 0 }
 0x166   : > { %1608 = vrot.lane.b32.xlu1 %v8163_v7, %s7949_s7  ;;  %6551 = vmatpush3.bf16.xpose.msra.mxu0 %v557_v8 }
 0x168   : > { %v538_v9 = vpop.permute.xlu0 %537 }
 0x169   : > { %7099 = vmatprep.subr.msk.bf16.mxu0 %vm543_vm1, %v538_v9  ;;  %v560_v11 = vsel %vm543_vm1, %v538_v9, 0 }
 0x16c   : > { %v540_v10 = vpop.permute.xlu1 %539  ;;  %v542_v17 = vpop.permute.xlu0 %541 }
 0x16d   : > { %v563_v13 = vsel %vm543_vm1, %v540_v10, 0  ;;  %v566_v20 = vsel %vm543_vm1, %v542_v17, 0 }
 0x16e   : > { %6553 = vmatpush3.bf16.xpose.msra.mxu0 %v560_v11 }
 0x16f   : > { %7100 = vmatprep.subr.msk.bf16.mxu0 %vm543_vm1, %v540_v10 }
 0x174   : > { %v638_v12 = vpop.permute.xlu1 %637 }
 0x175   : > { %7102 = vmatprep.subr.msk.bf16.mxu1 %vm543_vm1, %v638_v12  ;;  %v658_v14 = vsel %vm543_vm1, %v638_v12, 0 }
 0x176   : > { %6555 = vmatpush3.bf16.xpose.msra.mxu0 %v563_v13  ;;  %6567 = vmatpush3.bf16.xpose.msra.mxu1 %v658_v14 }
 0x177   : > { %7101 = vmatprep.subr.msk.bf16.mxu0 %vm543_vm1, %v542_v17 }
 0x178   : > { %v640_v18 = vpop.permute.xlu1 %639 }
 0x179   : > { %7103 = vmatprep.subr.msk.bf16.mxu1 %vm543_vm1, %v640_v18  ;;  %v661_v21 = vsel %vm543_vm1, %v640_v18, 0 }
 0x17c   : > { %v642_v19 = vpop.permute.xlu0 %641 }
 0x17d   : > { %v664_v22 = vsel %vm543_vm1, %v642_v19, 0 }
 0x17e   : > { %6557 = vmatpush3.bf16.xpose.msra.mxu0 %v566_v20  ;;  %6569 = vmatpush3.bf16.xpose.msra.mxu1 %v661_v21 }
 0x17f   : > { %7104 = vmatprep.subr.msk.bf16.mxu1 %vm543_vm1, %v642_v19 }
 0x180   : > { %v644_v24 = vpop.permute.xlu0 %643 }
 0x181   : > { %v667_v30 = vsel %vm543_vm1, %v644_v24, 0 }
 0x184   : > { %v739_v23 = vpop.permute.xlu1 %738 }
 0x185   : > { %6559 = vmatmul.mubr.msk.bf16.vlgmr.msra.gmra.mrb[32].mxu0 %vm543_vm1, %v8073_v59  ;;  %7106 = vmatprep.subr.msk.bf16.mxu0 %vm543_vm1, %v739_v23  ;;  %v759_v27 = vsel %vm543_vm1, %v739_v23, 0 }
 0x186   : > { %6562 = vmatprep.mubr.msk.bf16.mxu0 %vm543_vm1, %v8089_v6  ;;  %6571 = vmatpush3.bf16.xpose.msra.mxu1 %v664_v22 }
 0x187   : > { %6583 = vmatpush3.bf16.xpose.msra.mxu0 %v759_v27  ;;  %7105 = vmatprep.subr.msk.bf16.mxu1 %vm543_vm1, %v644_v24 }
 0x188   : > { %v741_v28 = vpop.permute.xlu1 %740 }
 0x189   : > { %7107 = vmatprep.subr.msk.bf16.mxu0 %vm543_vm1, %v741_v28  ;;  %v762_v29 = vsel %vm543_vm1, %v741_v28, 0 }
 0x18c   : > { %v743_v31 = vpop.permute.xlu0 %742 }
 0x18d   : > { %6563 = vmatmul.mubr.msk.bf16.gmra.mrb[36].mxu0 %vm543_vm1, %v8087_v5  ;;  %v765_v33 = vsel %vm543_vm1, %v743_v31, 0 }
 0x18e   : > { %6573 = vmatpush3.bf16.xpose.msra.mxu1 %v667_v30  ;;  %6590 = vmatprep.mubr.msk.bf16.mxu0 %vm543_vm1, %v8127_v36 }
 0x18f   : > { %6585 = vmatpush3.bf16.xpose.msra.mxu0 %v762_v29 }
 0x190   : > { %7108 = vmatprep.subr.msk.bf16.mxu0 %vm543_vm1, %v743_v31  ;;  %v745_v37 = vpop.permute.xlu0 %744 }
 0x191   : > { %v768_v42 = vsel %vm543_vm1, %v745_v37, 0 }
 0x194   : > { %v840_v32 = vpop.permute.xlu1 %839 }
 0x195   : > { %6575 = vmatmul.mubr.msk.bf16.vlgmr.msra.gmra.mrb[0].mxu1 %vm543_vm1, %v8099_v15  ;;  %7110 = vmatprep.subr.msk.bf16.mxu1 %vm543_vm1, %v840_v32  ;;  %v860_v34 = vsel %vm543_vm1, %v840_v32, 0 }
 0x196   : > { %6578 = vmatprep.mubr.msk.bf16.mxu1 %vm543_vm1, %v8115_v26  ;;  %6599 = vmatpush3.bf16.xpose.msra.mxu1 %v860_v34 }
 0x197   : > { %6587 = vmatpush3.bf16.xpose.msra.mxu0 %v765_v33 }
 0x198   : > { %v842_v38 = vpop.permute.xlu1 %841  ;;  %7109 = vmatprep.subr.msk.bf16.mxu0 %vm543_vm1, %v745_v37 }
 0x199   : > { %7111 = vmatprep.subr.msk.bf16.mxu1 %vm543_vm1, %v842_v38  ;;  %v863_v39 = vsel %vm543_vm1, %v842_v38, 0 }
 0x19c   : > { %v846_v40 = vpop.permute.xlu1 %845  ;;  %v844_v41 = vpop.permute.xlu0 %843 }
 0x19d   : > { %6579 = vmatmul.mubr.msk.bf16.gmra.mrb[4].mxu1 %vm543_vm1, %v8113_v25  ;;  %v866_v47 = vsel %vm543_vm1, %v844_v41, 0  ;;  %v869_v53 = vsel %vm543_vm1, %v846_v40, 0 }
 0x19e   : > { %6601 = vmatpush3.bf16.xpose.msra.mxu1 %v863_v39  ;;  %6606 = vmatprep.mubr.msk.bf16.mxu1 %vm543_vm1, %v8151_v57 }
 0x19f   : > { %6589 = vmatpush3.bf16.xpose.msra.mxu0 %v768_v42  ;;  %7112 = vmatprep.subr.msk.bf16.mxu1 %vm543_vm1, %v844_v41 }
 0x1a0   : > { %v1338_v43 = vpop.permute.xlu1 %1337  ;;  %v1342_v44 = vpop.permute.xlu0 %1341 }
 0x1a1   : > { %6614 = vmatprep.subr.bf16.mxu0 %v1338_v43 }
 0x1a4   : > { %v1340_v48 = vpop.permute.xlu1 %1339  ;;  %v8247_v49 = vpop.permute.xlu0 %1426 }
 0x1a6   : > { %6591 = vmatmul.mubr.msk.bf16.vlgmr.msra.gmra.mrb[40].mxu0 %vm543_vm1, %v8125_v35  ;;  %6603 = vmatpush3.bf16.xpose.msra.mxu1 %v866_v47 }
 0x1a7   : > { %6594 = vmatprep.mubr.msk.bf16.mxu0 %vm543_vm1, %v8139_v46  ;;  %6615 = vmatpush3.bf16.msra.mxu0 %v1338_v43 }
 0x1a8   : > { %6616 = vmatprep.subr.bf16.mxu0 %v1340_v48  ;;  %v1344_v50 = vpop.permute.xlu1 %1343  ;;  %7113 = vmatprep.subr.msk.bf16.mxu1 %vm543_vm1, %v846_v40  ;;  %v1516_v52 = vpop.permute.xlu0 %1515 }
 0x1ab   : > { %6617 = vmatpush3.bf16.msra.mxu0 %v1340_v48 }
 0x1ac   : > { %6618 = vmatprep.subr.bf16.mxu0 %v1342_v44  ;;  %v8255_v54 = vpop.permute.xlu1 %1428  ;;  %v8259_v55 = vpop.permute.xlu0 %1430 }
 0x1ad   : > { %11114 = vst [vmem:[#allocation7_spill] sm:$0xff] %v8259_v55 }
 0x1ae   : > { %6595 = vmatmul.mubr.msk.bf16.gmra.mrb[44].mxu0 %vm543_vm1, %v8137_v45  ;;  %6605 = vmatpush3.bf16.xpose.msra.mxu1 %v869_v53 }
 0x1af   : > { %6619 = vmatpush3.bf16.msra.mxu0 %v1342_v44  ;;  %6646 = vmatprep.subr.bf16.mxu1 %v1516_v52 }
 0x1b0   : > { %6620 = vmatprep.subr.bf16.mxu0 %v1344_v50  ;;  %v1518_v58 = vpop.permute.xlu1 %1517  ;;  %v1520_v61 = vpop.permute.xlu0 %1519 }
 0x1b3   : > { %6621 = vmatpush3.bf16.msra.mxu0 %v1344_v50 }
 0x1b4   : > { %6630 = vmatprep.subr.bf16.mxu0 %v8247_v49  ;;  %v8266_v62 = vpop.permute.xlu1 %1432  ;;  %v8268_v63 = vpop.permute.xlu0 %1604 }
 0x1b5   : > { %6607 = vmatmul.mubr.msk.bf16.vlgmr.msra.gmra.mrb[8].mxu1 %vm543_vm1, %v8149_v56  ;;  %11115 = vst [vmem:[#allocation8_spill] sm:$0xff] %v8266_v62  ;;  %11116 = vst [vmem:[#allocation9_spill] sm:$0xff] %v8268_v63 }
 0x1b6   : > { %6610 = vmatprep.mubr.msk.bf16.mxu1 %vm543_vm1, %v8163_v7  ;;  %6647 = vmatpush3.bf16.msra.mxu1 %v1516_v52 }
 0x1b7   : > { %6648 = vmatprep.subr.bf16.mxu1 %v1518_v58 }
 0x1b8   : > { %v1522_v0 = vpop.permute.xlu1 %1521  ;;  %v8272_v1 = vpop.permute.xlu0 %1701 }
 0x1b9   : > { %11117 = vst [vmem:[#allocation10_spill] sm:$0xff] %v8272_v1 }
 0x1ba   : > { %6649 = vmatpush3.bf16.msra.mxu1 %v1518_v58 }
 0x1bb   : > { %6650 = vmatprep.subr.bf16.mxu1 %v1520_v61 }
 0x1bd   : > { %6611 = vmatmul.mubr.msk.bf16.gmra.mrb[12].mxu1 %vm543_vm1, %v8161_v4 }
 0x1be   : > { %6651 = vmatpush3.bf16.msra.mxu1 %v1520_v61 }
 0x1bf   : > { %6652 = vmatprep.subr.bf16.mxu1 %v1522_v0 }
 0x1c2   : > { %6653 = vmatpush3.bf16.msra.mxu1 %v1522_v0 }
 0x1c3   : > { %7114 = vmatprep.subr.msk.bf16.mxu1 %vm543_vm1, %v8272_v1 }
 0x258   : > { %v8276_v2 = vpop.f32.mrb[32].mxu0 }
 0x259   : > { %v8278_v3 = vpop.f32.mrb[33].mxu0  ;;  %v943_v51 = vsel %vm936_vm2, %v8276_v2, -inf }
 0x25a   : > { %944 = vmax.xlane.f32.xlu0 %v943_v51  ;;  %v8282_v8 = vpop.f32.mrb[34].mxu0  ;;  %v937_v11 = vsel %vm936_vm2, %v8278_v3, -inf }
 0x25b   : > { %v8284_v9 = vpop.f32.mrb[35].mxu0  ;;  %v946_v14 = vsel %vm936_vm2, %v8282_v8, -inf }
 0x25c   : > { %v940_v10 = vsel %vm936_vm2, %v8284_v9, -inf }
 0x25d   : > { %941 = vmax.xlane.f32.xlu1 %v940_v10 }
 0x25e   : > { %938 = vmax.xlane.f32.xlu0 %v937_v11 }
 0x260   : > { %v8290_v12 = vpop.f32.mrb[36].mxu0 }
 0x261   : > { %v8292_v13 = vpop.f32.mrb[37].mxu0  ;;  %v955_v17 = vsel %vm936_vm2, %v8290_v12, -inf }
 0x262   : > { %947 = vmax.xlane.f32.xlu0 %v946_v14  ;;  %956 = vmax.xlane.f32.xlu1 %v955_v17  ;;  %v8298_v18 = vpop.f32.mrb[38].mxu0  ;;  %v949_v20 = vsel %vm936_vm2, %v8292_v13, -inf }
 0x263   : > { %v8300_v19 = vpop.f32.mrb[39].mxu0  ;;  %v958_v21 = vsel %vm936_vm2, %v8298_v18, -inf }
 0x264   : > { %v952_v27 = vsel %vm936_vm2, %v8300_v19, -inf }
 0x266   : > { %950 = vmax.xlane.f32.xlu1 %v949_v20  ;;  %959 = vmax.xlane.f32.xlu0 %v958_v21 }
 0x268   : > { %v8306_v22 = vpop.f32.mrb[0].mxu1 }
 0x269   : > { %v8308_v23 = vpop.f32.mrb[1].mxu1  ;;  %v967_v24 = vsel %vm936_vm2, %v8306_v22, -inf }
 0x26a   : > { %v8314_v28 = vpop.f32.mrb[2].mxu1  ;;  %968 = vmax.xlane.f32.xlu1 %v967_v24  ;;  %953 = vmax.xlane.f32.xlu0 %v952_v27  ;;  %v961_v30 = vsel %vm936_vm2, %v8308_v23, -inf }
 0x26b   : > { %v8316_v29 = vpop.f32.mrb[3].mxu1  ;;  %v970_v31 = vsel %vm936_vm2, %v8314_v28, -inf }
 0x26c   : > { %v964_v37 = vsel %vm936_vm2, %v8316_v29, -inf }
 0x26e   : > { %962 = vmax.xlane.f32.xlu1 %v961_v30  ;;  %971 = vmax.xlane.f32.xlu0 %v970_v31 }
 0x270   : > { %v8322_v32 = vpop.f32.mrb[4].mxu1 }
 0x271   : > { %v8324_v33 = vpop.f32.mrb[5].mxu1  ;;  %v979_v34 = vsel %vm936_vm2, %v8322_v32, -inf }
 0x272   : > { %v8330_v38 = vpop.f32.mrb[6].mxu1  ;;  %980 = vmax.xlane.f32.xlu1 %v979_v34  ;;  %965 = vmax.xlane.f32.xlu0 %v964_v37  ;;  %v973_v40 = vsel %vm936_vm2, %v8324_v33, -inf }
 0x273   : > { %v8332_v39 = vpop.f32.mrb[7].mxu1  ;;  %v982_v41 = vsel %vm936_vm2, %v8330_v38, -inf }
 0x274   : > { %v976_v43 = vsel %vm936_vm2, %v8332_v39, -inf }
 0x276   : > { %974 = vmax.xlane.f32.xlu1 %v973_v40  ;;  %983 = vmax.xlane.f32.xlu0 %v982_v41 }
 0x279   : > { %v8338_v42 = vpop.f32.mrb[40].mxu0 }
 0x27a   : > { %v8342_v44 = vpop.f32.mrb[41].mxu0  ;;  %977 = vmax.xlane.f32.xlu0 %v976_v43  ;;  %v991_v47 = vsel %vm936_vm2, %v8338_v42, -inf }
 0x27b   : > { %992 = vmax.xlane.f32.xlu1 %v991_v47  ;;  %v8346_v48 = vpop.f32.mrb[42].mxu0  ;;  %v985_v53 = vsel %vm936_vm2, %v8342_v44, -inf }
 0x27c   : > { %v8348_v50 = vpop.f32.mrb[43].mxu0  ;;  %v994_v52 = vsel %vm936_vm2, %v8346_v48, -inf }
 0x27d   : > { %v988_v61 = vsel %vm936_vm2, %v8348_v50, -inf }
 0x27e   : > { %995 = vmax.xlane.f32.xlu0 %v994_v52 }
 0x27f   : > { %986 = vmax.xlane.f32.xlu1 %v985_v53 }
 0x281   : > { %v8354_v58 = vpop.f32.mrb[44].mxu0 }
 0x282   : > { %v8358_v0 = vpop.f32.mrb[45].mxu0  ;;  %989 = vmax.xlane.f32.xlu0 %v988_v61  ;;  %v1003_v51 = vsel %vm936_vm2, %v8354_v58, -inf }
 0x283   : > { %1004 = vmax.xlane.f32.xlu1 %v1003_v51  ;;  %v8362_v10 = vpop.f32.mrb[46].mxu0  ;;  %v997_v17 = vsel %vm936_vm2, %v8358_v0, -inf }
 0x284   : > { %v8364_v11 = vpop.f32.mrb[47].mxu0  ;;  %v1006_v14 = vsel %vm936_vm2, %v8362_v10, -inf }
 0x285   : > { %v1000_v27 = vsel %vm936_vm2, %v8364_v11, -inf }
 0x286   : > { %1007 = vmax.xlane.f32.xlu0 %v1006_v14 }
 0x287   : > { %998 = vmax.xlane.f32.xlu1 %v997_v17  ;;  %v8404_v17 = vpop.permute.xlu1 %1606 }
 0x288   : > { %v8370_v20 = vpop.f32.mrb[8].mxu1  ;;  %11118 = vst [vmem:[#allocation11_spill] sm:$0xff] %v8404_v17 }
 0x289   : > { %v8372_v21 = vpop.f32.mrb[9].mxu1  ;;  %v1015_v24 = vsel %vm936_vm2, %v8370_v20, -inf }
 0x28a   : > { %v8378_v30 = vpop.f32.mrb[10].mxu1  ;;  %1001 = vmax.xlane.f32.xlu0 %v1000_v27  ;;  %v1009_v37 = vsel %vm936_vm2, %v8372_v21, -inf }
 0x28b   : > { %1016 = vmax.xlane.f32.xlu1 %v1015_v24  ;;  %v8380_v31 = vpop.f32.mrb[11].mxu1  ;;  %v1018_v34 = vsel %vm936_vm2, %v8378_v30, -inf  ;;  %v8406_v24 = vpop.permute.xlu1 %1610 }
 0x28c   : > { %v1012_v47 = vsel %vm936_vm2, %v8380_v31, -inf  ;;  %11119 = vst [vmem:[#allocation12_spill] sm:$0xff] %v8406_v24 }
 0x28e   : > { %1019 = vmax.xlane.f32.xlu0 %v1018_v34 }
 0x28f   : > { %1010 = vmax.xlane.f32.xlu1 %v1009_v37  ;;  %v8408_v27 = vpop.permute.xlu1 %1703 }
 0x290   : > { %v8386_v40 = vpop.f32.mrb[12].mxu1  ;;  %11120 = vst [vmem:[#allocation13_spill] sm:$0xff] %v8408_v27 }
 0x291   : > { %v8388_v41 = vpop.f32.mrb[13].mxu1  ;;  %v1027_v43 = vsel %vm936_vm2, %v8386_v40, -inf }
 0x292   : > { %v8394_v52 = vpop.f32.mrb[14].mxu1  ;;  %1013 = vmax.xlane.f32.xlu0 %v1012_v47  ;;  %v1021_v51 = vsel %vm936_vm2, %v8388_v41, -inf  ;;  %v8416_v47 = vpop.permute.xlu0 %1806 }
 0x293   : > { %1028 = vmax.xlane.f32.xlu1 %v1027_v43  ;;  %v8396_v53 = vpop.f32.mrb[15].mxu1  ;;  %v1030_v61 = vsel %vm936_vm2, %v8394_v52, -inf  ;;  %v8410_v34 = vpop.permute.xlu1 %1705  ;;  %11124 = vst [vmem:[#allocation17_spill] sm:$0xff] %v8416_v47 }
 0x294   : > { %v1024_v14 = vsel %vm936_vm2, %v8396_v53, -inf  ;;  %11121 = vst [vmem:[#allocation14_spill] sm:$0xff] %v8410_v34 }
 0x296   : > { %1031 = vmax.xlane.f32.xlu0 %v1030_v61 }
 0x297   : > { %1022 = vmax.xlane.f32.xlu1 %v1021_v51  ;;  %v8412_v37 = vpop.permute.xlu1 %1707  ;;  %v8420_v51 = vpop.permute.xlu0 %1693 }
 0x298   : > { %11122 = vst [vmem:[#allocation15_spill] sm:$0xff] %v8412_v37  ;;  %11126 = vst [vmem:[#allocation19_spill] sm:$0xff] %v8420_v51 }
 0x29a   : > { %1025 = vmax.xlane.f32.xlu0 %v1024_v14 }
 0x29b   : > { %v8414_v43 = vpop.permute.xlu1 %1808 }
 0x29c   : > { %11123 = vst [vmem:[#allocation16_spill] sm:$0xff] %v8414_v43 }
 0x29f   : > { %v8418_v61 = vpop.permute.xlu1 %1810 }
 0x2a0   : > { %11125 = vst [vmem:[#allocation18_spill] sm:$0xff] %v8418_v61 }
 0x2a3   : > { %v8422_v1 = vpop.permute.xlu1 %1608 }
 0x2a4   : > { %11127 = vst [vmem:[#allocation20_spill] sm:$0xff] %v8422_v1 }
 0x2e7   : > { %v945_v14 = vpop.xlane.xlu0 %944 }
 0x2e8   : > { %v1035_v17 = vsub.f32 %v8276_v2, %v945_v14 }
 0x2ea   : > { %v1069_v24 = vmul.f32 1.442695, %v1035_v17  ;;  %v942_v63 = vpop.xlane.xlu1 %941 }
 0x2eb   : > { %v939_v27 = vpop.xlane.xlu0 %938  ;;  %v1034_v37 = vsub.f32 %v8284_v9, %v942_v63 }
 0x2ec   : > { %7428 = vpow2.f32 %v1069_v24  ;;  %v1033_v34 = vsub.f32 %v8278_v3, %v939_v27 }
 0x2ed   : > { %v1067_v1 = vmul.f32 1.442695, %v1034_v37 }
 0x2ee   : > { %v1065_v43 = vmul.f32 1.442695, %v1033_v34 }
 0x2ef   : > { %v948_v62 = vpop.xlane.xlu0 %947  ;;  %v957_v47 = vpop.xlane.xlu1 %956 }
 0x2f0   : > { %7430 = vpow2.f32 %v1065_v43  ;;  %v1036_v61 = vsub.f32 %v8282_v8, %v948_v62  ;;  %v1039_v51 = vsub.f32 %v8290_v12, %v957_v47 }
 0x2f2   : > { %v1071_v55 = vmul.f32 1.442695, %v1036_v61  ;;  %v1077_v60 = vmul.f32 1.442695, %v1039_v51 }
 0x2f3   : > { %v951_v2 = vpop.xlane.xlu1 %950  ;;  %v960_v17 = vpop.xlane.xlu0 %959 }
 0x2f4   : > { %7432 = vpow2.f32 %v1071_v55  ;;  %v1037_v24 = vsub.f32 %v8292_v13, %v951_v2  ;;  %v1040_v3 = vsub.f32 %v8298_v18, %v960_v17 }
 0x2f5   : > { %7434 = vpow2.f32 %v1077_v60 }
 0x2f6   : > { %v8431_v63 = vpop.eup %7428  ;;  %7436 = vpow2.f32 %v1067_v1  ;;  %v1073_v9 = vmul.f32 1.442695, %v1037_v24  ;;  %v1079_v27 = vmul.f32 1.442695, %v1040_v3 }
 0x2f7   : > { %v969_v34 = vpop.xlane.xlu1 %968  ;;  %v954_v62 = vpop.xlane.xlu0 %953  ;;  %v1135_v8 = vsel %vm936_vm2, %v8431_v63, 0.0 }
 0x2f8   : > { %7438 = vpow2.f32 %v1073_v9  ;;  %v1038_v12 = vsub.f32 %v8300_v19, %v954_v62  ;;  %1136 = vadd.xlane.f32.xlu1 %v1135_v8  ;;  %v1043_v13 = vsub.f32 %v8306_v22, %v969_v34 }
 0x2f9   : > { %7440 = vpow2.f32 %v1079_v27 }
 0x2fa   : > { %v8436_v55 = vpop.eup %7430  ;;  %v1075_v60 = vmul.f32 1.442695, %v1038_v12  ;;  %v1085_v47 = vmul.f32 1.442695, %v1043_v13 }
 0x2fb   : > { %v963_v18 = vpop.xlane.xlu1 %962  ;;  %v972_v37 = vpop.xlane.xlu0 %971  ;;  %v1129_v1 = vsel %vm936_vm2, %v8436_v55, 0.0 }
 0x2fc   : > { %1130 = vadd.xlane.f32.xlu1 %v1129_v1  ;;  %7442 = vpow2.f32 %v1075_v60  ;;  %v1041_v61 = vsub.f32 %v8308_v23, %v963_v18  ;;  %v1044_v23 = vsub.f32 %v8314_v28, %v972_v37 }
 0x2fd   : > { %7444 = vpow2.f32 %v1085_v47 }
 0x2fe   : > { %v8441_v43 = vpop.eup %7432  ;;  %v1081_v3 = vmul.f32 1.442695, %v1041_v61  ;;  %v1087_v13 = vmul.f32 1.442695, %v1044_v23 }
 0x2ff   : > { %v8444_v19 = vpop.eup %7434  ;;  %v981_v51 = vpop.xlane.xlu1 %980  ;;  %v1138_v22 = vsel %vm936_vm2, %v8441_v43, 0.0 }
 0x300   : > { %v966_v14 = vpop.xlane.xlu0 %965  ;;  %v8448_v2 = vpop.eup %7436  ;;  %v1147_v17 = vsel %vm936_vm2, %v8444_v19, 0.0  ;;  %1139 = vadd.xlane.f32.xlu0 %v1138_v22  ;;  %7446 = vpow2.f32 %v1081_v3 }
 0x301   : > { %1148 = vadd.xlane.f32.xlu1 %v1147_v17  ;;  %v1132_v62 = vsel %vm936_vm2, %v8448_v2, 0.0  ;;  %v1042_v60 = vsub.f32 %v8316_v29, %v966_v14 }
 0x302   : > { %v8452_v24 = vpop.eup %7438 }
 0x303   : > { %v975_v9 = vpop.xlane.xlu1 %974  ;;  %v1141_v34 = vsel %vm936_vm2, %v8452_v24, 0.0  ;;  %v8459_v8 = vpop.eup %7440  ;;  %v1083_v22 = vmul.f32 1.442695, %v1042_v60 }
 0x304   : > { %v984_v27 = vpop.xlane.xlu0 %983  ;;  %1133 = vadd.xlane.f32.xlu0 %v1132_v62  ;;  %v1150_v37 = vsel %vm936_vm2, %v8459_v8, 0.0 }
 0x305   : > { %v1048_v12 = vsub.f32 %v8330_v38, %v984_v27  ;;  %1142 = vadd.xlane.f32.xlu1 %v1141_v34  ;;  %v1047_v38 = vsub.f32 %v8322_v32, %v981_v51  ;;  %v1045_v34 = vsub.f32 %v8324_v33, %v975_v9 }
 0x306   : > { %v8465_v1 = vpop.eup %7442 }
 0x307   : > { %v1095_v18 = vmul.f32 1.442695, %v1048_v12  ;;  %v1144_v29 = vsel %vm936_vm2, %v8465_v1, 0.0  ;;  %v8471_v14 = vpop.eup %7444 }
 0x308   : > { %v978_v28 = vpop.xlane.xlu0 %977  ;;  %v993_v61 = vpop.xlane.xlu1 %992  ;;  %1151 = vadd.xlane.f32.xlu0 %v1150_v37  ;;  %v1159_v32 = vsel %vm936_vm2, %v8471_v14, 0.0 }
 0x309   : > { %v1046_v47 = vsub.f32 %v8332_v39, %v978_v28  ;;  %7448 = vpow2.f32 %v1095_v18  ;;  %v1093_v39 = vmul.f32 1.442695, %v1047_v38  ;;  %v1089_v18 = vmul.f32 1.442695, %v1045_v34 }
 0x30a   : > { %7450 = vpow2.f32 %v1087_v13  ;;  %v8477_v51 = vpop.eup %7446 }
 0x30b   : > { %v1091_v17 = vmul.f32 1.442695, %v1046_v47  ;;  %v1153_v9 = vsel %vm936_vm2, %v8477_v51, 0.0 }
 0x30c   : > { %v996_v3 = vpop.xlane.xlu0 %995  ;;  %v987_v23 = vpop.xlane.xlu1 %986  ;;  %1145 = vadd.xlane.f32.xlu0 %v1144_v29 }
 0x30d   : > { %7452 = vpow2.f32 %v1091_v17  ;;  %v1052_v27 = vsub.f32 %v8346_v48, %v996_v3  ;;  %v1051_v48 = vsub.f32 %v8338_v42, %v993_v61  ;;  %v1049_v61 = vsub.f32 %v8342_v44, %v987_v23 }
 0x30e   : > { %7454 = vpow2.f32 %v1083_v22 }
 0x30f   : > { %v1103_v62 = vmul.f32 1.442695, %v1052_v27  ;;  %v1101_v42 = vmul.f32 1.442695, %v1051_v48  ;;  %v1097_v44 = vmul.f32 1.442695, %v1049_v61 }
 0x310   : > { %v990_v12 = vpop.xlane.xlu0 %989  ;;  %1160 = vadd.xlane.f32.xlu0 %v1159_v32  ;;  %v1005_v60 = vpop.xlane.xlu1 %1004 }
 0x311   : > { %7456 = vpow2.f32 %v1103_v62  ;;  %v1050_v13 = vsub.f32 %v8348_v50, %v990_v12  ;;  %v1055_v23 = vsub.f32 %v8354_v58, %v1005_v60 }
 0x312   : > { %7458 = vpow2.f32 %v1093_v39 }
 0x313   : > { %v1099_v28 = vmul.f32 1.442695, %v1050_v13  ;;  %v8481_v37 = vpop.eup %7448  ;;  %v1109_v58 = vmul.f32 1.442695, %v1055_v23 }
 0x314   : > { %v1008_v33 = vpop.xlane.xlu0 %1007  ;;  %v8485_v47 = vpop.eup %7450  ;;  %v1174_v50 = vsel %vm936_vm2, %v8481_v37, 0.0  ;;  %1154 = vadd.xlane.f32.xlu0 %v1153_v9 }
 0x315   : > { %7460 = vpow2.f32 %v1099_v28  ;;  %v1056_v38 = vsub.f32 %v8362_v10, %v1008_v33  ;;  %1175 = vadd.xlane.f32.xlu1 %v1174_v50  ;;  %v999_v3 = vpop.xlane.xlu1 %998  ;;  %v1162_v10 = vsel %vm936_vm2, %v8485_v47, 0.0 }
 0x316   : > { %7462 = vpow2.f32 %v1089_v18  ;;  %v1053_v60 = vsub.f32 %v8358_v0, %v999_v3 }
 0x317   : > { %v8490_v22 = vpop.eup %7452  ;;  %v1111_v17 = vmul.f32 1.442695, %v1056_v38 }
 0x318   : > { %v1002_v29 = vpop.xlane.xlu0 %1001  ;;  %v1168_v27 = vsel %vm936_vm2, %v8490_v22, 0.0  ;;  %v8497_v39 = vpop.eup %7454  ;;  %1163 = vadd.xlane.f32.xlu0 %v1162_v10 }
 0x319   : > { %7464 = vpow2.f32 %v1111_v17  ;;  %v1054_v34 = vsub.f32 %v8364_v11, %v1002_v29  ;;  %1169 = vadd.xlane.f32.xlu1 %v1168_v27  ;;  %v1156_v18 = vsel %vm936_vm2, %v8497_v39, 0.0  ;;  %v1017_v28 = vpop.xlane.xlu1 %1016  ;;  %v1105_v29 = vmul.f32 1.442695, %v1053_v60 }
 0x31a   : > { %7466 = vpow2.f32 %v1101_v42  ;;  %v1059_v0 = vsub.f32 %v8370_v20, %v1017_v28 }
 0x31b   : > { %v8500_v62 = vpop.eup %7456  ;;  %v1107_v12 = vmul.f32 1.442695, %v1054_v34 }
 0x31c   : > { %v1020_v32 = vpop.xlane.xlu0 %1019  ;;  %v1186_v13 = vsel %vm936_vm2, %v8500_v62, 0.0  ;;  %v8507_v48 = vpop.eup %7458  ;;  %1157 = vadd.xlane.f32.xlu0 %v1156_v18  ;;  %v1117_v23 = vmul.f32 1.442695, %v1059_v0 }
 0x31d   : > { %7468 = vpow2.f32 %v1107_v12  ;;  %v1060_v11 = vsub.f32 %v8378_v30, %v1020_v32  ;;  %1187 = vadd.xlane.f32.xlu1 %v1186_v13  ;;  %v1171_v42 = vsel %vm936_vm2, %v8507_v48, 0.0  ;;  %v1011_v27 = vpop.xlane.xlu1 %1010 }
 0x31e   : > { %7470 = vpow2.f32 %v1097_v44  ;;  %v1057_v12 = vsub.f32 %v8372_v21, %v1011_v27 }
 0x31f   : > { %v8510_v33 = vpop.eup %7460  ;;  %v1119_v9 = vmul.f32 1.442695, %v1060_v11 }
 0x320   : > { %v1014_v38 = vpop.xlane.xlu0 %1013  ;;  %v1180_v50 = vsel %vm936_vm2, %v8510_v33, 0.0  ;;  %v8517_v61 = vpop.eup %7462  ;;  %1172 = vadd.xlane.f32.xlu0 %v1171_v42  ;;  %v1113_v11 = vmul.f32 1.442695, %v1057_v12 }
 0x321   : > { %7472 = vpow2.f32 %v1119_v9  ;;  %v1058_v30 = vsub.f32 %v8380_v31, %v1014_v38  ;;  %1181 = vadd.xlane.f32.xlu1 %v1180_v50  ;;  %v1165_v34 = vsel %vm936_vm2, %v8517_v61, 0.0  ;;  %v1029_v27 = vpop.xlane.xlu1 %1028 }
 0x322   : > { %7474 = vpow2.f32 %v1109_v58 }
 0x323   : > { %v8520_v17 = vpop.eup %7464  ;;  %v1115_v3 = vmul.f32 1.442695, %v1058_v30 }
 0x324   : > { %v1198_v10 = vsel %vm936_vm2, %v8520_v17, 0.0  ;;  %v8527_v44 = vpop.eup %7466  ;;  %1166 = vadd.xlane.f32.xlu0 %v1165_v34 }
 0x325   : > { %7476 = vpow2.f32 %v1115_v3  ;;  %1199 = vadd.xlane.f32.xlu1 %v1198_v10  ;;  %v1183_v20 = vsel %vm936_vm2, %v8527_v44, 0.0  ;;  %v1063_v10 = vsub.f32 %v8386_v40, %v1029_v27  ;;  %v1023_v34 = vpop.xlane.xlu1 %1022 }
 0x326   : > { %7478 = vpow2.f32 %v1105_v29  ;;  %v1061_v12 = vsub.f32 %v8388_v41, %v1023_v34 }
 0x327   : > { %v8529_v31 = vpop.eup %7468  ;;  %7480 = vpow2.f32 %v1117_v23  ;;  %v1125_v23 = vmul.f32 1.442695, %v1063_v10 }
 0x328   : > { %v1192_v32 = vsel %vm936_vm2, %v8529_v31, 0.0  ;;  %v8536_v13 = vpop.eup %7470  ;;  %1184 = vadd.xlane.f32.xlu0 %v1183_v20  ;;  %7482 = vpow2.f32 %v1113_v11  ;;  %v1032_v20 = vpop.xlane.xlu0 %1031 }
 0x329   : > { %1193 = vadd.xlane.f32.xlu1 %v1192_v32  ;;  %v1177_v28 = vsel %vm936_vm2, %v8536_v13, 0.0  ;;  %7484 = vpow2.f32 %v1125_v23  ;;  %v1121_v32 = vmul.f32 1.442695, %v1061_v12  ;;  %v1064_v11 = vsub.f32 %v8394_v52, %v1032_v20 }
 0x32b   : > { %v8538_v18 = vpop.eup %7472  ;;  %7486 = vpow2.f32 %v1121_v32 }
 0x32c   : > { %v1210_v21 = vsel %vm936_vm2, %v8538_v18, 0.0  ;;  %v8544_v58 = vpop.eup %7474  ;;  %1178 = vadd.xlane.f32.xlu0 %v1177_v28  ;;  %v1026_v28 = vpop.xlane.xlu0 %1025 }
 0x32d   : > { %1211 = vadd.xlane.f32.xlu1 %v1210_v21  ;;  %v1195_v9 = vsel %vm936_vm2, %v8544_v58, 0.0  ;;  %v1127_v21 = vmul.f32 1.442695, %v1064_v11 }
 0x32f   : > { %v8546_v60 = vpop.eup %7476  ;;  %7488 = vpow2.f32 %v1127_v21 }
 0x330   : > { %v1204_v38 = vsel %vm936_vm2, %v8546_v60, 0.0  ;;  %v8552_v50 = vpop.eup %7478  ;;  %1196 = vadd.xlane.f32.xlu0 %v1195_v9  ;;  %v1062_v9 = vsub.f32 %v8396_v53, %v1026_v28 }
 0x331   : > { %1205 = vadd.xlane.f32.xlu1 %v1204_v38  ;;  %v1189_v42 = vsel %vm936_vm2, %v8552_v50, 0.0  ;;  %v8556_v30 = vpop.eup %7480 }
 0x332   : > { %v1207_v29 = vsel %vm936_vm2, %v8556_v30, 0.0  ;;  %v8560_v0 = vpop.eup %7482  ;;  %v1123_v40 = vmul.f32 1.442695, %v1062_v9 }
 0x333   : > { %v1201_v3 = vsel %vm936_vm2, %v8560_v0, 0.0  ;;  %v8572_v38 = vpop.eup %7484 }
 0x334   : > { %1190 = vadd.xlane.f32.xlu0 %v1189_v42  ;;  %v1219_v42 = vsel %vm936_vm2, %v8572_v38, 0.0  ;;  %7490 = vpow2.f32 %v1123_v40 }
 0x338   : > { %1208 = vadd.xlane.f32.xlu0 %v1207_v29  ;;  %v8576_v29 = vpop.eup %7486 }
 0x339   : > { %v1213_v41 = vsel %vm936_vm2, %v8576_v29, 0.0  ;;  %v8580_v52 = vpop.eup %7488 }
 0x33a   : > { %v1222_v53 = vsel %vm936_vm2, %v8580_v52, 0.0 }
 0x33c   : > { %1202 = vadd.xlane.f32.xlu0 %v1201_v3 }
 0x33e   : > { %v8584_v3 = vpop.eup %7490 }
 0x33f   : > { %v1216_v27 = vsel %vm936_vm2, %v8584_v3, 0.0 }
 0x342   : > { %1695 = vrot.lane.b32.xlu1 %v8073_v59, %s7951_s9 }
 0x352   : > { %1911 = vrot.lane.b32.xlu0 %v8127_v36, %s7950_s8 }
 0x366   : > { %1220 = vadd.xlane.f32.xlu1 %v1219_v42 }
 0x36a   : > { %1214 = vadd.xlane.f32.xlu1 %v1213_v41 }
 0x371   : > { %1223 = vadd.xlane.f32.xlu0 %v1222_v53 }
 0x375   : > { %1217 = vadd.xlane.f32.xlu0 %v1216_v27 }
 0x37b   : > { %1913 = vrot.lane.b32.xlu1 %v8125_v35, %s7950_s8 }
 0x37f   : > { %1915 = vrot.lane.b32.xlu1 %v8139_v46, %s7950_s8 }
 0x383   : > { %1800 = vrot.lane.b32.xlu1 %v8099_v15, %s7951_s9 }
 0x385   : > { %v1137_v10 = vpop.xlane.xlu1 %1136 }
 0x387   : > { %1699 = vrot.lane.b32.xlu1 %v8087_v5, %s7951_s9 }
 0x389   : > { %v1131_v34 = vpop.xlane.xlu1 %1130 }
 0x38b   : > { %2018 = vrot.lane.b32.xlu1 %v8149_v56, %s7950_s8  ;;  %1812 = vrot.lane.b32.xlu0 %v8113_v25, %s7950_s8 }
 0x38d   : > { %v1140_v23 = vpop.xlane.xlu0 %1139 }
 0x38e   : > { %v1149_v12 = vpop.xlane.xlu1 %1148  ;;  %7492 = vrcp.f32 %v1140_v23 }
 0x38f   : > { %1905 = vrot.lane.b32.xlu1 %v8125_v35, %s7951_s9  ;;  %1798 = vrot.lane.b32.xlu0 %v8101_v16, %s7951_s9  ;;  %7494 = vrcp.f32 %v1131_v34 }
 0x390   : > { %7496 = vrcp.f32 %v1137_v10 }
 0x391   : > { %v1134_v20 = vpop.xlane.xlu0 %1133 }
 0x392   : > { %7498 = vrcp.f32 %v1134_v20  ;;  %v1143_v32 = vpop.xlane.xlu1 %1142 }
 0x393   : > { %1802 = vrot.lane.b32.xlu1 %v8115_v26, %s7951_s9  ;;  %2016 = vrot.lane.b32.xlu0 %v8151_v57, %s7950_s8 }
 0x395   : > { %v1152_v11 = vpop.xlane.xlu0 %1151 }
 0x396   : > { %7500 = vrcp.f32 %v1152_v11 }
 0x397   : > { %2022 = vrot.lane.b32.xlu1 %v8161_v4, %s7950_s8  ;;  %1697 = vrot.lane.b32.xlu0 %v8089_v6, %s7951_s9  ;;  %7502 = vrcp.f32 %v1143_v32 }
 0x398   : > { %v7493_v28 = vpop.eup %7492  ;;  %7504 = vrcp.f32 %v1149_v12 }
 0x399   : > { %v1146_v21 = vpop.xlane.xlu0 %1145  ;;  %v7495_v9 = vpop.eup %7494  ;;  %v1292_v41 = vmul.f32 %v7493_v28, %v8441_v43 }
 0x39a   : > { %7506 = vrcp.f32 %v1146_v21  ;;  %v7497_v40 = vpop.eup %7496  ;;  %v1289_v27 = vmul.f32 %v7495_v9, %v8436_v55 }
 0x39b   : > { %2010 = vrot.lane.b32.xlu1 %v8149_v56, %s7951_s9  ;;  %1917 = vrot.lane.b32.xlu0 %v8137_v45, %s7950_s8  ;;  %v1291_v34 = vmul.f32 %v7497_v40, %v8431_v63 }
 0x39c   : > { %v7499_v42 = vpop.eup %7498 }
 0x39d   : > { %v1161_v53 = vpop.xlane.xlu0 %1160  ;;  %v1290_v10 = vmul.f32 %v7499_v42, %v8448_v2  ;;  %v1322_v12 = vpack.c.bf16 %v1292_v41, %v1291_v34 }
 0x39f   : > { %1909 = vrot.lane.b32.xlu1 %v8137_v45, %s7951_s9  ;;  %1903 = vrot.lane.b32.xlu0 %v8127_v36, %s7951_s9  ;;  %v1321_v23 = vpack.c.bf16 %v1290_v10, %v1289_v27 }
 0x3a0   : > { %v7501_v20 = vpop.eup %7500 }
 0x3a1   : > { %6622 = vmatprep.mubr.msk.bf16.mxu0 %vm936_vm2, %v1321_v23  ;;  %v1155_v32 = vpop.xlane.xlu0 %1154  ;;  %v7503_v43 = vpop.eup %7502  ;;  %v1296_v2 = vmul.f32 %v7501_v20, %v8459_v8  ;;  %v11129_v8 = vld [vmem:[#allocation7_spill] sm:$0xff] }
 0x3a2   : > { %v1176_v11 = vpop.xlane.xlu1 %1175  ;;  %6623 = vmatmul.mubr.msk.bf16.vlgmr.msra.gmra.mrb[48].mxu0 %vm936_vm2, %v1322_v12  ;;  %v7505_v55 = vpop.eup %7504  ;;  %v1293_v21 = vmul.f32 %v7503_v43, %v8452_v24 }
 0x3a3   : > { %2014 = vrot.lane.b32.xlu1 %v8161_v4, %s7951_s9  ;;  %6631 = vmatpush3.bf16.msra.mxu0 %v8247_v49  ;;  %v1295_v42 = vmul.f32 %v7505_v55, %v8444_v19  ;;  %v11128_v49 = vld [vmem:[#allocation3_spill] sm:$0xff] }
 0x3a4   : > { %v7507_v63 = vpop.eup %7506  ;;  %2020 = vrot.lane.b32.xlu0 %v8163_v7, %s7950_s8  ;;  %6632 = vmatprep.subr.bf16.mxu0 %v8255_v54 }
 0x3a5   : > { %v1164_v28 = vpop.xlane.xlu0 %1163  ;;  %v1294_v9 = vmul.f32 %v7507_v63, %v8465_v1  ;;  %v1324_v24 = vpack.c.bf16 %v1296_v2, %v1295_v42 }
 0x3a6   : > { %v1170_v40 = vpop.xlane.xlu1 %1169  ;;  %7508 = vrcp.f32 %v1164_v28 }
 0x3a7   : > { %2513 = vrot.lane.b32.xlu1 %v11128_v49, %s7952_s10  ;;  %6633 = vmatpush3.bf16.msra.mxu0 %v8255_v54  ;;  %v1323_v41 = vpack.c.bf16 %v1294_v9, %v1293_v21  ;;  %7510 = vrcp.f32 %v1155_v32  ;;  %v11130_v54 = vld [vmem:[#allocation8_spill] sm:$0xff] }
 0x3a8   : > { %1804 = vrot.lane.b32.xlu0 %v8113_v25, %s7951_s9  ;;  %6634 = vmatprep.subr.bf16.mxu0 %v11129_v8  ;;  %7512 = vrcp.f32 %v1161_v53  ;;  %v11131_v53 = vld [vmem:[#allocation9_spill] sm:$0xff] }
 0x3a9   : > { %6626 = vmatprep.mubr.msk.bf16.mxu0 %vm936_vm2, %v1323_v41  ;;  %v1158_v1 = vpop.xlane.xlu0 %1157  ;;  %v11132_v41 = vld [vmem:[#allocation11_spill] sm:$0xff] }
 0x3aa   : > { %v1188_v19 = vpop.xlane.xlu1 %1187  ;;  %7514 = vrcp.f32 %v1158_v1  ;;  %6627 = vmatmul.mubr.msk.bf16.gmra.mrb[52].mxu0 %vm936_vm2, %v1324_v24 }
 0x3ab   : > { %2517 = vrot.lane.b32.xlu1 %v8089_v6, %s7952_s10  ;;  %6635 = vmatpush3.bf16.msra.mxu0 %v11129_v8 }
 0x3ac   : > { %2008 = vrot.lane.b32.xlu0 %v8151_v57, %s7951_s9  ;;  %6636 = vmatprep.subr.bf16.mxu0 %v11130_v54 }
 0x3ad   : > { %v1173_v27 = vpop.xlane.xlu0 %1172 }
 0x3ae   : > { %v1182_v10 = vpop.xlane.xlu1 %1181  ;;  %7516 = vrcp.f32 %v1173_v27 }
 0x3af   : > { %2602 = vrot.lane.b32.xlu1 %v8101_v16, %s7952_s10  ;;  %6637 = vmatpush3.bf16.msra.mxu0 %v11130_v54  ;;  %7518 = vrcp.f32 %v1170_v40 }
 0x3b0   : > { %1907 = vrot.lane.b32.xlu0 %v8139_v46, %s7951_s9  ;;  %6662 = vmatprep.subr.bf16.mxu0 %v11131_v53  ;;  %v7509_v34 = vpop.eup %7508  ;;  %7520 = vrcp.f32 %v1176_v11 }
 0x3b1   : > { %v1167_v23 = vpop.xlane.xlu0 %1166  ;;  %v7511_v12 = vpop.eup %7510  ;;  %v1300_v55 = vmul.f32 %v7509_v34, %v8485_v47 }
 0x3b2   : > { %7522 = vrcp.f32 %v1167_v23  ;;  %v7513_v20 = vpop.eup %7512  ;;  %v1200_v32 = vpop.xlane.xlu1 %1199  ;;  %v1297_v2 = vmul.f32 %v7511_v12, %v8477_v51 }
 0x3b3   : > { %2691 = vrot.lane.b32.xlu1 %v8127_v36, %s7952_s10  ;;  %v1299_v11 = vmul.f32 %v7513_v20, %v8471_v14  ;;  %v11134_v20 = vld [vmem:[#allocation12_spill] sm:$0xff] }
 0x3b4   : > { %v7515_v43 = vpop.eup %7514  ;;  %2012 = vrot.lane.b32.xlu0 %v8163_v7, %s7951_s9 }
 0x3b5   : > { %v1185_v63 = vpop.xlane.xlu0 %1184  ;;  %v1298_v28 = vmul.f32 %v7515_v43, %v8497_v39  ;;  %v1326_v9 = vpack.c.bf16 %v1300_v55, %v1299_v11  ;;  %v11135_v11 = vld [vmem:[#allocation17_spill] sm:$0xff] }
 0x3b6   : > { %7524 = vrcp.f32 %v1185_v63  ;;  %v1194_v40 = vpop.xlane.xlu1 %1193 }
 0x3b7   : > { %2606 = vrot.lane.b32.xlu1 %v8115_v26, %s7952_s10  ;;  %v1325_v21 = vpack.c.bf16 %v1298_v28, %v1297_v2  ;;  %7526 = vrcp.f32 %v1182_v10 }
 0x3b8   : > { %2515 = vrot.lane.b32.xlu0 %v8073_v59, %s7952_s10  ;;  %v7517_v47 = vpop.eup %7516  ;;  %7528 = vrcp.f32 %v1188_v19 }
 0x3b9   : > { %6638 = vmatprep.mubr.msk.bf16.mxu0 %vm936_vm2, %v1325_v21  ;;  %v1179_v51 = vpop.xlane.xlu0 %1178  ;;  %v7519_v42 = vpop.eup %7518  ;;  %v1303_v8 = vmul.f32 %v7517_v47, %v8507_v48  ;;  %v11133_v48 = vld [vmem:[#allocation20_spill] sm:$0xff]  ;;  %v11136_v21 = vld [vmem:[#allocation10_spill] sm:$0xff] }
 0x3ba   : > { %7530 = vrcp.f32 %v1179_v51  ;;  %6639 = vmatmul.mubr.msk.bf16.vlgmr.msra.gmra.mrb[56].mxu0 %vm936_vm2, %v1326_v9  ;;  %v7521_v14 = vpop.eup %7520  ;;  %v1302_v19 = vmul.f32 %v7519_v42, %v8490_v22  ;;  %v1212_v27 = vpop.xlane.xlu1 %1211  ;;  %v1722_v9 = vsel %vm543_vm1, %v11136_v21, 0  ;;  %v11137_v51 = vld [vmem:[#allocation13_spill] sm:$0xff] }
 0x3bb   : > { %2695 = vrot.lane.b32.xlu1 %v8139_v46, %s7952_s10  ;;  %6663 = vmatpush3.bf16.msra.mxu0 %v11131_v53  ;;  %v1304_v54 = vmul.f32 %v7521_v14, %v8481_v37 }
 0x3bc   : > { %v7523_v39 = vpop.eup %7522  ;;  %2519 = vrot.lane.b32.xlu0 %v8087_v5, %s7952_s10  ;;  %6664 = vmatprep.subr.bf16.mxu0 %v11132_v41 }
 0x3bd   : > { %v1197_v24 = vpop.xlane.xlu0 %1196  ;;  %v1301_v1 = vmul.f32 %v7523_v39, %v8517_v61  ;;  %v1328_v53 = vpack.c.bf16 %v1304_v54, %v1303_v8 }
 0x3be   : > { %7532 = vrcp.f32 %v1197_v24 }
 0x3bf   : > { %2780 = vrot.lane.b32.xlu1 %v8151_v57, %s7952_s10  ;;  %6665 = vmatpush3.bf16.msra.mxu0 %v11132_v41  ;;  %v1327_v10 = vpack.c.bf16 %v1302_v19, %v1301_v1  ;;  %7534 = vrcp.f32 %v1194_v40 }
 0x3c0   : > { %2604 = vrot.lane.b32.xlu0 %v8099_v15, %s7952_s10  ;;  %6666 = vmatprep.subr.bf16.mxu0 %v11133_v48  ;;  %v7525_v61 = vpop.eup %7524  ;;  %7536 = vrcp.f32 %v1200_v32  ;;  %v1206_v32 = vpop.xlane.xlu1 %1205 }
 0x3c1   : > { %6642 = vmatprep.mubr.msk.bf16.mxu0 %vm936_vm2, %v1327_v10  ;;  %v1191_v37 = vpop.xlane.xlu0 %1190  ;;  %v7527_v22 = vpop.eup %7526  ;;  %v1307_v12 = vmul.f32 %v7525_v61, %v8527_v44 }
 0x3c2   : > { %7538 = vrcp.f32 %v1191_v37  ;;  %6643 = vmatmul.mubr.msk.bf16.gmra.mrb[60].mxu0 %vm936_vm2, %v1328_v53  ;;  %v7529_v34 = vpop.eup %7528  ;;  %v1306_v63 = vmul.f32 %v7527_v22, %v8510_v33  ;;  %v1827_v22 = vsel %vm543_vm1, %v11135_v11, 0 }
 0x3c3   : > { %2879 = vrot.lane.b32.xlu1 %v8073_v59, %s7953_s11  ;;  %6667 = vmatpush3.bf16.msra.mxu0 %v11133_v48  ;;  %v1308_v2 = vmul.f32 %v7529_v34, %v8500_v62 }
 0x3c4   : > { %v7531_v23 = vpop.eup %7530  ;;  %2693 = vrot.lane.b32.xlu0 %v8125_v35, %s7952_s10  ;;  %6668 = vmatprep.subr.bf16.mxu0 %v11134_v20 }
 0x3c5   : > { %v1209_v43 = vpop.xlane.xlu0 %1208  ;;  %v1305_v55 = vmul.f32 %v7531_v23, %v8536_v13  ;;  %v1330_v28 = vpack.c.bf16 %v1308_v2, %v1307_v12  ;;  %v11142_v12 = vld [vmem:[#allocation18_spill] sm:$0xff] }
 0x3c6   : > { %7540 = vrcp.f32 %v1209_v43 }
 0x3c7   : > { %2982 = vrot.lane.b32.xlu1 %v8101_v16, %s7953_s11  ;;  %6669 = vmatpush3.bf16.msra.mxu0 %v11134_v20  ;;  %v1329_v44 = vpack.c.bf16 %v1306_v63, %v1305_v55  ;;  %7542 = vrcp.f32 %v1206_v32  ;;  %v1696_v20 = vpop.permute.xlu1 %1695  ;;  %v1833_v32 = vsel %vm543_vm1, %v11142_v12, 0 }
 0x3c8   : > { %2608 = vrot.lane.b32.xlu0 %v8113_v25, %s7952_s10  ;;  %7118 = vmatprep.subr.msk.bf16.mxu0 %vm543_vm1, %v11135_v11  ;;  %v7533_v13 = vpop.eup %7532  ;;  %7544 = vrcp.f32 %v1212_v27  ;;  %v11139_v27 = vld [vmem:[#allocation14_spill] sm:$0xff] }
 0x3c9   : > { %6654 = vmatprep.mubr.msk.bf16.mxu1 %vm936_vm2, %v1329_v44  ;;  %v1203_v62 = vpop.xlane.xlu0 %1202  ;;  %v7535_v33 = vpop.eup %7534  ;;  %v1311_v42 = vmul.f32 %v7533_v13, %v8544_v58  ;;  %v1725_v58 = vsel %vm543_vm1, %v11137_v51, 0 }
 0x3ca   : > { %7546 = vrcp.f32 %v1203_v62  ;;  %6655 = vmatmul.mubr.msk.bf16.vlgmr.msra.gmra.mrb[16].mxu1 %vm936_vm2, %v1330_v28  ;;  %v7537_v47 = vpop.eup %7536  ;;  %v1310_v39 = vmul.f32 %v7535_v33, %v8529_v31 }
 0x3cb   : > { %2869 = vrot.lane.b32.xlu1 %v11128_v49, %s7954_s12  ;;  %6679 = vmatpush3.bf16.xpose.msra.mxu1 %v1722_v9  ;;  %v1312_v41 = vmul.f32 %v7537_v47, %v8520_v17  ;;  %v11138_v17 = vld [vmem:[#allocation19_spill] sm:$0xff] }
 0x3cc   : > { %v7539_v40 = vpop.eup %7538  ;;  %2697 = vrot.lane.b32.xlu0 %v8137_v45, %s7952_s10  ;;  %7115 = vmatprep.subr.msk.bf16.mxu1 %vm543_vm1, %v11137_v51 }
 0x3cd   : > { %v1309_v14 = vmul.f32 %v7539_v40, %v8552_v50  ;;  %v1332_v24 = vpack.c.bf16 %v1312_v41, %v1311_v42  ;;  %v1912_v23 = vpop.permute.xlu0 %1911 }
 0x3ce   : > { %v1932_v43 = vsel %vm543_vm1, %v1912_v23, 0 }
 0x3cf   : > { %3087 = vrot.lane.b32.xlu1 %v8127_v36, %s7953_s11  ;;  %v1331_v8 = vpack.c.bf16 %v1310_v39, %v1309_v14 }
 0x3d0   : > { %2782 = vrot.lane.b32.xlu0 %v8149_v56, %s7952_s10  ;;  %v7541_v1 = vpop.eup %7540 }
 0x3d1   : > { %6658 = vmatprep.mubr.msk.bf16.mxu1 %vm936_vm2, %v1331_v8  ;;  %v7543_v19 = vpop.eup %7542  ;;  %v1315_v54 = vmul.f32 %v7541_v1, %v8556_v30  ;;  %v1728_v30 = vsel %vm543_vm1, %v11139_v27, 0 }
 0x3d2   : > { %6659 = vmatmul.mubr.msk.bf16.gmra.mrb[20].mxu1 %vm936_vm2, %v1332_v24  ;;  %v7545_v31 = vpop.eup %7544  ;;  %v1314_v48 = vmul.f32 %v7543_v19, %v8546_v60  ;;  %v11141_v60 = vld [vmem:[#allocation16_spill] sm:$0xff] }
 0x3d3   : > { %6681 = vmatpush3.bf16.xpose.msra.mxu1 %v1725_v58  ;;  %6686 = vmatprep.mubr.msk.bf16.mxu1 %vm543_vm1, %v11138_v17  ;;  %v1316_v53 = vmul.f32 %v7545_v31, %v8538_v18  ;;  %v11140_v18 = vld [vmem:[#allocation15_spill] sm:$0xff]  ;;  %v1830_v34 = vsel %vm543_vm1, %v11141_v60, 0 }
 0x3d4   : > { %v7547_v50 = vpop.eup %7546  ;;  %2877 = vrot.lane.b32.xlu0 %v11128_v49, %s7953_s11  ;;  %7116 = vmatprep.subr.msk.bf16.mxu1 %vm543_vm1, %v11139_v27 }
 0x3d5   : > { %v1313_v10 = vmul.f32 %v7547_v50, %v8560_v0  ;;  %v1334_v37 = vpack.c.bf16 %v1316_v53, %v1315_v54  ;;  %v1731_v0 = vsel %vm543_vm1, %v11140_v18, 0 }
 0x3d7   : > { %v1333_v61 = vpack.c.bf16 %v1314_v48, %v1313_v10 }
 0x3d8   : > { %2784 = vrot.lane.b32.xlu0 %v8163_v7, %s7952_s10 }
 0x3d9   : > { %6670 = vmatprep.mubr.msk.bf16.mxu0 %vm936_vm2, %v1333_v61 }
 0x3da   : > { %6671 = vmatmul.mubr.msk.bf16.vlgmr.msra.gmra.mrb[64].mxu0 %vm936_vm2, %v1334_v37 }
 0x3db   : > { %6683 = vmatpush3.bf16.xpose.msra.mxu1 %v1728_v30  ;;  %6695 = vmatpush3.bf16.xpose.msra.mxu0 %v1827_v22 }
 0x3dc   : > { %2786 = vrot.lane.b32.xlu0 %v8161_v4, %s7952_s10  ;;  %7117 = vmatprep.subr.msk.bf16.mxu1 %vm543_vm1, %v11140_v18 }
 0x3dd   : > { %7119 = vmatprep.subr.msk.bf16.mxu0 %vm543_vm1, %v11141_v60 }
 0x3e0   : > { %2881 = vrot.lane.b32.xlu0 %v8089_v6, %s7953_s11 }
 0x3e3   : > { %6685 = vmatpush3.bf16.xpose.msra.mxu1 %v1731_v0  ;;  %6697 = vmatpush3.bf16.xpose.msra.mxu0 %v1830_v34 }
 0x3e4   : > { %2883 = vrot.lane.b32.xlu0 %v8087_v5, %s7953_s11  ;;  %7120 = vmatprep.subr.msk.bf16.mxu0 %vm543_vm1, %v11142_v12 }
 0x3e5   : > { %7122 = vmatprep.subr.msk.bf16.mxu1 %vm543_vm1, %v1912_v23 }
 0x3e8   : > { %2984 = vrot.lane.b32.xlu0 %v8099_v15, %s7953_s11 }
 0x3ea   : > { %6687 = vmatmul.mubr.msk.bf16.vlgmr.msra.gmra.mrb[24].mxu1 %vm543_vm1, %v1696_v20 }
 0x3eb   : > { %6699 = vmatpush3.bf16.xpose.msra.mxu0 %v1833_v32  ;;  %6711 = vmatpush3.bf16.xpose.msra.mxu1 %v1932_v43 }
 0x3ec   : > { %2986 = vrot.lane.b32.xlu0 %v8115_v26, %s7953_s11 }
 0x3f3   : > { %v1221_v55 = vpop.xlane.xlu1 %1220 }
 0x3f7   : > { %v1215_v63 = vpop.xlane.xlu1 %1214 }
 0x3fb   : > { %v1914_v2 = vpop.permute.xlu1 %1913 }
 0x3fc   : > { %7123 = vmatprep.subr.msk.bf16.mxu1 %vm543_vm1, %v1914_v2  ;;  %v1935_v44 = vsel %vm543_vm1, %v1914_v2, 0 }
 0x3fd   : > { %6713 = vmatpush3.bf16.xpose.msra.mxu1 %v1935_v44 }
 0x3fe   : > { %v1224_v28 = vpop.xlane.xlu0 %1223 }
 0x3ff   : > { %v1916_v11 = vpop.permute.xlu1 %1915  ;;  %7548 = vrcp.f32 %v1224_v28 }
 0x400   : > { %7124 = vmatprep.subr.msk.bf16.mxu1 %vm543_vm1, %v1916_v11  ;;  %7550 = vrcp.f32 %v1215_v63  ;;  %v1938_v33 = vsel %vm543_vm1, %v1916_v11, 0 }
 0x401   : > { %7552 = vrcp.f32 %v1221_v55 }
 0x402   : > { %v1218_v13 = vpop.xlane.xlu0 %1217 }
 0x403   : > { %v1801_v62 = vpop.permute.xlu1 %1800  ;;  %7554 = vrcp.f32 %v1218_v13 }
 0x405   : > { %6715 = vmatpush3.bf16.xpose.msra.mxu1 %v1938_v33 }
 0x406   : > { %v1813_v21 = vpop.permute.xlu0 %1812 }
 0x407   : > { %v1700_v9 = vpop.permute.xlu1 %1699  ;;  %7121 = vmatprep.subr.msk.bf16.mxu0 %vm543_vm1, %v1813_v21  ;;  %v1836_v47 = vsel %vm543_vm1, %v1813_v21, 0 }
 0x408   : > { %6701 = vmatpush3.bf16.xpose.msra.mxu0 %v1836_v47 }
 0x409   : > { %v7549_v40 = vpop.eup %7548 }
 0x40a   : > { %v1799_v51 = vpop.permute.xlu0 %1798  ;;  %v7551_v42 = vpop.eup %7550  ;;  %v1320_v8 = vmul.f32 %v7549_v40, %v8580_v52 }
 0x40b   : > { %v2019_v14 = vpop.permute.xlu1 %2018  ;;  %v7553_v39 = vpop.eup %7552  ;;  %v1317_v1 = vmul.f32 %v7551_v42, %v8576_v29 }
 0x40c   : > { %v1319_v31 = vmul.f32 %v7553_v39, %v8572_v38  ;;  %v2040_v22 = vsel %vm543_vm1, %v2019_v14, 0 }
 0x40d   : > { %v7555_v41 = vpop.eup %7554 }
 0x40e   : > { %v2017_v24 = vpop.permute.xlu0 %2016  ;;  %v1318_v19 = vmul.f32 %v7555_v41, %v8584_v3  ;;  %v1336_v50 = vpack.c.bf16 %v1320_v8, %v1319_v31 }
 0x40f   : > { %v1906_v58 = vpop.permute.xlu1 %1905  ;;  %7126 = vmatprep.subr.msk.bf16.mxu0 %vm543_vm1, %v2017_v24  ;;  %v2037_v48 = vsel %vm543_vm1, %v2017_v24, 0 }
 0x410   : > { %v1335_v17 = vpack.c.bf16 %v1318_v19, %v1317_v1 }
 0x412   : > { %6674 = vmatprep.mubr.msk.bf16.mxu0 %vm936_vm2, %v1335_v17  ;;  %v1698_v54 = vpop.permute.xlu0 %1697 }
 0x413   : > { %v1803_v27 = vpop.permute.xlu1 %1802  ;;  %6675 = vmatmul.mubr.msk.bf16.gmra.mrb[68].mxu0 %vm936_vm2, %v1336_v50  ;;  %6690 = vmatprep.mubr.msk.bf16.mxu1 %vm543_vm1, %v1698_v54 }
 0x414   : > { %6691 = vmatmul.mubr.msk.bf16.gmra.mrb[28].mxu1 %vm543_vm1, %v1700_v9  ;;  %6702 = vmatprep.mubr.msk.bf16.mxu0 %vm543_vm1, %v1799_v51 }
 0x416   : > { %v1918_v29 = vpop.permute.xlu0 %1917 }
 0x417   : > { %v2023_v52 = vpop.permute.xlu1 %2022  ;;  %7125 = vmatprep.subr.msk.bf16.mxu1 %vm543_vm1, %v1918_v29  ;;  %v1941_v38 = vsel %vm543_vm1, %v1918_v29, 0 }
 0x418   : > { %6717 = vmatpush3.bf16.xpose.msra.mxu1 %v1941_v38  ;;  %v2046_v43 = vsel %vm543_vm1, %v2023_v52, 0 }
 0x41a   : > { %v1904_v3 = vpop.permute.xlu0 %1903 }
 0x41b   : > { %v2011_v10 = vpop.permute.xlu1 %2010  ;;  %6703 = vmatmul.mubr.msk.bf16.vlgmr.msra.gmra.mrb[72].mxu0 %vm543_vm1, %v1801_v62  ;;  %6718 = vmatprep.mubr.msk.bf16.mxu1 %vm543_vm1, %v1904_v3 }
 0x41c   : > { %6727 = vmatpush3.bf16.xpose.msra.mxu0 %v2037_v48  ;;  %6706 = vmatprep.mubr.msk.bf16.mxu0 %vm543_vm1, %v1803_v27 }
 0x41d   : > { %7127 = vmatprep.subr.msk.bf16.mxu0 %vm543_vm1, %v2019_v14 }
 0x41e   : > { %v2021_v53 = vpop.permute.xlu0 %2020 }
 0x41f   : > { %v1910_v61 = vpop.permute.xlu1 %1909  ;;  %6719 = vmatmul.mubr.msk.bf16.vlgmr.msra.gmra.mrb[32].mxu1 %vm543_vm1, %v1906_v58  ;;  %v2043_v23 = vsel %vm543_vm1, %v2021_v53, 0 }
 0x422   : > { %v1805_v37 = vpop.permute.xlu0 %1804 }
 0x423   : > { %v2015_v30 = vpop.permute.xlu1 %2014  ;;  %6707 = vmatmul.mubr.msk.bf16.gmra.mrb[76].mxu0 %vm543_vm1, %v1805_v37 }
 0x424   : > { %6729 = vmatpush3.bf16.xpose.msra.mxu0 %v2040_v22 }
 0x425   : > { %7128 = vmatprep.subr.msk.bf16.mxu0 %vm543_vm1, %v2021_v53 }
 0x426   : > { %v2009_v18 = vpop.permute.xlu0 %2008 }
 0x427   : > { %v2514_v60 = vpop.permute.xlu1 %2513  ;;  %6734 = vmatprep.mubr.msk.bf16.mxu0 %vm543_vm1, %v2009_v18 }
 0x428   : > { %6742 = vmatprep.subr.bf16.mxu1 %v2514_v60 }
 0x429   : > { %6743 = vmatpush3.bf16.msra.mxu1 %v2514_v60 }
 0x42a   : > { %v1908_v0 = vpop.permute.xlu0 %1907 }
 0x42b   : > { %v2518_v34 = vpop.permute.xlu1 %2517  ;;  %6722 = vmatprep.mubr.msk.bf16.mxu1 %vm543_vm1, %v1908_v0 }
 0x42c   : > { %6731 = vmatpush3.bf16.xpose.msra.mxu0 %v2043_v23  ;;  %6723 = vmatmul.mubr.msk.bf16.gmra.mrb[36].mxu1 %vm543_vm1, %v1910_v61 }
 0x42d   : > { %7129 = vmatprep.subr.msk.bf16.mxu0 %vm543_vm1, %v2023_v52 }
 0x42e   : > { %v2013_v12 = vpop.permute.xlu0 %2012 }
 0x42f   : > { %v2603_v20 = vpop.permute.xlu1 %2602 }
 0x432   : > { %v2516_v32 = vpop.permute.xlu0 %2515 }
 0x433   : > { %6744 = vmatprep.subr.bf16.mxu1 %v2516_v32  ;;  %v8803_v55 = vpop.permute.xlu1 %2691 }
 0x434   : > { %6733 = vmatpush3.bf16.xpose.msra.mxu0 %v2046_v43  ;;  %6745 = vmatpush3.bf16.msra.mxu1 %v2516_v32 }
 0x435   : > { %6758 = vmatprep.subr.bf16.mxu0 %v2603_v20  ;;  %6746 = vmatprep.subr.bf16.mxu1 %v2518_v34 }
 0x436   : > { %v2520_v63 = vpop.permute.xlu0 %2519 }
 0x437   : > { %v2607_v44 = vpop.permute.xlu1 %2606 }
 0x438   : > { %6747 = vmatpush3.bf16.msra.mxu1 %v2518_v34 }
 0x439   : > { %6748 = vmatprep.subr.bf16.mxu1 %v2520_v63 }
 0x43a   : > { %v2605_v2 = vpop.permute.xlu0 %2604 }
 0x43b   : > { %6735 = vmatmul.mubr.msk.bf16.vlgmr.msra.gmra.mrb[80].mxu0 %vm543_vm1, %v2011_v10  ;;  %v8810_v11 = vpop.permute.xlu1 %2695 }
 0x43c   : > { %6738 = vmatprep.mubr.msk.bf16.mxu0 %vm543_vm1, %v2013_v12  ;;  %6759 = vmatpush3.bf16.msra.mxu0 %v2603_v20 }
 0x43d   : > { %6749 = vmatpush3.bf16.msra.mxu1 %v2520_v63  ;;  %6760 = vmatprep.subr.bf16.mxu0 %v2605_v2 }
 0x43e   : > { %6774 = vmatprep.subr.bf16.mxu1 %v8803_v55  ;;  %v8808_v28 = vpop.permute.xlu0 %2693 }
 0x43f   : > { %v8813_v62 = vpop.permute.xlu1 %2780 }
 0x440   : > { %6761 = vmatpush3.bf16.msra.mxu0 %v2605_v2  ;;  %11143 = vst [vmem:[#allocation7_spill] sm:$0xff] %v8813_v62 }
 0x441   : > { %6762 = vmatprep.subr.bf16.mxu0 %v2607_v44 }
 0x442   : > { %v2609_v13 = vpop.permute.xlu0 %2608 }
 0x443   : > { %6739 = vmatmul.mubr.msk.bf16.gmra.mrb[84].mxu0 %vm543_vm1, %v2015_v30 }
 0x444   : > { %6763 = vmatpush3.bf16.msra.mxu0 %v2607_v44 }
 0x445   : > { %6764 = vmatprep.subr.bf16.mxu0 %v2609_v13 }
 0x448   : > { %6765 = vmatpush3.bf16.msra.mxu0 %v2609_v13 }
 0x449   : > { %6790 = vmatprep.subr.bf16.mxu0 %v8813_v62 }
 0x475   : > { %v8816_v33 = vpop.f32.mrb[48].mxu0 }
 0x476   : > { %11144 = vst [vmem:[#allocation8_spill] sm:$0xff] %v8816_v33  ;;  %v8818_v21 = vpop.f32.mrb[49].mxu0 }
 0x477   : > { %11145 = vst [vmem:[#allocation9_spill] sm:$0xff] %v8818_v21  ;;  %v8820_v9 = vpop.f32.mrb[50].mxu0 }
 0x478   : > { %11146 = vst [vmem:[#allocation11_spill] sm:$0xff] %v8820_v9  ;;  %v8822_v47 = vpop.f32.mrb[51].mxu0 }
 0x479   : > { %11147 = vst [vmem:[#allocation20_spill] sm:$0xff] %v8822_v47  ;;  %v8996_v47 = vpop.permute.xlu0 %2697 }
 0x47d   : > { %v8824_v40 = vpop.f32.mrb[52].mxu0 }
 0x47e   : > { %11148 = vst [vmem:[#allocation12_spill] sm:$0xff] %v8824_v40  ;;  %v8826_v51 = vpop.f32.mrb[53].mxu0 }
 0x47f   : > { %11149 = vst [vmem:[#allocation17_spill] sm:$0xff] %v8826_v51  ;;  %v8828_v42 = vpop.f32.mrb[54].mxu0 }
 0x480   : > { %11150 = vst [vmem:[#allocation10_spill] sm:$0xff] %v8828_v42  ;;  %v8830_v14 = vpop.f32.mrb[55].mxu0 }
 0x481   : > { %11151 = vst [vmem:[#allocation13_spill] sm:$0xff] %v8830_v14 }
 0x48d   : > { %v8832_v39 = vpop.f32.mrb[56].mxu0 }
 0x48e   : > { %11152 = vst [vmem:[#allocation19_spill] sm:$0xff] %v8832_v39  ;;  %v8834_v41 = vpop.f32.mrb[57].mxu0 }
 0x48f   : > { %11153 = vst [vmem:[#allocation14_spill] sm:$0xff] %v8834_v41  ;;  %v8836_v8 = vpop.f32.mrb[58].mxu0 }
 0x490   : > { %11154 = vst [vmem:[#allocation15_spill] sm:$0xff] %v8836_v8  ;;  %v8838_v24 = vpop.f32.mrb[59].mxu0  ;;  %v9020_v8 = vpop.permute.xlu1 %2879 }
 0x491   : > { %11155 = vst [vmem:[#allocation16_spill] sm:$0xff] %v8838_v24  ;;  %11180 = vst [vmem:[#allocation44_spill] sm:$0xff] %v9020_v8 }
 0x494   : > { %v9024_v41 = vpop.permute.xlu1 %2982 }
 0x495   : > { %v8840_v1 = vpop.f32.mrb[60].mxu0  ;;  %11182 = vst [vmem:[#allocation46_spill] sm:$0xff] %v9024_v41 }
 0x496   : > { %11156 = vst [vmem:[#allocation18_spill] sm:$0xff] %v8840_v1  ;;  %v8842_v19 = vpop.f32.mrb[61].mxu0 }
 0x497   : > { %11157 = vst [vmem:[#allocation21_spill] sm:$0xff] %v8842_v19  ;;  %v8844_v58 = vpop.f32.mrb[62].mxu0 }
 0x498   : > { %11158 = vst [vmem:[#allocation22_spill] sm:$0xff] %v8844_v58  ;;  %v8846_v31 = vpop.f32.mrb[63].mxu0  ;;  %v9008_v58 = vpop.permute.xlu0 %2782 }
 0x499   : > { %11159 = vst [vmem:[#allocation23_spill] sm:$0xff] %v8846_v31  ;;  %11176 = vst [vmem:[#allocation40_spill] sm:$0xff] %v9008_v58  ;;  %v9028_v24 = vpop.permute.xlu1 %2869 }
 0x49a   : > { %11184 = vst [vmem:[#allocation48_spill] sm:$0xff] %v9028_v24 }
 0x49c   : > { %v9012_v19 = vpop.permute.xlu0 %2877 }
 0x49d   : > { %v8848_v17 = vpop.f32.mrb[16].mxu1 }
 0x49e   : > { %11160 = vst [vmem:[#allocation24_spill] sm:$0xff] %v8848_v17  ;;  %v8850_v50 = vpop.f32.mrb[17].mxu1 }
 0x49f   : > { %11161 = vst [vmem:[#allocation25_spill] sm:$0xff] %v8850_v50  ;;  %v8852_v54 = vpop.f32.mrb[18].mxu1 }
 0x4a0   : > { %11162 = vst [vmem:[#allocation26_spill] sm:$0xff] %v8852_v54  ;;  %v8854_v27 = vpop.f32.mrb[19].mxu1  ;;  %v9014_v31 = vpop.permute.xlu0 %2784 }
 0x4a1   : > { %11163 = vst [vmem:[#allocation27_spill] sm:$0xff] %v8854_v27  ;;  %11177 = vst [vmem:[#allocation41_spill] sm:$0xff] %v9014_v31 }
 0x4a4   : > { %v9016_v39 = vpop.permute.xlu0 %2786 }
 0x4a5   : > { %v8856_v29 = vpop.f32.mrb[20].mxu1  ;;  %11178 = vst [vmem:[#allocation42_spill] sm:$0xff] %v9016_v39 }
 0x4a6   : > { %11164 = vst [vmem:[#allocation28_spill] sm:$0xff] %v8856_v29  ;;  %v8858_v52 = vpop.f32.mrb[21].mxu1 }
 0x4a7   : > { %11165 = vst [vmem:[#allocation29_spill] sm:$0xff] %v8858_v52  ;;  %v8860_v38 = vpop.f32.mrb[22].mxu1 }
 0x4a8   : > { %11166 = vst [vmem:[#allocation30_spill] sm:$0xff] %v8860_v38  ;;  %v8862_v3 = vpop.f32.mrb[23].mxu1 }
 0x4a9   : > { %11167 = vst [vmem:[#allocation31_spill] sm:$0xff] %v8862_v3 }
 0x4ad   : > { %v8864_v10 = vpop.f32.mrb[64].mxu0 }
 0x4ae   : > { %11168 = vst [vmem:[#allocation32_spill] sm:$0xff] %v8864_v10  ;;  %v8866_v48 = vpop.f32.mrb[65].mxu0 }
 0x4af   : > { %11169 = vst [vmem:[#allocation33_spill] sm:$0xff] %v8866_v48  ;;  %v8868_v53 = vpop.f32.mrb[66].mxu0 }
 0x4b0   : > { %11170 = vst [vmem:[#allocation34_spill] sm:$0xff] %v8868_v53  ;;  %v8870_v61 = vpop.f32.mrb[67].mxu0 }
 0x4b1   : > { %11171 = vst [vmem:[#allocation35_spill] sm:$0xff] %v8870_v61 }
 0x4bd   : > { %v8872_v37 = vpop.f32.mrb[24].mxu1 }
 0x4be   : > { %v8874_v30 = vpop.f32.mrb[25].mxu1  ;;  %v2119_v22 = vsel %vm936_vm2, %v8872_v37, -inf }
 0x4bf   : > { %2120 = vmax.xlane.f32.xlu0 %v2119_v22  ;;  %v8878_v18 = vpop.f32.mrb[26].mxu1  ;;  %v2113_v34 = vsel %vm936_vm2, %v8874_v30, -inf }
 0x4c0   : > { %v8880_v60 = vpop.f32.mrb[27].mxu1  ;;  %v2122_v23 = vsel %vm936_vm2, %v8878_v18, -inf }
 0x4c1   : > { %v2116_v0 = vsel %vm936_vm2, %v8880_v60, -inf }
 0x4c2   : > { %2117 = vmax.xlane.f32.xlu1 %v2116_v0 }
 0x4c3   : > { %2114 = vmax.xlane.f32.xlu0 %v2113_v34 }
 0x4c7   : > { %2123 = vmax.xlane.f32.xlu0 %v2122_v23 }
 0x4e6   : > { %v8888_v12 = vpop.f32.mrb[68].mxu0 }
 0x4e7   : > { %11172 = vst [vmem:[#allocation36_spill] sm:$0xff] %v8888_v12  ;;  %v8890_v20 = vpop.f32.mrb[69].mxu0  ;;  %v8892_v32 = vpop.f32.mrb[28].mxu1 }
 0x4e8   : > { %11173 = vst [vmem:[#allocation37_spill] sm:$0xff] %v8890_v20  ;;  %v8894_v43 = vpop.f32.mrb[70].mxu0  ;;  %v8896_v63 = vpop.f32.mrb[29].mxu1  ;;  %v2131_v2 = vsel %vm936_vm2, %v8892_v32, -inf }
 0x4e9   : > { %11174 = vst [vmem:[#allocation38_spill] sm:$0xff] %v8894_v43  ;;  %v8900_v44 = vpop.f32.mrb[71].mxu0  ;;  %2132 = vmax.xlane.f32.xlu1 %v2131_v2  ;;  %v8902_v13 = vpop.f32.mrb[30].mxu1  ;;  %v2125_v34 = vsel %vm936_vm2, %v8896_v63, -inf }
 0x4ea   : > { %11175 = vst [vmem:[#allocation39_spill] sm:$0xff] %v8900_v44  ;;  %v8904_v22 = vpop.f32.mrb[31].mxu1  ;;  %v2134_v0 = vsel %vm936_vm2, %v8902_v13, -inf }
 0x4eb   : > { %2135 = vmax.xlane.f32.xlu0 %v2134_v0  ;;  %v2128_v20 = vsel %vm936_vm2, %v8904_v22, -inf }
 0x4ed   : > { %2126 = vmax.xlane.f32.xlu1 %v2125_v34 }
 0x4ee   : > { %v8910_v23 = vpop.f32.mrb[72].mxu0 }
 0x4ef   : > { %v8914_v12 = vpop.f32.mrb[73].mxu0  ;;  %2129 = vmax.xlane.f32.xlu0 %v2128_v20  ;;  %v2143_v2 = vsel %vm936_vm2, %v8910_v23, -inf }
 0x4f0   : > { %v8918_v44 = vpop.f32.mrb[74].mxu0  ;;  %v2137_v20 = vsel %vm936_vm2, %v8914_v12, -inf }
 0x4f1   : > { %v8920_v43 = vpop.f32.mrb[75].mxu0  ;;  %2144 = vmax.xlane.f32.xlu1 %v2143_v2  ;;  %v2146_v0 = vsel %vm936_vm2, %v8918_v44, -inf }
 0x4f2   : > { %v8924_v34 = vpop.f32.mrb[32].mxu1  ;;  %v2140_v2 = vsel %vm936_vm2, %v8920_v43, -inf }
 0x4f3   : > { %2147 = vmax.xlane.f32.xlu0 %v2146_v0  ;;  %v8926_v48 = vpop.f32.mrb[33].mxu1 }
 0x4f4   : > { %v8928_v61 = vpop.f32.mrb[34].mxu1 }
 0x4f5   : > { %2138 = vmax.xlane.f32.xlu1 %v2137_v20  ;;  %v8932_v10 = vpop.f32.mrb[35].mxu1 }
 0x4f6   : > { %v8934_v53 = vpop.f32.mrb[76].mxu0 }
 0x4f7   : > { %2141 = vmax.xlane.f32.xlu0 %v2140_v2  ;;  %v8938_v52 = vpop.f32.mrb[77].mxu0  ;;  %v2155_v0 = vsel %vm936_vm2, %v8934_v53, -inf }
 0x4f8   : > { %v8942_v3 = vpop.f32.mrb[78].mxu0  ;;  %v2149_v38 = vsel %vm936_vm2, %v8938_v52, -inf }
 0x4f9   : > { %2156 = vmax.xlane.f32.xlu1 %v2155_v0  ;;  %v8944_v29 = vpop.f32.mrb[79].mxu0  ;;  %v2158_v20 = vsel %vm936_vm2, %v8942_v3, -inf  ;;  %v2167_v0 = vsel %vm936_vm2, %v8924_v34, -inf }
 0x4fa   : > { %v2152_v2 = vsel %vm936_vm2, %v8944_v29, -inf }
 0x4fb   : > { %2159 = vmax.xlane.f32.xlu0 %v2158_v20  ;;  %v2170_v20 = vsel %vm936_vm2, %v8928_v61, -inf }
 0x4fd   : > { %2150 = vmax.xlane.f32.xlu1 %v2149_v38  ;;  %v2161_v38 = vsel %vm936_vm2, %v8926_v48, -inf }
 0x4ff   : > { %2153 = vmax.xlane.f32.xlu0 %v2152_v2  ;;  %v8952_v54 = vpop.f32.mrb[36].mxu1  ;;  %v2164_v2 = vsel %vm936_vm2, %v8932_v10, -inf }
 0x500   : > { %v8954_v50 = vpop.f32.mrb[37].mxu1  ;;  %v2179_v40 = vsel %vm936_vm2, %v8952_v54, -inf }
 0x501   : > { %2168 = vmax.xlane.f32.xlu1 %v2167_v0  ;;  %v8958_v27 = vpop.f32.mrb[38].mxu1  ;;  %v2173_v42 = vsel %vm936_vm2, %v8954_v50, -inf }
 0x502   : > { %v8960_v17 = vpop.f32.mrb[39].mxu1  ;;  %v2182_v0 = vsel %vm936_vm2, %v8958_v27, -inf }
 0x503   : > { %2171 = vmax.xlane.f32.xlu0 %v2170_v20 }
 0x505   : > { %2162 = vmax.xlane.f32.xlu1 %v2161_v38  ;;  %v2176_v38 = vsel %vm936_vm2, %v8960_v17, -inf }
 0x507   : > { %2165 = vmax.xlane.f32.xlu0 %v2164_v2 }
 0x509   : > { %2180 = vmax.xlane.f32.xlu1 %v2179_v40 }
 0x50b   : > { %2183 = vmax.xlane.f32.xlu0 %v2182_v0 }
 0x50d   : > { %2174 = vmax.xlane.f32.xlu1 %v2173_v42 }
 0x50e   : > { %v8974_v20 = vpop.f32.mrb[80].mxu0 }
 0x50f   : > { %v8978_v51 = vpop.f32.mrb[81].mxu0  ;;  %2177 = vmax.xlane.f32.xlu0 %v2176_v38  ;;  %v2191_v40 = vsel %vm936_vm2, %v8974_v20, -inf }
 0x510   : > { %v8980_v2 = vpop.f32.mrb[82].mxu0  ;;  %v2185_v42 = vsel %vm936_vm2, %v8978_v51, -inf }
 0x511   : > { %v8984_v14 = vpop.f32.mrb[83].mxu0  ;;  %2192 = vmax.xlane.f32.xlu1 %v2191_v40  ;;  %v2194_v0 = vsel %vm936_vm2, %v8980_v2, -inf }
 0x512   : > { %v2188_v38 = vsel %vm936_vm2, %v8984_v14, -inf }
 0x513   : > { %2195 = vmax.xlane.f32.xlu0 %v2194_v0 }
 0x515   : > { %2186 = vmax.xlane.f32.xlu1 %v2185_v42 }
 0x516   : > { %v8990_v33 = vpop.f32.mrb[84].mxu0 }
 0x517   : > { %v8994_v9 = vpop.f32.mrb[85].mxu0  ;;  %2189 = vmax.xlane.f32.xlu0 %v2188_v38  ;;  %v2203_v40 = vsel %vm936_vm2, %v8990_v33, -inf }
 0x518   : > { %v8998_v21 = vpop.f32.mrb[86].mxu0  ;;  %v2197_v1 = vsel %vm936_vm2, %v8994_v9, -inf }
 0x519   : > { %v9002_v0 = vpop.f32.mrb[87].mxu0  ;;  %2204 = vmax.xlane.f32.xlu1 %v2203_v40  ;;  %v2206_v42 = vsel %vm936_vm2, %v8998_v21, -inf  ;;  %v9018_v40 = vpop.permute.xlu0 %2881 }
 0x51a   : > { %v2200_v38 = vsel %vm936_vm2, %v9002_v0, -inf  ;;  %11179 = vst [vmem:[#allocation43_spill] sm:$0xff] %v9018_v40 }
 0x51b   : > { %2207 = vmax.xlane.f32.xlu0 %v2206_v42 }
 0x51d   : > { %2198 = vmax.xlane.f32.xlu1 %v2197_v1  ;;  %v9022_v42 = vpop.permute.xlu0 %2883 }
 0x51e   : > { %11181 = vst [vmem:[#allocation45_spill] sm:$0xff] %v9022_v42 }
 0x51f   : > { %2201 = vmax.xlane.f32.xlu0 %v2200_v38  ;;  %v9032_v38 = vpop.permute.xlu1 %3087 }
 0x520   : > { %11186 = vst [vmem:[#allocation50_spill] sm:$0xff] %v9032_v38 }
 0x521   : > { %v9026_v1 = vpop.permute.xlu0 %2984 }
 0x522   : > { %11183 = vst [vmem:[#allocation47_spill] sm:$0xff] %v9026_v1 }
 0x525   : > { %v9030_v58 = vpop.permute.xlu0 %2986 }
 0x526   : > { %11185 = vst [vmem:[#allocation49_spill] sm:$0xff] %v9030_v58 }
 0x54c   : > { %v2121_v49 = vpop.xlane.xlu0 %2120 }
 0x54d   : > { %v2211_v31 = vsub.f32 %v8872_v37, %v2121_v49 }
 0x54f   : > { %v2245_v39 = vmul.f32 1.442695, %v2211_v31  ;;  %v2118_v62 = vpop.xlane.xlu1 %2117 }
 0x550   : > { %v2115_v40 = vpop.xlane.xlu0 %2114  ;;  %v2210_v42 = vsub.f32 %v8880_v60, %v2118_v62 }
 0x551   : > { %7556 = vpow2.f32 %v2245_v39  ;;  %v2209_v8 = vsub.f32 %v8874_v30, %v2115_v40 }
 0x552   : > { %v2243_v24 = vmul.f32 1.442695, %v2210_v42 }
 0x553   : > { %v2241_v41 = vmul.f32 1.442695, %v2209_v8 }
 0x554   : > { %v2124_v4 = vpop.xlane.xlu0 %2123 }
 0x555   : > { %7558 = vpow2.f32 %v2241_v41  ;;  %v2212_v1 = vsub.f32 %v8878_v18, %v2124_v4 }
 0x557   : > { %v2247_v58 = vmul.f32 1.442695, %v2212_v1 }
 0x559   : > { %7560 = vpow2.f32 %v2247_v58 }
 0x55a   : > { %7562 = vpow2.f32 %v2243_v24 }
 0x55b   : > { %v9038_v38 = vpop.eup %7556 }
 0x55c   : > { %v2311_v49 = vsel %vm936_vm2, %v9038_v38, 0.0 }
 0x55d   : > { %2312 = vadd.xlane.f32.xlu1 %v2311_v49 }
 0x55f   : > { %v9042_v39 = vpop.eup %7558 }
 0x560   : > { %v2305_v62 = vsel %vm936_vm2, %v9042_v39, 0.0 }
 0x561   : > { %2306 = vadd.xlane.f32.xlu1 %v2305_v62 }
 0x563   : > { %v9046_v8 = vpop.eup %7560 }
 0x564   : > { %v2314_v4 = vsel %vm936_vm2, %v9046_v8, 0.0  ;;  %v9050_v41 = vpop.eup %7562 }
 0x565   : > { %2315 = vadd.xlane.f32.xlu0 %v2314_v4  ;;  %v2308_v24 = vsel %vm936_vm2, %v9050_v41, 0.0 }
 0x569   : > { %2309 = vadd.xlane.f32.xlu0 %v2308_v24 }
 0x576   : > { %v2133_v58 = vpop.xlane.xlu1 %2132 }
 0x577   : > { %v2215_v31 = vsub.f32 %v8892_v32, %v2133_v58 }
 0x578   : > { %v2136_v37 = vpop.xlane.xlu0 %2135 }
 0x579   : > { %v2253_v30 = vmul.f32 1.442695, %v2215_v31  ;;  %v2216_v18 = vsub.f32 %v8902_v13, %v2136_v37 }
 0x57a   : > { %v2127_v60 = vpop.xlane.xlu1 %2126 }
 0x57b   : > { %7564 = vpow2.f32 %v2253_v30  ;;  %v2255_v40 = vmul.f32 1.442695, %v2216_v18  ;;  %v2213_v42 = vsub.f32 %v8896_v63, %v2127_v60 }
 0x57c   : > { %v2130_v1 = vpop.xlane.xlu0 %2129 }
 0x57d   : > { %7566 = vpow2.f32 %v2255_v40  ;;  %v2249_v49 = vmul.f32 1.442695, %v2213_v42  ;;  %v2214_v62 = vsub.f32 %v8904_v22, %v2130_v1 }
 0x57e   : > { %v2145_v4 = vpop.xlane.xlu1 %2144 }
 0x57f   : > { %7568 = vpow2.f32 %v2249_v49  ;;  %v2251_v24 = vmul.f32 1.442695, %v2214_v62  ;;  %v2219_v26 = vsub.f32 %v8910_v23, %v2145_v4 }
 0x580   : > { %v2148_v32 = vpop.xlane.xlu0 %2147 }
 0x581   : > { %7570 = vpow2.f32 %v2251_v24  ;;  %v2261_v58 = vmul.f32 1.442695, %v2219_v26  ;;  %v2220_v13 = vsub.f32 %v8918_v44, %v2148_v32 }
 0x582   : > { %v2139_v31 = vpop.xlane.xlu1 %2138 }
 0x583   : > { %7572 = vpow2.f32 %v2261_v58  ;;  %v2217_v37 = vsub.f32 %v8914_v12, %v2139_v31  ;;  %v2263_v18 = vmul.f32 1.442695, %v2220_v13 }
 0x584   : > { %v2142_v63 = vpop.xlane.xlu0 %2141 }
 0x585   : > { %v9061_v30 = vpop.eup %7564  ;;  %v2257_v60 = vmul.f32 1.442695, %v2217_v37  ;;  %v2218_v22 = vsub.f32 %v8920_v43, %v2142_v63 }
 0x586   : > { %v2157_v40 = vpop.xlane.xlu1 %2156  ;;  %v2323_v23 = vsel %vm936_vm2, %v9061_v30, 0.0 }
 0x587   : > { %v9066_v42 = vpop.eup %7566  ;;  %7574 = vpow2.f32 %v2257_v60  ;;  %2324 = vadd.xlane.f32.xlu0 %v2323_v23  ;;  %v2259_v26 = vmul.f32 1.442695, %v2218_v22  ;;  %v2223_v44 = vsub.f32 %v8934_v53, %v2157_v40 }
 0x588   : > { %v2160_v1 = vpop.xlane.xlu0 %2159  ;;  %7576 = vpow2.f32 %v2263_v18  ;;  %v2326_v4 = vsel %vm936_vm2, %v9066_v42, 0.0 }
 0x589   : > { %v9069_v12 = vpop.eup %7568  ;;  %v2224_v49 = vsub.f32 %v8942_v3, %v2160_v1  ;;  %7578 = vpow2.f32 %v2259_v26  ;;  %v2269_v53 = vmul.f32 1.442695, %v2223_v44 }
 0x58a   : > { %v2151_v62 = vpop.xlane.xlu1 %2150  ;;  %v2317_v43 = vsel %vm936_vm2, %v9069_v12, 0.0 }
 0x58b   : > { %v9076_v24 = vpop.eup %7570  ;;  %v2271_v32 = vmul.f32 1.442695, %v2224_v49  ;;  %2318 = vadd.xlane.f32.xlu1 %v2317_v43  ;;  %2327 = vadd.xlane.f32.xlu0 %v2326_v4  ;;  %v2221_v3 = vsub.f32 %v8938_v52, %v2151_v62 }
 0x58c   : > { %v2154_v58 = vpop.xlane.xlu0 %2153  ;;  %v2320_v18 = vsel %vm936_vm2, %v9076_v24, 0.0 }
 0x58d   : > { %v9078_v13 = vpop.eup %7572  ;;  %7580 = vpow2.f32 %v2271_v32  ;;  %v2222_v31 = vsub.f32 %v8944_v29, %v2154_v58  ;;  %v2265_v26 = vmul.f32 1.442695, %v2221_v3 }
 0x58e   : > { %v2169_v37 = vpop.xlane.xlu1 %2168  ;;  %v2335_v63 = vsel %vm936_vm2, %v9078_v13, 0.0  ;;  %7582 = vpow2.f32 %v2269_v53 }
 0x58f   : > { %v2267_v60 = vmul.f32 1.442695, %v2222_v31  ;;  %v2227_v22 = vsub.f32 %v8924_v34, %v2169_v37  ;;  %2336 = vadd.xlane.f32.xlu1 %v2335_v63  ;;  %2321 = vadd.xlane.f32.xlu0 %v2320_v18 }
 0x590   : > { %v2172_v40 = vpop.xlane.xlu0 %2171 }
 0x591   : > { %v9087_v23 = vpop.eup %7574  ;;  %7584 = vpow2.f32 %v2267_v60  ;;  %v2277_v52 = vmul.f32 1.442695, %v2227_v22  ;;  %v2228_v62 = vsub.f32 %v8928_v61, %v2172_v40 }
 0x592   : > { %v2163_v29 = vpop.xlane.xlu1 %2162  ;;  %v2329_v44 = vsel %vm936_vm2, %v9087_v23, 0.0  ;;  %v9091_v1 = vpop.eup %7576 }
 0x593   : > { %7586 = vpow2.f32 %v2277_v52  ;;  %v2225_v49 = vsub.f32 %v8926_v48, %v2163_v29  ;;  %2330 = vadd.xlane.f32.xlu0 %v2329_v44  ;;  %v9096_v32 = vpop.eup %7578  ;;  %v2338_v58 = vsel %vm936_vm2, %v9091_v1, 0.0  ;;  %v2279_v63 = vmul.f32 1.442695, %v2228_v62 }
 0x594   : > { %v2166_v34 = vpop.xlane.xlu0 %2165  ;;  %7588 = vpow2.f32 %v2265_v26  ;;  %v2332_v22 = vsel %vm936_vm2, %v9096_v32, 0.0 }
 0x595   : > { %v2273_v43 = vmul.f32 1.442695, %v2225_v49  ;;  %v2226_v4 = vsub.f32 %v8932_v10, %v2166_v34 }
 0x596   : > { %v2181_v53 = vpop.xlane.xlu1 %2180 }
 0x597   : > { %v9100_v3 = vpop.eup %7580  ;;  %v2275_v31 = vmul.f32 1.442695, %v2226_v4  ;;  %v2231_v37 = vsub.f32 %v8952_v54, %v2181_v53  ;;  %2339 = vadd.xlane.f32.xlu0 %v2338_v58  ;;  %7590 = vpow2.f32 %v2273_v43 }
 0x598   : > { %v2184_v48 = vpop.xlane.xlu0 %2183  ;;  %v2350_v61 = vsel %vm936_vm2, %v9100_v3, 0.0  ;;  %v9105_v18 = vpop.eup %7582 }
 0x599   : > { %7592 = vpow2.f32 %v2275_v31  ;;  %v2285_v10 = vmul.f32 1.442695, %v2231_v37  ;;  %2351 = vadd.xlane.f32.xlu1 %v2350_v61  ;;  %v2232_v26 = vsub.f32 %v8958_v27, %v2184_v48  ;;  %v2347_v43 = vsel %vm936_vm2, %v9105_v18, 0.0 }
 0x59a   : > { %v2175_v60 = vpop.xlane.xlu1 %2174 }
 0x59b   : > { %v9109_v40 = vpop.eup %7584  ;;  %7594 = vpow2.f32 %v2285_v10  ;;  %v2229_v54 = vsub.f32 %v8954_v50, %v2175_v60  ;;  %2333 = vadd.xlane.f32.xlu0 %v2332_v22  ;;  %v2287_v27 = vmul.f32 1.442695, %v2232_v26 }
 0x59c   : > { %v2178_v52 = vpop.xlane.xlu0 %2177  ;;  %v2344_v29 = vsel %vm936_vm2, %v9109_v40, 0.0  ;;  %7596 = vpow2.f32 %v2279_v63 }
 0x59d   : > { %v9115_v44 = vpop.eup %7586  ;;  %v2281_v49 = vmul.f32 1.442695, %v2229_v54  ;;  %v2230_v34 = vsub.f32 %v8960_v17, %v2178_v52  ;;  %2345 = vadd.xlane.f32.xlu1 %v2344_v29 }
 0x59e   : > { %v2193_v62 = vpop.xlane.xlu1 %2192  ;;  %v9120_v4 = vpop.eup %7588  ;;  %v2359_v31 = vsel %vm936_vm2, %v9115_v44, 0.0 }
 0x59f   : > { %v2283_v50 = vmul.f32 1.442695, %v2230_v34  ;;  %2348 = vadd.xlane.f32.xlu0 %v2347_v43  ;;  %7598 = vpow2.f32 %v2281_v49  ;;  %v2235_v53 = vsub.f32 %v8974_v20, %v2193_v62  ;;  %v2341_v61 = vsel %vm936_vm2, %v9120_v4, 0.0 }
 0x5a0   : > { %v2196_v58 = vpop.xlane.xlu0 %2195 }
 0x5a1   : > { %7600 = vpow2.f32 %v2283_v50  ;;  %v2236_v17 = vsub.f32 %v8980_v2, %v2196_v58  ;;  %2360 = vadd.xlane.f32.xlu1 %v2359_v31  ;;  %v9126_v37 = vpop.eup %7590  ;;  %v2293_v20 = vmul.f32 1.442695, %v2235_v53 }
 0x5a2   : > { %v2187_v48 = vpop.xlane.xlu1 %2186  ;;  %7602 = vpow2.f32 %v2287_v27  ;;  %v2353_v52 = vsel %vm936_vm2, %v9126_v37, 0.0 }
 0x5a3   : > { %v9130_v63 = vpop.eup %7592  ;;  %v2295_v10 = vmul.f32 1.442695, %v2236_v17  ;;  %2342 = vadd.xlane.f32.xlu0 %v2341_v61  ;;  %v2233_v2 = vsub.f32 %v8978_v51, %v2187_v48 }
 0x5a4   : > { %v2190_v60 = vpop.xlane.xlu0 %2189  ;;  %v2356_v22 = vsel %vm936_vm2, %v9130_v63, 0.0 }
 0x5a5   : > { %v9134_v54 = vpop.eup %7594  ;;  %7604 = vpow2.f32 %v2295_v10  ;;  %v2234_v26 = vsub.f32 %v8984_v14, %v2190_v60  ;;  %2357 = vadd.xlane.f32.xlu1 %v2356_v22  ;;  %v2289_v62 = vmul.f32 1.442695, %v2233_v2 }
 0x5a6   : > { %v9140_v29 = vpop.eup %7596  ;;  %7606 = vpow2.f32 %v2293_v20  ;;  %v2371_v34 = vsel %vm936_vm2, %v9134_v54, 0.0 }
 0x5a7   : > { %v2291_v49 = vmul.f32 1.442695, %v2234_v26  ;;  %2354 = vadd.xlane.f32.xlu0 %v2353_v52  ;;  %v2362_v51 = vsel %vm936_vm2, %v9140_v29, 0.0 }
 0x5a8   : > { %v2208_v2 = vpop.xlane.xlu0 %2207 }
 0x5a9   : > { %7608 = vpow2.f32 %v2291_v49  ;;  %2372 = vadd.xlane.f32.xlu1 %v2371_v34  ;;  %v9144_v43 = vpop.eup %7598  ;;  %v2205_v49 = vpop.xlane.xlu1 %2204 }
 0x5aa   : > { %7610 = vpow2.f32 %v2289_v62  ;;  %v2365_v53 = vsel %vm936_vm2, %v9144_v43, 0.0  ;;  %v2239_v62 = vsub.f32 %v8990_v33, %v2205_v49 }
 0x5ab   : > { %v9148_v14 = vpop.eup %7600  ;;  %2363 = vadd.xlane.f32.xlu0 %v2362_v51 }
 0x5ac   : > { %v2368_v50 = vsel %vm936_vm2, %v9148_v14, 0.0  ;;  %v9152_v27 = vpop.eup %7602  ;;  %v2202_v26 = vpop.xlane.xlu0 %2201 }
 0x5ad   : > { %2369 = vadd.xlane.f32.xlu1 %v2368_v50  ;;  %v2374_v48 = vsel %vm936_vm2, %v9152_v27, 0.0  ;;  %v2238_v52 = vsub.f32 %v9002_v0, %v2202_v26  ;;  %v2199_v51 = vpop.xlane.xlu1 %2198  ;;  %v2301_v50 = vmul.f32 1.442695, %v2239_v62 }
 0x5af   : > { %v9156_v58 = vpop.eup %7604  ;;  %2366 = vadd.xlane.f32.xlu0 %v2365_v53  ;;  %v2299_v34 = vmul.f32 1.442695, %v2238_v52  ;;  %v2237_v53 = vsub.f32 %v8994_v9, %v2199_v51 }
 0x5b0   : > { %v2386_v31 = vsel %vm936_vm2, %v9156_v58, 0.0  ;;  %v9160_v17 = vpop.eup %7606 }
 0x5b1   : > { %2387 = vadd.xlane.f32.xlu1 %v2386_v31  ;;  %v2383_v20 = vsel %vm936_vm2, %v9160_v17, 0.0  ;;  %7612 = vpow2.f32 %v2299_v34  ;;  %v2240_v31 = vsub.f32 %v8998_v21, %v2208_v2 }
 0x5b2   : > { %7614 = vpow2.f32 %v2301_v50 }
 0x5b3   : > { %v9164_v61 = vpop.eup %7608  ;;  %2375 = vadd.xlane.f32.xlu0 %v2374_v48  ;;  %v2297_v48 = vmul.f32 1.442695, %v2237_v53 }
 0x5b4   : > { %v2380_v10 = vsel %vm936_vm2, %v9164_v61, 0.0  ;;  %v9170_v60 = vpop.eup %7610 }
 0x5b5   : > { %2381 = vadd.xlane.f32.xlu1 %v2380_v10  ;;  %v2377_v22 = vsel %vm936_vm2, %v9170_v60, 0.0  ;;  %7616 = vpow2.f32 %v2297_v48 }
 0x5b7   : > { %2384 = vadd.xlane.f32.xlu0 %v2383_v20  ;;  %v2303_v20 = vmul.f32 1.442695, %v2240_v31 }
 0x5b9   : > { %7618 = vpow2.f32 %v2303_v20 }
 0x5bb   : > { %2378 = vadd.xlane.f32.xlu0 %v2377_v22  ;;  %v9182_v10 = vpop.eup %7612 }
 0x5bc   : > { %v2392_v0 = vsel %vm936_vm2, %v9182_v10, 0.0  ;;  %v9186_v22 = vpop.eup %7614 }
 0x5bd   : > { %v2395_v26 = vsel %vm936_vm2, %v9186_v22, 0.0 }
 0x5bf   : > { %v9190_v9 = vpop.eup %7616 }
 0x5c0   : > { %v2389_v52 = vsel %vm936_vm2, %v9190_v9, 0.0 }
 0x5c3   : > { %v9194_v49 = vpop.eup %7618 }
 0x5c4   : > { %v2398_v62 = vsel %vm936_vm2, %v9194_v49, 0.0 }
 0x5c6   : > { %2988 = vrot.lane.b32.xlu1 %v8113_v25, %s7953_s11 }
 0x5d1   : > { %2871 = vrot.lane.b32.xlu0 %v8073_v59, %s7954_s12 }
 0x5ea   : > { %2393 = vadd.xlane.f32.xlu1 %v2392_v0  ;;  %v2313_v33 = vpop.xlane.xlu1 %2312 }
 0x5ee   : > { %v2307_v21 = vpop.xlane.xlu1 %2306 }
 0x5f0   : > { %2396 = vadd.xlane.f32.xlu0 %v2395_v26 }
 0x5f2   : > { %v2316_v2 = vpop.xlane.xlu0 %2315 }
 0x5f3   : > { %7620 = vrcp.f32 %v2316_v2 }
 0x5f4   : > { %2390 = vadd.xlane.f32.xlu0 %v2389_v52  ;;  %7622 = vrcp.f32 %v2307_v21 }
 0x5f5   : > { %7624 = vrcp.f32 %v2313_v33 }
 0x5f6   : > { %v2310_v34 = vpop.xlane.xlu0 %2309 }
 0x5f7   : > { %7626 = vrcp.f32 %v2310_v34  ;;  %v11187_v34 = vld [vmem:[#allocation5_spill] sm:$0xff] }
 0x5f8   : > { %2399 = vadd.xlane.f32.xlu0 %v2398_v62 }
 0x5fb   : > { %2974 = vrot.lane.b32.xlu1 %v8101_v16, %s7954_s12 }
 0x5fd   : > { %v7621_v51 = vpop.eup %7620 }
 0x5fe   : > { %v7623_v50 = vpop.eup %7622  ;;  %v2468_v48 = vmul.f32 %v7621_v51, %v9046_v8 }
 0x5ff   : > { %3192 = vrot.lane.b32.xlu1 %v8151_v57, %s7953_s11  ;;  %v7625_v53 = vpop.eup %7624  ;;  %v2465_v20 = vmul.f32 %v7623_v50, %v9042_v39 }
 0x600   : > { %v2467_v33 = vmul.f32 %v7625_v53, %v9038_v38 }
 0x601   : > { %v7627_v31 = vpop.eup %7626 }
 0x602   : > { %v2466_v0 = vmul.f32 %v7627_v31, %v9050_v41  ;;  %v2498_v21 = vpack.c.bf16 %v2468_v48, %v2467_v33 }
 0x603   : > { %2873 = vrot.lane.b32.xlu1 %v8089_v6, %s7954_s12 }
 0x604   : > { %v2497_v26 = vpack.c.bf16 %v2466_v0, %v2465_v20  ;;  %v11188_v0 = vld [vmem:[#allocation6_spill] sm:$0xff] }
 0x606   : > { %6750 = vmatprep.mubr.msk.bf16.mxu1 %vm936_vm2, %v2497_v26 }
 0x607   : > { %6751 = vmatmul.mubr.msk.bf16.vlgmr.msra.gmra.mrb[40].mxu1 %vm936_vm2, %v2498_v21  ;;  %3093 = vrot.lane.b32.xlu1 %v8137_v45, %s7953_s11 }
 0x608   : > { %6775 = vmatpush3.bf16.msra.mxu1 %v8803_v55 }
 0x609   : > { %6776 = vmatprep.subr.bf16.mxu1 %v8808_v28 }
 0x60b   : > { %3079 = vrot.lane.b32.xlu1 %v8127_v36, %s7954_s12 }
 0x60c   : > { %6777 = vmatpush3.bf16.msra.mxu1 %v8808_v28 }
 0x60d   : > { %6778 = vmatprep.subr.bf16.mxu1 %v8810_v11 }
 0x60e   : > { %3089 = vrot.lane.b32.xlu0 %v8125_v35, %s7953_s11 }
 0x60f   : > { %3196 = vrot.lane.b32.xlu1 %v8163_v7, %s7953_s11 }
 0x610   : > { %6779 = vmatpush3.bf16.msra.mxu1 %v8810_v11 }
 0x611   : > { %6780 = vmatprep.subr.bf16.mxu1 %v8996_v47 }
 0x612   : > { %3091 = vrot.lane.b32.xlu0 %v8139_v46, %s7953_s11 }
 0x613   : > { %2980 = vrot.lane.b32.xlu1 %v8113_v25, %s7954_s12 }
 0x614   : > { %6781 = vmatpush3.bf16.msra.mxu1 %v8996_v47  ;;  %v2325_v55 = vpop.xlane.xlu0 %2324 }
 0x615   : > { %7130 = vmatprep.subr.msk.bf16.mxu1 %vm543_vm1, %v9012_v19 }
 0x616   : > { %2976 = vrot.lane.b32.xlu0 %v8099_v15, %s7954_s12 }
 0x617   : > { %3184 = vrot.lane.b32.xlu1 %v8151_v57, %s7954_s12 }
 0x618   : > { %v2328_v28 = vpop.xlane.xlu0 %2327  ;;  %v2319_v11 = vpop.xlane.xlu1 %2318 }
 0x619   : > { %7628 = vrcp.f32 %v2328_v28 }
 0x61a   : > { %2875 = vrot.lane.b32.xlu0 %v8087_v5, %s7954_s12  ;;  %7630 = vrcp.f32 %v2319_v11 }
 0x61b   : > { %3083 = vrot.lane.b32.xlu1 %v8139_v46, %s7954_s12  ;;  %7632 = vrcp.f32 %v2325_v55 }
 0x61c   : > { %v2322_v47 = vpop.xlane.xlu0 %2321  ;;  %v2337_v39 = vpop.xlane.xlu1 %2336 }
 0x61d   : > { %7634 = vrcp.f32 %v2322_v47 }
 0x61e   : > { %3194 = vrot.lane.b32.xlu0 %v8149_v56, %s7953_s11 }
 0x61f   : > { %3188 = vrot.lane.b32.xlu1 %v8163_v7, %s7954_s12 }
 0x620   : > { %v2331_v38 = vpop.xlane.xlu0 %2330 }
 0x622   : > { %3081 = vrot.lane.b32.xlu0 %v8125_v35, %s7954_s12 }
 0x623   : > { %3691 = vrot.lane.b32.xlu1 %v8073_v59, %s7955_s13  ;;  %v7629_v41 = vpop.eup %7628 }
 0x624   : > { %v2340_v8 = vpop.xlane.xlu0 %2339  ;;  %v7631_v2 = vpop.eup %7630  ;;  %v2472_v53 = vmul.f32 %v7629_v41, %v9066_v42 }
 0x625   : > { %7636 = vrcp.f32 %v2340_v8  ;;  %v7633_v62 = vpop.eup %7632  ;;  %v2469_v31 = vmul.f32 %v7631_v2, %v9069_v12 }
 0x626   : > { %v2352_v52 = vpop.xlane.xlu1 %2351  ;;  %2978 = vrot.lane.b32.xlu0 %v11187_v34, %s7954_s12  ;;  %7638 = vrcp.f32 %v2331_v38  ;;  %v2471_v33 = vmul.f32 %v7633_v62, %v9061_v30 }
 0x627   : > { %3695 = vrot.lane.b32.xlu1 %v8087_v5, %s7955_s13  ;;  %v7635_v51 = vpop.eup %7634  ;;  %7640 = vrcp.f32 %v2337_v39 }
 0x628   : > { %v2334_v50 = vpop.xlane.xlu0 %2333  ;;  %v2470_v48 = vmul.f32 %v7635_v51, %v9076_v24  ;;  %v2500_v55 = vpack.c.bf16 %v2472_v53, %v2471_v33 }
 0x629   : > { %7642 = vrcp.f32 %v2334_v50 }
 0x62a   : > { %v2346_v20 = vpop.xlane.xlu1 %2345  ;;  %3198 = vrot.lane.b32.xlu0 %v11188_v0, %s7953_s11  ;;  %v2499_v26 = vpack.c.bf16 %v2470_v48, %v2469_v31  ;;  %v11190_v31 = vld [vmem:[#allocation3_spill] sm:$0xff] }
 0x62b   : > { %3867 = vrot.lane.b32.xlu1 %v8127_v36, %s7955_s13 }
 0x62c   : > { %v2349_v21 = vpop.xlane.xlu0 %2348  ;;  %6754 = vmatprep.mubr.msk.bf16.mxu1 %vm936_vm2, %v2499_v26 }
 0x62d   : > { %7644 = vrcp.f32 %v2349_v21  ;;  %6755 = vmatmul.mubr.msk.bf16.gmra.mrb[44].mxu1 %vm936_vm2, %v2500_v55 }
 0x62e   : > { %v2361_v42 = vpop.xlane.xlu1 %2360  ;;  %3186 = vrot.lane.b32.xlu0 %v8149_v56, %s7954_s12  ;;  %7646 = vrcp.f32 %v2346_v20  ;;  %v11191_v20 = vld [vmem:[#allocation40_spill] sm:$0xff] }
 0x62f   : > { %3869 = vrot.lane.b32.xlu1 %v8125_v35, %s7955_s13  ;;  %v7637_v30 = vpop.eup %7636  ;;  %7648 = vrcp.f32 %v2352_v52 }
 0x630   : > { %v2343_v12 = vpop.xlane.xlu0 %2342  ;;  %v7639_v24 = vpop.eup %7638  ;;  %v2476_v38 = vmul.f32 %v7637_v30, %v9091_v1 }
 0x631   : > { %7650 = vrcp.f32 %v2343_v12  ;;  %v7641_v28 = vpop.eup %7640  ;;  %v2473_v8 = vmul.f32 %v7639_v24, %v9087_v23 }
 0x632   : > { %v2358_v11 = vpop.xlane.xlu1 %2357  ;;  %3085 = vrot.lane.b32.xlu0 %v8137_v45, %s7954_s12  ;;  %v2475_v2 = vmul.f32 %v7641_v28, %v9078_v13 }
 0x633   : > { %v7643_v47 = vpop.eup %7642  ;;  %7652 = vrcp.f32 %v2358_v11  ;;  %3871 = vrot.lane.b32.xlu1 %v8139_v46, %s7955_s13  ;;  %v11192_v11 = vld [vmem:[#allocation41_spill] sm:$0xff] }
 0x634   : > { %v2355_v39 = vpop.xlane.xlu0 %2354  ;;  %v2474_v41 = vmul.f32 %v7643_v47, %v9096_v32  ;;  %v2502_v51 = vpack.c.bf16 %v2476_v38, %v2475_v2  ;;  %v11189_v32 = vld [vmem:[#allocation7_spill] sm:$0xff] }
 0x635   : > { %7654 = vrcp.f32 %v2355_v39 }
 0x636   : > { %v2373_v52 = vpop.xlane.xlu1 %2372  ;;  %3190 = vrot.lane.b32.xlu0 %v11188_v0, %s7954_s12  ;;  %v2501_v62 = vpack.c.bf16 %v2474_v41, %v2473_v8  ;;  %7656 = vrcp.f32 %v2361_v42  ;;  %v11193_v8 = vld [vmem:[#allocation42_spill] sm:$0xff] }
 0x637   : > { %3873 = vrot.lane.b32.xlu1 %v8137_v45, %s7955_s13  ;;  %v7645_v1 = vpop.eup %7644 }
 0x638   : > { %6766 = vmatprep.mubr.msk.bf16.mxu0 %vm936_vm2, %v2501_v62  ;;  %v2364_v50 = vpop.xlane.xlu0 %2363  ;;  %v7647_v23 = vpop.eup %7646  ;;  %v2479_v33 = vmul.f32 %v7645_v1, %v9105_v18  ;;  %v11194_v1 = vld [vmem:[#allocation46_spill] sm:$0xff] }
 0x639   : > { %7658 = vrcp.f32 %v2364_v50  ;;  %6767 = vmatmul.mubr.msk.bf16.vlgmr.msra.gmra.mrb[88].mxu0 %vm936_vm2, %v2502_v51  ;;  %v7649_v13 = vpop.eup %7648  ;;  %v2478_v55 = vmul.f32 %v7647_v23, %v9109_v40 }
 0x63a   : > { %6791 = vmatpush3.bf16.msra.mxu0 %v11189_v32  ;;  %v2370_v53 = vpop.xlane.xlu1 %2369  ;;  %3689 = vrot.lane.b32.xlu0 %v11190_v31, %s7955_s13  ;;  %v2480_v30 = vmul.f32 %v7649_v13, %v9100_v3  ;;  %v11195_v32 = vld [vmem:[#allocation44_spill] sm:$0xff] }
 0x63b   : > { %v7651_v48 = vpop.eup %7650  ;;  %7660 = vrcp.f32 %v2370_v53  ;;  %6792 = vmatprep.subr.bf16.mxu0 %v11191_v20  ;;  %3958 = vrot.lane.b32.xlu1 %v8149_v56, %s7955_s13 }
 0x63c   : > { %v2367_v26 = vpop.xlane.xlu0 %2366  ;;  %v2477_v21 = vmul.f32 %v7651_v48, %v9120_v4  ;;  %v2504_v18 = vpack.c.bf16 %v2480_v30, %v2479_v33  ;;  %v2901_v33 = vsel %vm543_vm1, %v11195_v32, 0 }
 0x63d   : > { %v7653_v42 = vpop.eup %7652  ;;  %7662 = vrcp.f32 %v2367_v26 }
 0x63e   : > { %6793 = vmatpush3.bf16.msra.mxu0 %v11191_v20  ;;  %v2388_v12 = vpop.xlane.xlu1 %2387  ;;  %3693 = vrot.lane.b32.xlu0 %v8089_v6, %s7955_s13  ;;  %v2503_v24 = vpack.c.bf16 %v2478_v55, %v2477_v21  ;;  %7664 = vrcp.f32 %v2373_v52  ;;  %v2482_v4 = vmul.f32 %v7653_v42, %v9130_v63  ;;  %v11196_v21 = vld [vmem:[#allocation48_spill] sm:$0xff] }
 0x63f   : > { %v7655_v28 = vpop.eup %7654  ;;  %6794 = vmatprep.subr.bf16.mxu0 %v11192_v11  ;;  %3962 = vrot.lane.b32.xlu1 %v11188_v0, %s7955_s13 }
 0x640   : > { %6770 = vmatprep.mubr.msk.bf16.mxu0 %vm936_vm2, %v2503_v24  ;;  %v2376_v40 = vpop.xlane.xlu0 %2375  ;;  %v2481_v3 = vmul.f32 %v7655_v28, %v9126_v37  ;;  %v7657_v47 = vpop.eup %7656 }
 0x641   : > { %7666 = vrcp.f32 %v2376_v40  ;;  %6771 = vmatmul.mubr.msk.bf16.gmra.mrb[92].mxu0 %vm936_vm2, %v2504_v18  ;;  %v2483_v37 = vmul.f32 %v7657_v47, %v9115_v44  ;;  %v2898_v44 = vsel %vm543_vm1, %v9012_v19, 0 }
 0x642   : > { %6795 = vmatpush3.bf16.msra.mxu0 %v11192_v11  ;;  %3778 = vrot.lane.b32.xlu0 %v8101_v16, %s7955_s13  ;;  %v2505_v38 = vpack.c.bf16 %v2482_v4, %v2481_v3  ;;  %v2382_v41 = vpop.xlane.xlu1 %2381  ;;  %v11200_v3 = vld [vmem:[#allocation50_spill] sm:$0xff]  ;;  %v11201_v4 = vld [vmem:[#allocation49_spill] sm:$0xff] }
 0x643   : > { %v7659_v39 = vpop.eup %7658  ;;  %6796 = vmatprep.subr.bf16.mxu0 %v11193_v8  ;;  %4158 = vrot.lane.b32.xlu1 %v8101_v16, %s7956_s14 }
 0x644   : > { %v2484_v63 = vmul.f32 %v7659_v39, %v9140_v29  ;;  %6782 = vmatprep.mubr.msk.bf16.mxu1 %vm936_vm2, %v2505_v38  ;;  %v2385_v2 = vpop.xlane.xlu0 %2384  ;;  %v3108_v38 = vsel %vm543_vm1, %v11200_v3, 0  ;;  %v3009_v39 = vsel %vm543_vm1, %v11201_v4, 0 }
 0x645   : > { %v7661_v52 = vpop.eup %7660  ;;  %7668 = vrcp.f32 %v2385_v2 }
 0x646   : > { %v2506_v62 = vpack.c.bf16 %v2484_v63, %v2483_v37  ;;  %6797 = vmatpush3.bf16.msra.mxu0 %v11193_v8  ;;  %3780 = vrot.lane.b32.xlu0 %v8099_v15, %s7955_s13  ;;  %7670 = vrcp.f32 %v2382_v41  ;;  %v2486_v23 = vmul.f32 %v7661_v52, %v9148_v14  ;;  %v2989_v8 = vpop.permute.xlu1 %2988 }
 0x647   : > { %v7663_v51 = vpop.eup %7662  ;;  %7134 = vmatprep.subr.msk.bf16.mxu0 %vm543_vm1, %v11194_v1  ;;  %4059 = vrot.lane.b32.xlu1 %v8087_v5, %s7956_s14  ;;  %7672 = vrcp.f32 %v2388_v12  ;;  %v3012_v37 = vsel %vm543_vm1, %v2989_v8, 0 }
 0x648   : > { %6783 = vmatmul.mubr.msk.bf16.vlgmr.msra.gmra.mrb[48].mxu1 %vm936_vm2, %v2506_v62  ;;  %v2379_v29 = vpop.xlane.xlu0 %2378  ;;  %v2485_v50 = vmul.f32 %v7663_v51, %v9144_v43  ;;  %v7665_v13 = vpop.eup %7664 }
 0x649   : > { %6807 = vmatpush3.bf16.xpose.msra.mxu1 %v2898_v44  ;;  %7674 = vrcp.f32 %v2379_v29  ;;  %v2487_v19 = vmul.f32 %v7665_v13, %v9134_v54 }
 0x64a   : > { %7131 = vmatprep.subr.msk.bf16.mxu1 %vm543_vm1, %v11195_v32  ;;  %3782 = vrot.lane.b32.xlu0 %v11187_v34, %s7955_s13  ;;  %v2507_v53 = vpack.c.bf16 %v2486_v23, %v2485_v50 }
 0x64b   : > { %v7667_v48 = vpop.eup %7666  ;;  %4045 = vrot.lane.b32.xlu1 %v11190_v31, %s7957_s15 }
 0x64c   : > { %6786 = vmatprep.mubr.msk.bf16.mxu1 %vm936_vm2, %v2507_v53  ;;  %v2488_v43 = vmul.f32 %v7667_v48, %v9152_v27  ;;  %v11197_v27 = vld [vmem:[#allocation43_spill] sm:$0xff]  ;;  %v2872_v47 = vpop.permute.xlu0 %2871 }
 0x64d   : > { %v2904_v18 = vsel %vm543_vm1, %v11197_v27, 0 }
 0x64e   : > { %3784 = vrot.lane.b32.xlu0 %v8113_v25, %s7955_s13  ;;  %v2508_v14 = vpack.c.bf16 %v2488_v43, %v2487_v19 }
 0x64f   : > { %4162 = vrot.lane.b32.xlu1 %v11187_v34, %s7956_s14  ;;  %v7669_v20 = vpop.eup %7668 }
 0x650   : > { %6787 = vmatmul.mubr.msk.bf16.gmra.mrb[52].mxu1 %vm936_vm2, %v2508_v14  ;;  %v7671_v26 = vpop.eup %7670  ;;  %v2491_v42 = vmul.f32 %v7669_v20, %v9160_v17  ;;  %v3003_v17 = vsel %vm543_vm1, %v11194_v1, 0 }
 0x651   : > { %6809 = vmatpush3.bf16.xpose.msra.mxu1 %v2901_v33  ;;  %6814 = vmatprep.mubr.msk.bf16.mxu1 %vm543_vm1, %v11196_v21  ;;  %v7673_v54 = vpop.eup %7672  ;;  %v2490_v12 = vmul.f32 %v7671_v26, %v9164_v61 }
 0x652   : > { %7132 = vmatprep.subr.msk.bf16.mxu1 %vm543_vm1, %v11197_v27  ;;  %3956 = vrot.lane.b32.xlu0 %v8151_v57, %s7955_s13  ;;  %v2492_v24 = vmul.f32 %v7673_v54, %v9156_v58  ;;  %v11199_v58 = vld [vmem:[#allocation47_spill] sm:$0xff] }
 0x653   : > { %v7675_v55 = vpop.eup %7674  ;;  %4049 = vrot.lane.b32.xlu1 %v8089_v6, %s7957_s15  ;;  %v3006_v40 = vsel %vm543_vm1, %v11199_v58, 0 }
 0x654   : > { %v2489_v30 = vmul.f32 %v7675_v55, %v9170_v60  ;;  %v2510_v11 = vpack.c.bf16 %v2492_v24, %v2491_v42  ;;  %v11198_v60 = vld [vmem:[#allocation45_spill] sm:$0xff] }
 0x655   : > { %v2907_v61 = vsel %vm543_vm1, %v11198_v60, 0 }
 0x656   : > { %4053 = vrot.lane.b32.xlu0 %v11190_v31, %s7956_s14  ;;  %v2509_v28 = vpack.c.bf16 %v2490_v12, %v2489_v30 }
 0x658   : > { %6798 = vmatprep.mubr.msk.bf16.mxu0 %vm936_vm2, %v2509_v28 }
 0x659   : > { %6811 = vmatpush3.bf16.xpose.msra.mxu1 %v2904_v18  ;;  %6799 = vmatmul.mubr.msk.bf16.vlgmr.msra.gmra.mrb[96].mxu0 %vm936_vm2, %v2510_v11 }
 0x65a   : > { %7133 = vmatprep.subr.msk.bf16.mxu1 %vm543_vm1, %v11198_v60  ;;  %6823 = vmatpush3.bf16.xpose.msra.mxu0 %v3003_v17 }
 0x65b   : > { %3960 = vrot.lane.b32.xlu0 %v8163_v7, %s7955_s13  ;;  %7135 = vmatprep.subr.msk.bf16.mxu0 %vm543_vm1, %v11199_v58 }
 0x65f   : > { %4055 = vrot.lane.b32.xlu0 %v8073_v59, %s7956_s14 }
 0x661   : > { %6813 = vmatpush3.bf16.xpose.msra.mxu1 %v2907_v61 }
 0x662   : > { %6825 = vmatpush3.bf16.xpose.msra.mxu0 %v3006_v40  ;;  %7138 = vmatprep.subr.msk.bf16.mxu1 %vm543_vm1, %v11200_v3 }
 0x663   : > { %4057 = vrot.lane.b32.xlu0 %v8089_v6, %s7956_s14  ;;  %7136 = vmatprep.subr.msk.bf16.mxu0 %vm543_vm1, %v11201_v4 }
 0x667   : > { %4160 = vrot.lane.b32.xlu0 %v8099_v15, %s7956_s14 }
 0x668   : > { %6815 = vmatmul.mubr.msk.bf16.vlgmr.msra.gmra.mrb[56].mxu1 %vm543_vm1, %v2872_v47 }
 0x669   : > { %6839 = vmatpush3.bf16.xpose.msra.mxu1 %v3108_v38 }
 0x66a   : > { %6827 = vmatpush3.bf16.xpose.msra.mxu0 %v3009_v39 }
 0x66b   : > { %4047 = vrot.lane.b32.xlu0 %v8073_v59, %s7957_s15  ;;  %7137 = vmatprep.subr.msk.bf16.mxu0 %vm543_vm1, %v2989_v8 }
 0x66f   : > { %4263 = vrot.lane.b32.xlu0 %v8127_v36, %s7956_s14 }
 0x672   : > { %6829 = vmatpush3.bf16.xpose.msra.mxu0 %v3012_v37 }
 0x677   : > { %v2394_v63 = vpop.xlane.xlu1 %2393 }
 0x678   : > { %7676 = vrcp.f32 %v2394_v63 }
 0x67b   : > { %v2975_v41 = vpop.permute.xlu1 %2974 }
 0x67d   : > { %v2397_v2 = vpop.xlane.xlu0 %2396 }
 0x67f   : > { %v3193_v52 = vpop.permute.xlu1 %3192 }
 0x680   : > { %7142 = vmatprep.subr.msk.bf16.mxu0 %vm543_vm1, %v3193_v52  ;;  %v3213_v30 = vsel %vm543_vm1, %v3193_v52, 0 }
 0x681   : > { %v2391_v62 = vpop.xlane.xlu0 %2390 }
 0x682   : > { %7678 = vrcp.f32 %v2391_v62  ;;  %v7677_v50 = vpop.eup %7676 }
 0x683   : > { %v2874_v51 = vpop.permute.xlu1 %2873  ;;  %7680 = vrcp.f32 %v2397_v2  ;;  %v2494_v19 = vmul.f32 %v7677_v50, %v9182_v10 }
 0x684   : > { %6818 = vmatprep.mubr.msk.bf16.mxu1 %vm543_vm1, %v2874_v51 }
 0x685   : > { %v2400_v1 = vpop.xlane.xlu0 %2399 }
 0x686   : > { %7682 = vrcp.f32 %v2400_v1 }
 0x687   : > { %v3094_v44 = vpop.permute.xlu1 %3093 }
 0x689   : > { %v3090_v29 = vpop.permute.xlu0 %3089 }
 0x68a   : > { %7139 = vmatprep.subr.msk.bf16.mxu1 %vm543_vm1, %v3090_v29  ;;  %v3111_v23 = vsel %vm543_vm1, %v3090_v29, 0 }
 0x68b   : > { %v3080_v13 = vpop.permute.xlu1 %3079  ;;  %6841 = vmatpush3.bf16.xpose.msra.mxu1 %v3111_v23 }
 0x68c   : > { %v7679_v32 = vpop.eup %7678 }
 0x68d   : > { %v3092_v53 = vpop.permute.xlu0 %3091  ;;  %v2493_v48 = vmul.f32 %v7679_v32, %v9190_v9  ;;  %v7681_v43 = vpop.eup %7680 }
 0x68e   : > { %7140 = vmatprep.subr.msk.bf16.mxu1 %vm543_vm1, %v3092_v53  ;;  %v2495_v21 = vmul.f32 %v7681_v43, %v9186_v22  ;;  %v3114_v27 = vsel %vm543_vm1, %v3092_v53, 0  ;;  %v3117_v22 = vsel %vm543_vm1, %v3094_v44, 0 }
 0x68f   : > { %v2511_v14 = vpack.c.bf16 %v2494_v19, %v2493_v48  ;;  %v3197_v33 = vpop.permute.xlu1 %3196 }
 0x690   : > { %v7683_v20 = vpop.eup %7682  ;;  %v3219_v60 = vsel %vm543_vm1, %v3197_v33, 0 }
 0x691   : > { %6802 = vmatprep.mubr.msk.bf16.mxu0 %vm936_vm2, %v2511_v14  ;;  %v2977_v26 = vpop.permute.xlu0 %2976  ;;  %v2496_v54 = vmul.f32 %v7683_v20, %v9194_v49 }
 0x693   : > { %6843 = vmatpush3.bf16.xpose.msra.mxu1 %v3114_v27  ;;  %v2512_v55 = vpack.c.bf16 %v2496_v54, %v2495_v21  ;;  %v2981_v9 = vpop.permute.xlu1 %2980 }
 0x694   : > { %7141 = vmatprep.subr.msk.bf16.mxu1 %vm543_vm1, %v3094_v44 }
 0x695   : > { %6803 = vmatmul.mubr.msk.bf16.gmra.mrb[100].mxu0 %vm936_vm2, %v2512_v55  ;;  %v2876_v10 = vpop.permute.xlu0 %2875 }
 0x696   : > { %6819 = vmatmul.mubr.msk.bf16.gmra.mrb[60].mxu1 %vm543_vm1, %v2876_v10  ;;  %6830 = vmatprep.mubr.msk.bf16.mxu0 %vm543_vm1, %v2975_v41 }
 0x697   : > { %6846 = vmatprep.mubr.msk.bf16.mxu1 %vm543_vm1, %v3080_v13  ;;  %v3185_v49 = vpop.permute.xlu1 %3184 }
 0x699   : > { %v3195_v42 = vpop.permute.xlu0 %3194 }
 0x69a   : > { %v3216_v11 = vsel %vm543_vm1, %v3195_v42, 0 }
 0x69b   : > { %6845 = vmatpush3.bf16.xpose.msra.mxu1 %v3117_v22  ;;  %v3084_v28 = vpop.permute.xlu1 %3083 }
 0x69d   : > { %6831 = vmatmul.mubr.msk.bf16.vlgmr.msra.gmra.mrb[104].mxu0 %vm543_vm1, %v2977_v26  ;;  %v3082_v12 = vpop.permute.xlu0 %3081 }
 0x69e   : > { %6855 = vmatpush3.bf16.xpose.msra.mxu0 %v3213_v30 }
 0x69f   : > { %7143 = vmatprep.subr.msk.bf16.mxu0 %vm543_vm1, %v3195_v42  ;;  %v3189_v61 = vpop.permute.xlu1 %3188 }
 0x6a1   : > { %v2979_v24 = vpop.permute.xlu0 %2978 }
 0x6a2   : > { %6834 = vmatprep.mubr.msk.bf16.mxu0 %vm543_vm1, %v2979_v24  ;;  %6847 = vmatmul.mubr.msk.bf16.vlgmr.msra.gmra.mrb[64].mxu1 %vm543_vm1, %v3082_v12 }
 0x6a3   : > { %6850 = vmatprep.mubr.msk.bf16.mxu1 %vm543_vm1, %v3084_v28  ;;  %v3692_v47 = vpop.permute.xlu1 %3691 }
 0x6a5   : > { %6835 = vmatmul.mubr.msk.bf16.gmra.mrb[108].mxu0 %vm543_vm1, %v2981_v9  ;;  %v3199_v18 = vpop.permute.xlu0 %3198 }
 0x6a6   : > { %6857 = vmatpush3.bf16.xpose.msra.mxu0 %v3216_v11  ;;  %6862 = vmatprep.mubr.msk.bf16.mxu0 %vm543_vm1, %v3185_v49  ;;  %v3222_v3 = vsel %vm543_vm1, %v3199_v18, 0 }
 0x6a7   : > { %7144 = vmatprep.subr.msk.bf16.mxu0 %vm543_vm1, %v3197_v33  ;;  %v3696_v39 = vpop.permute.xlu1 %3695 }
 0x6a9   : > { %v3187_v17 = vpop.permute.xlu0 %3186 }
 0x6ab   : > { %v9420_v63 = vpop.permute.xlu1 %3867 }
 0x6ad   : > { %v3086_v58 = vpop.permute.xlu0 %3085 }
 0x6ae   : > { %6859 = vmatpush3.bf16.xpose.msra.mxu0 %v3219_v60  ;;  %6851 = vmatmul.mubr.msk.bf16.gmra.mrb[68].mxu1 %vm543_vm1, %v3086_v58 }
 0x6af   : > { %7145 = vmatprep.subr.msk.bf16.mxu0 %vm543_vm1, %v3199_v18 }
 0x6b1   : > { %v3191_v40 = vpop.permute.xlu0 %3190 }
 0x6b5   : > { %v3690_v4 = vpop.permute.xlu0 %3689 }
 0x6b6   : > { %6861 = vmatpush3.bf16.xpose.msra.mxu0 %v3222_v3  ;;  %6870 = vmatprep.subr.bf16.mxu1 %v3690_v4 }
 0x6b7   : > { %6871 = vmatpush3.bf16.msra.mxu1 %v3690_v4 }
 0x6b8   : > { %6872 = vmatprep.subr.bf16.mxu1 %v3692_v47 }
 0x6b9   : > { %v3694_v38 = vpop.permute.xlu0 %3693 }
 0x6bb   : > { %6873 = vmatpush3.bf16.msra.mxu1 %v3692_v47 }
 0x6bc   : > { %6874 = vmatprep.subr.bf16.mxu1 %v3694_v38 }
 0x6bd   : > { %6863 = vmatmul.mubr.msk.bf16.vlgmr.msra.gmra.mrb[112].mxu0 %vm543_vm1, %v3187_v17  ;;  %v3779_v8 = vpop.permute.xlu0 %3778 }
 0x6be   : > { %6866 = vmatprep.mubr.msk.bf16.mxu0 %vm543_vm1, %v3189_v61  ;;  %6886 = vmatprep.subr.bf16.mxu0 %v3779_v8 }
 0x6bf   : > { %6875 = vmatpush3.bf16.msra.mxu1 %v3694_v38  ;;  %6887 = vmatpush3.bf16.msra.mxu0 %v3779_v8 }
 0x6c0   : > { %6876 = vmatprep.subr.bf16.mxu1 %v3696_v39 }
 0x6c1   : > { %v3781_v37 = vpop.permute.xlu0 %3780 }
 0x6c2   : > { %6888 = vmatprep.subr.bf16.mxu0 %v3781_v37 }
 0x6c3   : > { %6877 = vmatpush3.bf16.msra.mxu1 %v3696_v39  ;;  %6889 = vmatpush3.bf16.msra.mxu0 %v3781_v37 }
 0x6c4   : > { %6902 = vmatprep.subr.bf16.mxu1 %v9420_v63 }
 0x6c5   : > { %6867 = vmatmul.mubr.msk.bf16.gmra.mrb[116].mxu0 %vm543_vm1, %v3191_v40  ;;  %v3783_v41 = vpop.permute.xlu0 %3782 }
 0x6c6   : > { %6890 = vmatprep.subr.bf16.mxu0 %v3783_v41 }
 0x6c7   : > { %6891 = vmatpush3.bf16.msra.mxu0 %v3783_v41 }
 0x6c9   : > { %v3785_v2 = vpop.permute.xlu0 %3784 }
 0x6ca   : > { %6892 = vmatprep.subr.bf16.mxu0 %v3785_v2 }
 0x6cb   : > { %6893 = vmatpush3.bf16.msra.mxu0 %v3785_v2 }
 0x6cd   : > { %v9424_v52 = vpop.permute.xlu0 %3956 }
 0x6ce   : > { %11202 = vst [vmem:[#allocation5_spill] sm:$0xff] %v9424_v52  ;;  %6918 = vmatprep.subr.bf16.mxu0 %v9424_v52 }
 0x6da   : > { %v9427_v62 = vpop.f32.mrb[40].mxu1 }
 0x6db   : > { %11203 = vst [vmem:[#allocation6_spill] sm:$0xff] %v9427_v62  ;;  %v9429_v51 = vpop.f32.mrb[41].mxu1 }
 0x6dc   : > { %11204 = vst [vmem:[#allocation7_spill] sm:$0xff] %v9429_v51  ;;  %v9431_v1 = vpop.f32.mrb[42].mxu1 }
 0x6dd   : > { %11205 = vst [vmem:[#allocation40_spill] sm:$0xff] %v9431_v1  ;;  %v9435_v29 = vpop.f32.mrb[43].mxu1 }
 0x6de   : > { %11206 = vst [vmem:[#allocation41_spill] sm:$0xff] %v9435_v29 }
 0x700   : > { %v9439_v23 = vpop.f32.mrb[44].mxu1 }
 0x701   : > { %11207 = vst [vmem:[#allocation42_spill] sm:$0xff] %v9439_v23  ;;  %v9441_v13 = vpop.f32.mrb[45].mxu1 }
 0x702   : > { %11208 = vst [vmem:[#allocation46_spill] sm:$0xff] %v9441_v13  ;;  %v9443_v32 = vpop.f32.mrb[46].mxu1 }
 0x703   : > { %11209 = vst [vmem:[#allocation44_spill] sm:$0xff] %v9443_v32  ;;  %v9447_v48 = vpop.f32.mrb[47].mxu1 }
 0x704   : > { %11210 = vst [vmem:[#allocation48_spill] sm:$0xff] %v9447_v48 }
 0x70c   : > { %v9451_v43 = vpop.f32.mrb[88].mxu0 }
 0x70d   : > { %11211 = vst [vmem:[#allocation43_spill] sm:$0xff] %v9451_v43  ;;  %v9453_v14 = vpop.f32.mrb[89].mxu0 }
 0x70e   : > { %11212 = vst [vmem:[#allocation45_spill] sm:$0xff] %v9453_v14  ;;  %v9455_v20 = vpop.f32.mrb[90].mxu0 }
 0x70f   : > { %11213 = vst [vmem:[#allocation47_spill] sm:$0xff] %v9455_v20  ;;  %v9459_v26 = vpop.f32.mrb[91].mxu0 }
 0x710   : > { %11214 = vst [vmem:[#allocation50_spill] sm:$0xff] %v9459_v26  ;;  %v9657_v26 = vpop.permute.xlu0 %4053 }
 0x714   : > { %v9463_v54 = vpop.f32.mrb[92].mxu0  ;;  %v9661_v1 = vpop.permute.xlu0 %3960 }
 0x715   : > { %11215 = vst [vmem:[#allocation49_spill] sm:$0xff] %v9463_v54  ;;  %v9465_v27 = vpop.f32.mrb[93].mxu0  ;;  %11236 = vst [vmem:[#allocation71_spill] sm:$0xff] %v9661_v1 }
 0x716   : > { %11216 = vst [vmem:[#allocation51_spill] sm:$0xff] %v9465_v27  ;;  %v9467_v55 = vpop.f32.mrb[94].mxu0 }
 0x717   : > { %11217 = vst [vmem:[#allocation52_spill] sm:$0xff] %v9467_v55  ;;  %v9471_v9 = vpop.f32.mrb[95].mxu0 }
 0x718   : > { %11218 = vst [vmem:[#allocation53_spill] sm:$0xff] %v9471_v9  ;;  %v9665_v13 = vpop.permute.xlu0 %4055 }
 0x719   : > { %11238 = vst [vmem:[#allocation73_spill] sm:$0xff] %v9665_v13 }
 0x71b   : > { %v9475_v22 = vpop.f32.mrb[48].mxu1 }
 0x71c   : > { %11219 = vst [vmem:[#allocation54_spill] sm:$0xff] %v9475_v22  ;;  %v9477_v49 = vpop.f32.mrb[49].mxu1 }
 0x71d   : > { %11220 = vst [vmem:[#allocation55_spill] sm:$0xff] %v9477_v49  ;;  %v9479_v30 = vpop.f32.mrb[50].mxu1  ;;  %v9621_v49 = vpop.permute.xlu1 %3869 }
 0x71e   : > { %11221 = vst [vmem:[#allocation56_spill] sm:$0xff] %v9479_v30  ;;  %v9483_v24 = vpop.f32.mrb[51].mxu1 }
 0x71f   : > { %11222 = vst [vmem:[#allocation57_spill] sm:$0xff] %v9483_v24 }
 0x721   : > { %v9635_v20 = vpop.permute.xlu1 %3871 }
 0x723   : > { %v9487_v11 = vpop.f32.mrb[52].mxu1 }
 0x724   : > { %11223 = vst [vmem:[#allocation58_spill] sm:$0xff] %v9487_v11  ;;  %v9489_v18 = vpop.f32.mrb[53].mxu1 }
 0x725   : > { %11224 = vst [vmem:[#allocation59_spill] sm:$0xff] %v9489_v18  ;;  %v9491_v17 = vpop.f32.mrb[54].mxu1 }
 0x726   : > { %11225 = vst [vmem:[#allocation60_spill] sm:$0xff] %v9491_v17  ;;  %v9495_v58 = vpop.f32.mrb[55].mxu1 }
 0x727   : > { %11226 = vst [vmem:[#allocation61_spill] sm:$0xff] %v9495_v58 }
 0x72c   : > { %v9499_v40 = vpop.f32.mrb[96].mxu0 }
 0x72d   : > { %11227 = vst [vmem:[#allocation62_spill] sm:$0xff] %v9499_v40  ;;  %v9501_v3 = vpop.f32.mrb[97].mxu0 }
 0x72e   : > { %11228 = vst [vmem:[#allocation63_spill] sm:$0xff] %v9501_v3  ;;  %v9503_v4 = vpop.f32.mrb[98].mxu0 }
 0x72f   : > { %11229 = vst [vmem:[#allocation64_spill] sm:$0xff] %v9503_v4  ;;  %v9507_v38 = vpop.f32.mrb[99].mxu0 }
 0x730   : > { %11230 = vst [vmem:[#allocation65_spill] sm:$0xff] %v9507_v38 }
 0x73b   : > { %v9511_v8 = vpop.f32.mrb[56].mxu1 }
 0x73c   : > { %v9513_v37 = vpop.f32.mrb[57].mxu1  ;;  %v3295_v41 = vsel %vm936_vm2, %v9511_v8, -inf }
 0x73d   : > { %3296 = vmax.xlane.f32.xlu0 %v3295_v41  ;;  %v9517_v2 = vpop.f32.mrb[58].mxu1  ;;  %v3289_v61 = vsel %vm936_vm2, %v9513_v37, -inf }
 0x73e   : > { %3290 = vmax.xlane.f32.xlu1 %v3289_v61  ;;  %v9521_v47 = vpop.f32.mrb[59].mxu1  ;;  %v3298_v39 = vsel %vm936_vm2, %v9517_v2, -inf }
 0x73f   : > { %v3292_v60 = vsel %vm936_vm2, %v9521_v47, -inf }
 0x741   : > { %3293 = vmax.xlane.f32.xlu0 %v3292_v60 }
 0x742   : > { %3299 = vmax.xlane.f32.xlu1 %v3298_v39 }
 0x768   : > { %v9527_v12 = vpop.f32.mrb[100].mxu0 }
 0x769   : > { %11231 = vst [vmem:[#allocation66_spill] sm:$0xff] %v9527_v12  ;;  %v9529_v10 = vpop.f32.mrb[101].mxu0  ;;  %v9531_v41 = vpop.f32.mrb[60].mxu1 }
 0x76a   : > { %11232 = vst [vmem:[#allocation67_spill] sm:$0xff] %v9529_v10  ;;  %v9533_v28 = vpop.f32.mrb[102].mxu0  ;;  %v9535_v33 = vpop.f32.mrb[61].mxu1  ;;  %v3307_v61 = vsel %vm936_vm2, %v9531_v41, -inf }
 0x76b   : > { %11233 = vst [vmem:[#allocation68_spill] sm:$0xff] %v9533_v28  ;;  %v9541_v42 = vpop.f32.mrb[103].mxu0  ;;  %3308 = vmax.xlane.f32.xlu0 %v3307_v61  ;;  %v9543_v39 = vpop.f32.mrb[62].mxu1  ;;  %v3301_v19 = vsel %vm936_vm2, %v9535_v33, -inf }
 0x76c   : > { %11234 = vst [vmem:[#allocation69_spill] sm:$0xff] %v9541_v42  ;;  %v9547_v21 = vpop.f32.mrb[63].mxu1  ;;  %v3310_v44 = vsel %vm936_vm2, %v9543_v39, -inf }
 0x76d   : > { %3311 = vmax.xlane.f32.xlu1 %v3310_v44  ;;  %v3304_v61 = vsel %vm936_vm2, %v9547_v21, -inf }
 0x76f   : > { %3302 = vmax.xlane.f32.xlu0 %v3301_v19 }
 0x770   : > { %v9553_v50 = vpop.f32.mrb[104].mxu0 }
 0x771   : > { %v9557_v60 = vpop.f32.mrb[105].mxu0  ;;  %3305 = vmax.xlane.f32.xlu1 %v3304_v61  ;;  %v3319_v53 = vsel %vm936_vm2, %v9553_v50, -inf }
 0x772   : > { %v9561_v10 = vpop.f32.mrb[106].mxu0  ;;  %v3313_v28 = vsel %vm936_vm2, %v9557_v60, -inf }
 0x773   : > { %v9563_v42 = vpop.f32.mrb[107].mxu0  ;;  %3320 = vmax.xlane.f32.xlu0 %v3319_v53  ;;  %v3322_v44 = vsel %vm936_vm2, %v9561_v10, -inf }
 0x774   : > { %v3316_v53 = vsel %vm936_vm2, %v9563_v42, -inf }
 0x775   : > { %3323 = vmax.xlane.f32.xlu1 %v3322_v44  ;;  %v9567_v19 = vpop.f32.mrb[64].mxu1 }
 0x776   : > { %v9569_v12 = vpop.f32.mrb[65].mxu1 }
 0x777   : > { %3314 = vmax.xlane.f32.xlu0 %v3313_v28  ;;  %v9573_v61 = vpop.f32.mrb[66].mxu1 }
 0x778   : > { %v9575_v3 = vpop.f32.mrb[108].mxu0  ;;  %v9577_v38 = vpop.f32.mrb[67].mxu1 }
 0x779   : > { %3317 = vmax.xlane.f32.xlu1 %v3316_v53  ;;  %v9581_v40 = vpop.f32.mrb[109].mxu0  ;;  %v3331_v44 = vsel %vm936_vm2, %v9575_v3, -inf }
 0x77a   : > { %v9585_v4 = vpop.f32.mrb[110].mxu0  ;;  %v3325_v58 = vsel %vm936_vm2, %v9581_v40, -inf }
 0x77b   : > { %3332 = vmax.xlane.f32.xlu0 %v3331_v44  ;;  %v9587_v18 = vpop.f32.mrb[111].mxu0  ;;  %v3334_v28 = vsel %vm936_vm2, %v9585_v4, -inf  ;;  %v3343_v44 = vsel %vm936_vm2, %v9567_v19, -inf }
 0x77c   : > { %v3328_v53 = vsel %vm936_vm2, %v9587_v18, -inf }
 0x77d   : > { %3335 = vmax.xlane.f32.xlu1 %v3334_v28  ;;  %v3346_v28 = vsel %vm936_vm2, %v9573_v61, -inf }
 0x77f   : > { %3326 = vmax.xlane.f32.xlu0 %v3325_v58  ;;  %v3337_v58 = vsel %vm936_vm2, %v9569_v12, -inf }
 0x781   : > { %3329 = vmax.xlane.f32.xlu1 %v3328_v53  ;;  %v9595_v11 = vpop.f32.mrb[68].mxu1  ;;  %v3340_v53 = vsel %vm936_vm2, %v9577_v38, -inf }
 0x782   : > { %v9597_v17 = vpop.f32.mrb[69].mxu1  ;;  %v3355_v54 = vsel %vm936_vm2, %v9595_v11, -inf }
 0x783   : > { %3344 = vmax.xlane.f32.xlu0 %v3343_v44  ;;  %v9601_v22 = vpop.f32.mrb[70].mxu1  ;;  %v3349_v55 = vsel %vm936_vm2, %v9597_v17, -inf }
 0x784   : > { %v9603_v30 = vpop.f32.mrb[71].mxu1  ;;  %v3358_v44 = vsel %vm936_vm2, %v9601_v22, -inf }
 0x785   : > { %3347 = vmax.xlane.f32.xlu1 %v3346_v28 }
 0x787   : > { %3338 = vmax.xlane.f32.xlu0 %v3337_v58  ;;  %v3352_v58 = vsel %vm936_vm2, %v9603_v30, -inf }
 0x789   : > { %3341 = vmax.xlane.f32.xlu1 %v3340_v53 }
 0x78b   : > { %3356 = vmax.xlane.f32.xlu0 %v3355_v54 }
 0x78d   : > { %3359 = vmax.xlane.f32.xlu1 %v3358_v44 }
 0x78f   : > { %3350 = vmax.xlane.f32.xlu0 %v3349_v55 }
 0x790   : > { %v9617_v28 = vpop.f32.mrb[112].mxu0 }
 0x791   : > { %v9623_v53 = vpop.f32.mrb[113].mxu0  ;;  %3353 = vmax.xlane.f32.xlu1 %v3352_v58  ;;  %v3367_v54 = vsel %vm936_vm2, %v9617_v28, -inf }
 0x792   : > { %v9625_v24 = vpop.f32.mrb[114].mxu0  ;;  %v3361_v43 = vsel %vm936_vm2, %v9623_v53, -inf }
 0x793   : > { %v9629_v44 = vpop.f32.mrb[115].mxu0  ;;  %3368 = vmax.xlane.f32.xlu0 %v3367_v54  ;;  %v3370_v55 = vsel %vm936_vm2, %v9625_v24, -inf }
 0x794   : > { %v3364_v58 = vsel %vm936_vm2, %v9629_v44, -inf }
 0x795   : > { %3371 = vmax.xlane.f32.xlu1 %v3370_v55 }
 0x797   : > { %3362 = vmax.xlane.f32.xlu0 %v3361_v43  ;;  %v9651_v43 = vpop.permute.xlu1 %3873 }
 0x798   : > { %v9637_v27 = vpop.f32.mrb[116].mxu0 }
 0x799   : > { %v9641_v9 = vpop.f32.mrb[117].mxu0  ;;  %3365 = vmax.xlane.f32.xlu1 %v3364_v58  ;;  %v3379_v54 = vsel %vm936_vm2, %v9637_v27, -inf }
 0x79a   : > { %v9643_v23 = vpop.f32.mrb[118].mxu0  ;;  %v3373_v14 = vsel %vm936_vm2, %v9641_v9, -inf }
 0x79b   : > { %v9647_v55 = vpop.f32.mrb[119].mxu0  ;;  %3380 = vmax.xlane.f32.xlu0 %v3379_v54  ;;  %v3382_v32 = vsel %vm936_vm2, %v9643_v23, -inf  ;;  %v9659_v62 = vpop.permute.xlu1 %3958 }
 0x79c   : > { %v3376_v58 = vsel %vm936_vm2, %v9647_v55, -inf  ;;  %11235 = vst [vmem:[#allocation70_spill] sm:$0xff] %v9659_v62 }
 0x79d   : > { %3383 = vmax.xlane.f32.xlu1 %v3382_v32  ;;  %v9669_v32 = vpop.permute.xlu0 %4057 }
 0x79e   : > { %11240 = vst [vmem:[#allocation75_spill] sm:$0xff] %v9669_v32 }
 0x79f   : > { %3374 = vmax.xlane.f32.xlu0 %v3373_v14  ;;  %v9663_v54 = vpop.permute.xlu1 %3962 }
 0x7a0   : > { %11237 = vst [vmem:[#allocation72_spill] sm:$0xff] %v9663_v54 }
 0x7a1   : > { %3377 = vmax.xlane.f32.xlu1 %v3376_v58  ;;  %v9673_v14 = vpop.permute.xlu0 %4160 }
 0x7a2   : > { %11242 = vst [vmem:[#allocation77_spill] sm:$0xff] %v9673_v14 }
 0x7a3   : > { %v9667_v48 = vpop.permute.xlu1 %4158 }
 0x7a4   : > { %11239 = vst [vmem:[#allocation74_spill] sm:$0xff] %v9667_v48 }
 0x7a5   : > { %v9677_v58 = vpop.permute.xlu0 %4047 }
 0x7a6   : > { %11244 = vst [vmem:[#allocation79_spill] sm:$0xff] %v9677_v58 }
 0x7a7   : > { %v9671_v51 = vpop.permute.xlu1 %4059 }
 0x7a8   : > { %11241 = vst [vmem:[#allocation76_spill] sm:$0xff] %v9671_v51 }
 0x7a9   : > { %v9681_v62 = vpop.permute.xlu0 %4263 }
 0x7aa   : > { %11246 = vst [vmem:[#allocation81_spill] sm:$0xff] %v9681_v62 }
 0x7ab   : > { %v9675_v29 = vpop.permute.xlu1 %4045 }
 0x7ac   : > { %11243 = vst [vmem:[#allocation78_spill] sm:$0xff] %v9675_v29 }
 0x7af   : > { %v9679_v52 = vpop.permute.xlu1 %4162 }
 0x7b0   : > { %11245 = vst [vmem:[#allocation80_spill] sm:$0xff] %v9679_v52 }
 0x7b3   : > { %v9683_v1 = vpop.permute.xlu1 %4049 }
 0x7b4   : > { %11247 = vst [vmem:[#allocation82_spill] sm:$0xff] %v9683_v1 }
 0x7ca   : > { %v3297_v54 = vpop.xlane.xlu0 %3296 }
 0x7cb   : > { %v3387_v13 = vsub.f32 %v9511_v8, %v3297_v54  ;;  %v3291_v48 = vpop.xlane.xlu1 %3290 }
 0x7cc   : > { %v3385_v32 = vsub.f32 %v9513_v37, %v3291_v48 }
 0x7cd   : > { %v3421_v6 = vmul.f32 1.442695, %v3387_v13 }
 0x7ce   : > { %v3417_v51 = vmul.f32 1.442695, %v3385_v32  ;;  %v3294_v31 = vpop.xlane.xlu0 %3293 }
 0x7cf   : > { %7684 = vpow2.f32 %v3421_v6  ;;  %v3386_v14 = vsub.f32 %v9521_v47, %v3294_v31  ;;  %v3300_v29 = vpop.xlane.xlu1 %3299 }
 0x7d0   : > { %v3388_v58 = vsub.f32 %v9517_v2, %v3300_v29  ;;  %7686 = vpow2.f32 %v3417_v51 }
 0x7d1   : > { %v3419_v52 = vmul.f32 1.442695, %v3386_v14 }
 0x7d2   : > { %v3423_v62 = vmul.f32 1.442695, %v3388_v58 }
 0x7d4   : > { %7688 = vpow2.f32 %v3423_v62 }
 0x7d5   : > { %7690 = vpow2.f32 %v3419_v52 }
 0x7d9   : > { %v9689_v1 = vpop.eup %7684 }
 0x7da   : > { %v3487_v8 = vsel %vm936_vm2, %v9689_v1, 0.0  ;;  %v9693_v48 = vpop.eup %7686 }
 0x7db   : > { %3488 = vadd.xlane.f32.xlu0 %v3487_v8  ;;  %v3481_v6 = vsel %vm936_vm2, %v9693_v48, 0.0 }
 0x7de   : > { %v9695_v13 = vpop.eup %7688 }
 0x7df   : > { %3482 = vadd.xlane.f32.xlu0 %v3481_v6  ;;  %v3490_v31 = vsel %vm936_vm2, %v9695_v13, 0.0  ;;  %v9701_v51 = vpop.eup %7690 }
 0x7e0   : > { %3491 = vadd.xlane.f32.xlu1 %v3490_v31  ;;  %v3484_v52 = vsel %vm936_vm2, %v9701_v51, 0.0 }
 0x7e4   : > { %3485 = vadd.xlane.f32.xlu1 %v3484_v52 }
 0x7f8   : > { %v3309_v62 = vpop.xlane.xlu0 %3308 }
 0x7f9   : > { %v3391_v29 = vsub.f32 %v9531_v41, %v3309_v62 }
 0x7fa   : > { %v3312_v47 = vpop.xlane.xlu1 %3311 }
 0x7fb   : > { %v3429_v37 = vmul.f32 1.442695, %v3391_v29  ;;  %v3392_v2 = vsub.f32 %v9543_v39, %v3312_v47 }
 0x7fc   : > { %v3303_v54 = vpop.xlane.xlu0 %3302 }
 0x7fd   : > { %7692 = vpow2.f32 %v3429_v37  ;;  %v3431_v32 = vmul.f32 1.442695, %v3392_v2  ;;  %v3389_v14 = vsub.f32 %v9535_v33, %v3303_v54 }
 0x7fe   : > { %v3306_v58 = vpop.xlane.xlu1 %3305 }
 0x7ff   : > { %7694 = vpow2.f32 %v3431_v32  ;;  %v3425_v8 = vmul.f32 1.442695, %v3389_v14  ;;  %v3390_v6 = vsub.f32 %v9547_v21, %v3306_v58 }
 0x800   : > { %v3321_v31 = vpop.xlane.xlu0 %3320 }
 0x801   : > { %7696 = vpow2.f32 %v3425_v8  ;;  %v3427_v52 = vmul.f32 1.442695, %v3390_v6  ;;  %v3395_v59 = vsub.f32 %v9553_v50, %v3321_v31 }
 0x802   : > { %v3324_v41 = vpop.xlane.xlu1 %3323 }
 0x803   : > { %7698 = vpow2.f32 %v3427_v52  ;;  %v3437_v62 = vmul.f32 1.442695, %v3395_v59  ;;  %v3396_v39 = vsub.f32 %v9561_v10, %v3324_v41 }
 0x804   : > { %v3315_v29 = vpop.xlane.xlu0 %3314 }
 0x805   : > { %v3439_v47 = vmul.f32 1.442695, %v3396_v39  ;;  %v3393_v37 = vsub.f32 %v9557_v60, %v3315_v29  ;;  %7700 = vpow2.f32 %v3437_v62 }
 0x806   : > { %v3318_v33 = vpop.xlane.xlu1 %3317 }
 0x807   : > { %v9712_v2 = vpop.eup %7692  ;;  %7702 = vpow2.f32 %v3439_v47  ;;  %v3433_v21 = vmul.f32 1.442695, %v3393_v37  ;;  %v3394_v54 = vsub.f32 %v9563_v42, %v3318_v33 }
 0x808   : > { %v3333_v32 = vpop.xlane.xlu0 %3332  ;;  %v3499_v50 = vsel %vm936_vm2, %v9712_v2, 0.0 }
 0x809   : > { %v9717_v14 = vpop.eup %7694  ;;  %v3399_v59 = vsub.f32 %v9575_v3, %v3333_v32  ;;  %3500 = vadd.xlane.f32.xlu1 %v3499_v50  ;;  %7704 = vpow2.f32 %v3433_v21  ;;  %v3435_v60 = vmul.f32 1.442695, %v3394_v54 }
 0x80a   : > { %v3336_v10 = vpop.xlane.xlu1 %3335  ;;  %v3502_v31 = vsel %vm936_vm2, %v9717_v14, 0.0 }
 0x80b   : > { %v9720_v58 = vpop.eup %7696  ;;  %v3445_v8 = vmul.f32 1.442695, %v3399_v59  ;;  %v3400_v3 = vsub.f32 %v9585_v4, %v3336_v10 }
 0x80c   : > { %v3327_v6 = vpop.xlane.xlu0 %3326  ;;  %v3493_v42 = vsel %vm936_vm2, %v9720_v58, 0.0 }
 0x80d   : > { %v9726_v52 = vpop.eup %7698  ;;  %7706 = vpow2.f32 %v3445_v8  ;;  %v3397_v41 = vsub.f32 %v9581_v40, %v3327_v6  ;;  %3503 = vadd.xlane.f32.xlu1 %v3502_v31  ;;  %3494 = vadd.xlane.f32.xlu0 %v3493_v42  ;;  %v3447_v40 = vmul.f32 1.442695, %v3400_v3 }
 0x80e   : > { %v3330_v62 = vpop.xlane.xlu1 %3329  ;;  %7708 = vpow2.f32 %v3435_v60  ;;  %v3496_v33 = vsel %vm936_vm2, %v9726_v52, 0.0 }
 0x80f   : > { %v3441_v39 = vmul.f32 1.442695, %v3397_v41  ;;  %v3398_v29 = vsub.f32 %v9587_v18, %v3330_v62  ;;  %v9731_v47 = vpop.eup %7700 }
 0x810   : > { %v3345_v37 = vpop.xlane.xlu0 %3344  ;;  %v3511_v10 = vsel %vm936_vm2, %v9731_v47, 0.0 }
 0x811   : > { %v9735_v21 = vpop.eup %7702  ;;  %v3443_v54 = vmul.f32 1.442695, %v3398_v29  ;;  %3497 = vadd.xlane.f32.xlu1 %v3496_v33  ;;  %7710 = vpow2.f32 %v3441_v39  ;;  %v3403_v32 = vsub.f32 %v9567_v19, %v3345_v37 }
 0x812   : > { %v3348_v4 = vpop.xlane.xlu1 %3347  ;;  %v3514_v50 = vsel %vm936_vm2, %v9735_v21, 0.0 }
 0x813   : > { %7712 = vpow2.f32 %v3443_v54  ;;  %v3404_v18 = vsub.f32 %v9573_v61, %v3348_v4  ;;  %3515 = vadd.xlane.f32.xlu0 %v3514_v50  ;;  %v9743_v60 = vpop.eup %7704  ;;  %v3453_v6 = vmul.f32 1.442695, %v3403_v32 }
 0x814   : > { %v3339_v59 = vpop.xlane.xlu0 %3338  ;;  %7714 = vpow2.f32 %v3447_v40  ;;  %v3505_v3 = vsel %vm936_vm2, %v9743_v60, 0.0 }
 0x815   : > { %v3455_v8 = vmul.f32 1.442695, %v3404_v18  ;;  %3512 = vadd.xlane.f32.xlu1 %v3511_v10  ;;  %v3401_v42 = vsub.f32 %v9569_v12, %v3339_v59 }
 0x816   : > { %v3342_v31 = vpop.xlane.xlu1 %3341 }
 0x817   : > { %v9745_v19 = vpop.eup %7706  ;;  %7716 = vpow2.f32 %v3455_v8  ;;  %v3402_v41 = vsub.f32 %v9577_v38, %v3342_v31  ;;  %v3449_v54 = vmul.f32 1.442695, %v3401_v42 }
 0x818   : > { %v3357_v61 = vpop.xlane.xlu0 %3356  ;;  %v3523_v62 = vsel %vm936_vm2, %v9745_v19, 0.0  ;;  %v9753_v39 = vpop.eup %7708  ;;  %7718 = vpow2.f32 %v3453_v6 }
 0x819   : > { %v3451_v29 = vmul.f32 1.442695, %v3402_v41  ;;  %v3407_v37 = vsub.f32 %v9595_v11, %v3357_v61  ;;  %3506 = vadd.xlane.f32.xlu1 %v3505_v3  ;;  %3524 = vadd.xlane.f32.xlu0 %v3523_v62  ;;  %v3508_v32 = vsel %vm936_vm2, %v9753_v39, 0.0 }
 0x81a   : > { %v3360_v33 = vpop.xlane.xlu1 %3359 }
 0x81b   : > { %7720 = vpow2.f32 %v3451_v29  ;;  %v3461_v12 = vmul.f32 1.442695, %v3407_v37  ;;  %v9756_v38 = vpop.eup %7710  ;;  %v3408_v50 = vsub.f32 %v9601_v22, %v3360_v33 }
 0x81c   : > { %v3351_v40 = vpop.xlane.xlu0 %3350  ;;  %v3517_v42 = vsel %vm936_vm2, %v9756_v38, 0.0 }
 0x81d   : > { %v9760_v4 = vpop.eup %7712  ;;  %7722 = vpow2.f32 %v3461_v12  ;;  %v3405_v11 = vsub.f32 %v9597_v17, %v3351_v40  ;;  %3509 = vadd.xlane.f32.xlu1 %v3508_v32  ;;  %v3463_v22 = vmul.f32 1.442695, %v3408_v50 }
 0x81e   : > { %v3354_v18 = vpop.xlane.xlu1 %3353  ;;  %v3520_v59 = vsel %vm936_vm2, %v9760_v4, 0.0  ;;  %7724 = vpow2.f32 %v3449_v54  ;;  %v9767_v6 = vpop.eup %7714 }
 0x81f   : > { %v3457_v10 = vmul.f32 1.442695, %v3405_v11  ;;  %v3406_v8 = vsub.f32 %v9603_v30, %v3354_v18  ;;  %3521 = vadd.xlane.f32.xlu0 %v3520_v59  ;;  %v3526_v33 = vsel %vm936_vm2, %v9767_v6, 0.0 }
 0x820   : > { %v3369_v31 = vpop.xlane.xlu0 %3368 }
 0x821   : > { %v9771_v41 = vpop.eup %7716  ;;  %7726 = vpow2.f32 %v3457_v10  ;;  %v3459_v17 = vmul.f32 1.442695, %v3406_v8  ;;  %v3411_v61 = vsub.f32 %v9617_v28, %v3369_v31  ;;  %3518 = vadd.xlane.f32.xlu1 %v3517_v42 }
 0x822   : > { %v3372_v3 = vpop.xlane.xlu1 %3371  ;;  %v3538_v62 = vsel %vm936_vm2, %v9771_v41, 0.0  ;;  %v9777_v29 = vpop.eup %7718 }
 0x823   : > { %7728 = vpow2.f32 %v3459_v17  ;;  %v3412_v30 = vsub.f32 %v9625_v24, %v3372_v3  ;;  %3539 = vadd.xlane.f32.xlu0 %v3538_v62  ;;  %v3469_v12 = vmul.f32 1.442695, %v3411_v61  ;;  %v3535_v18 = vsel %vm936_vm2, %v9777_v29, 0.0 }
 0x824   : > { %v3363_v37 = vpop.xlane.xlu0 %3362  ;;  %7730 = vpow2.f32 %v3463_v22 }
 0x825   : > { %v9781_v54 = vpop.eup %7720  ;;  %v3471_v28 = vmul.f32 1.442695, %v3412_v30  ;;  %v3409_v40 = vsub.f32 %v9623_v53, %v3363_v37  ;;  %3527 = vadd.xlane.f32.xlu1 %v3526_v33 }
 0x826   : > { %v3366_v32 = vpop.xlane.xlu1 %3365  ;;  %v3532_v50 = vsel %vm936_vm2, %v9781_v54, 0.0 }
 0x827   : > { %v9786_v24 = vpop.eup %7722  ;;  %7732 = vpow2.f32 %v3471_v28  ;;  %v3410_v11 = vsub.f32 %v9629_v44, %v3366_v32  ;;  %3533 = vadd.xlane.f32.xlu0 %v3532_v50  ;;  %v3465_v10 = vmul.f32 1.442695, %v3409_v40 }
 0x828   : > { %v9791_v59 = vpop.eup %7724  ;;  %7734 = vpow2.f32 %v3469_v12  ;;  %v3547_v53 = vsel %vm936_vm2, %v9786_v24, 0.0  ;;  %v3381_v50 = vpop.xlane.xlu0 %3380 }
 0x829   : > { %v3467_v8 = vmul.f32 1.442695, %v3410_v11  ;;  %3536 = vadd.xlane.f32.xlu1 %v3535_v18  ;;  %v3529_v44 = vsel %vm936_vm2, %v9791_v59, 0.0 }
 0x82a   : > { %v3384_v11 = vpop.xlane.xlu1 %3383 }
 0x82b   : > { %v9795_v31 = vpop.eup %7726  ;;  %7736 = vpow2.f32 %v3467_v8  ;;  %3548 = vadd.xlane.f32.xlu0 %v3547_v53  ;;  %v3415_v8 = vsub.f32 %v9637_v27, %v3381_v50 }
 0x82c   : > { %7738 = vpow2.f32 %v3465_v10  ;;  %v3541_v22 = vsel %vm936_vm2, %v9795_v31, 0.0  ;;  %v3375_v18 = vpop.xlane.xlu0 %3374 }
 0x82d   : > { %v9799_v42 = vpop.eup %7728  ;;  %3530 = vadd.xlane.f32.xlu1 %v3529_v44  ;;  %v3413_v10 = vsub.f32 %v9641_v9, %v3375_v18  ;;  %v3416_v44 = vsub.f32 %v9643_v23, %v3384_v11 }
 0x82e   : > { %v9803_v17 = vpop.eup %7730  ;;  %v3544_v61 = vsel %vm936_vm2, %v9799_v42, 0.0  ;;  %v3378_v53 = vpop.xlane.xlu1 %3377 }
 0x82f   : > { %3542 = vadd.xlane.f32.xlu0 %v3541_v22  ;;  %v3550_v62 = vsel %vm936_vm2, %v9803_v17, 0.0  ;;  %v3473_v22 = vmul.f32 1.442695, %v3413_v10 }
 0x831   : > { %v9807_v3 = vpop.eup %7732  ;;  %3545 = vadd.xlane.f32.xlu1 %v3544_v61  ;;  %v3477_v61 = vmul.f32 1.442695, %v3415_v8  ;;  %7740 = vpow2.f32 %v3473_v22 }
 0x832   : > { %11248 = vst [vmem:[#allocation83_spill] sm:$0xff] %v9807_v3  ;;  %v9811_v30 = vpop.eup %7734  ;;  %v3562_v37 = vsel %vm936_vm2, %v9807_v3, 0.0 }
 0x833   : > { %3551 = vadd.xlane.f32.xlu0 %v3550_v62  ;;  %v3559_v12 = vsel %vm936_vm2, %v9811_v30, 0.0  ;;  %v3414_v62 = vsub.f32 %v9647_v55, %v3378_v53  ;;  %7742 = vpow2.f32 %v3477_v61 }
 0x835   : > { %v9815_v33 = vpop.eup %7736  ;;  %3563 = vadd.xlane.f32.xlu1 %v3562_v37  ;;  %v3479_v37 = vmul.f32 1.442695, %v3416_v44 }
 0x836   : > { %v9819_v28 = vpop.eup %7738  ;;  %v3556_v40 = vsel %vm936_vm2, %v9815_v33, 0.0 }
 0x837   : > { %3560 = vadd.xlane.f32.xlu0 %v3559_v12  ;;  %v3553_v32 = vsel %vm936_vm2, %v9819_v28, 0.0  ;;  %v3475_v12 = vmul.f32 1.442695, %v3414_v62  ;;  %7744 = vpow2.f32 %v3479_v37 }
 0x839   : > { %3557 = vadd.xlane.f32.xlu1 %v3556_v40  ;;  %7746 = vpow2.f32 %v3475_v12 }
 0x83b   : > { %3554 = vadd.xlane.f32.xlu0 %v3553_v32  ;;  %v9833_v32 = vpop.eup %7740 }
 0x83c   : > { %v3565_v23 = vsel %vm936_vm2, %v9833_v32, 0.0 }
 0x83d   : > { %v9835_v3 = vpop.eup %7742 }
 0x83e   : > { %v3571_v55 = vsel %vm936_vm2, %v9835_v3, 0.0 }
 0x841   : > { %v9839_v50 = vpop.eup %7744 }
 0x842   : > { %v3574_v10 = vsel %vm936_vm2, %v9839_v50, 0.0 }
 0x843   : > { %v9843_v11 = vpop.eup %7746 }
 0x844   : > { %v3568_v8 = vsel %vm936_vm2, %v9843_v11, 0.0 }
 0x84a   : > { %4164 = vrot.lane.b32.xlu1 %v8113_v25, %s7956_s14 }
 0x851   : > { %4051 = vrot.lane.b32.xlu0 %v8087_v5, %s7957_s15 }
 0x868   : > { %v3489_v40 = vpop.xlane.xlu0 %3488 }
 0x86c   : > { %v3483_v9 = vpop.xlane.xlu0 %3482 }
 0x86d   : > { %v3492_v27 = vpop.xlane.xlu1 %3491 }
 0x86e   : > { %3566 = vadd.xlane.f32.xlu1 %v3565_v23  ;;  %7748 = vrcp.f32 %v3492_v27 }
 0x86f   : > { %7750 = vrcp.f32 %v3483_v9 }
 0x870   : > { %3572 = vadd.xlane.f32.xlu0 %v3571_v55  ;;  %7752 = vrcp.f32 %v3489_v40  ;;  %v11249_v55 = vld [vmem:[#allocation2_spill] sm:$0xff] }
 0x871   : > { %v3486_v18 = vpop.xlane.xlu1 %3485 }
 0x872   : > { %7754 = vrcp.f32 %v3486_v18  ;;  %3575 = vadd.xlane.f32.xlu1 %v3574_v10 }
 0x874   : > { %3569 = vadd.xlane.f32.xlu0 %v3568_v8 }
 0x878   : > { %v7749_v53 = vpop.eup %7748 }
 0x879   : > { %v7751_v44 = vpop.eup %7750  ;;  %v3644_v62 = vmul.f32 %v7749_v53, %v9695_v13 }
 0x87a   : > { %v7753_v22 = vpop.eup %7752  ;;  %v3641_v37 = vmul.f32 %v7751_v44, %v9693_v48 }
 0x87b   : > { %v3643_v40 = vmul.f32 %v7753_v22, %v9689_v1 }
 0x87c   : > { %v7755_v61 = vpop.eup %7754 }
 0x87d   : > { %v3642_v12 = vmul.f32 %v7755_v61, %v9701_v51  ;;  %v3674_v27 = vpack.c.bf16 %v3644_v62, %v3643_v40 }
 0x87f   : > { %v3673_v9 = vpack.c.bf16 %v3642_v12, %v3641_v37 }
 0x881   : > { %6878 = vmatprep.mubr.msk.bf16.mxu1 %vm936_vm2, %v3673_v9 }
 0x882   : > { %6879 = vmatmul.mubr.msk.bf16.vlgmr.msra.gmra.mrb[72].mxu1 %vm936_vm2, %v3674_v27 }
 0x883   : > { %6903 = vmatpush3.bf16.msra.mxu1 %v9420_v63  ;;  %4150 = vrot.lane.b32.xlu1 %v8101_v16, %s7957_s15 }
 0x884   : > { %6904 = vmatprep.subr.bf16.mxu1 %v9621_v49 }
 0x887   : > { %6905 = vmatpush3.bf16.msra.mxu1 %v9621_v49  ;;  %4267 = vrot.lane.b32.xlu1 %v8139_v46, %s7956_s14 }
 0x888   : > { %6906 = vmatprep.subr.bf16.mxu1 %v9635_v20 }
 0x88a   : > { %4265 = vrot.lane.b32.xlu0 %v8125_v35, %s7956_s14 }
 0x88b   : > { %6907 = vmatpush3.bf16.msra.mxu1 %v9635_v20  ;;  %4154 = vrot.lane.b32.xlu1 %v11187_v34, %s7957_s15 }
 0x88c   : > { %6908 = vmatprep.subr.bf16.mxu1 %v9651_v43 }
 0x88e   : > { %4152 = vrot.lane.b32.xlu0 %v8099_v15, %s7957_s15 }
 0x88f   : > { %6909 = vmatpush3.bf16.msra.mxu1 %v9651_v43  ;;  %4269 = vrot.lane.b32.xlu1 %v8137_v45, %s7956_s14 }
 0x890   : > { %7146 = vmatprep.subr.msk.bf16.mxu1 %vm543_vm1, %v9657_v26 }
 0x892   : > { %4368 = vrot.lane.b32.xlu0 %v8151_v57, %s7956_s14 }
 0x893   : > { %4255 = vrot.lane.b32.xlu1 %v8127_v36, %s7957_s15 }
 0x896   : > { %v3501_v63 = vpop.xlane.xlu1 %3500  ;;  %4156 = vrot.lane.b32.xlu0 %v8113_v25, %s7957_s15 }
 0x897   : > { %4372 = vrot.lane.b32.xlu1 %v8163_v7, %s7956_s14 }
 0x89a   : > { %v3504_v1 = vpop.xlane.xlu1 %3503  ;;  %4370 = vrot.lane.b32.xlu0 %v8149_v56, %s7956_s14  ;;  %v3495_v20 = vpop.xlane.xlu0 %3494 }
 0x89b   : > { %4261 = vrot.lane.b32.xlu1 %v8137_v45, %s7957_s15  ;;  %7756 = vrcp.f32 %v3504_v1 }
 0x89c   : > { %7758 = vrcp.f32 %v3495_v20 }
 0x89d   : > { %7760 = vrcp.f32 %v3501_v63 }
 0x89e   : > { %v3498_v49 = vpop.xlane.xlu1 %3497  ;;  %4257 = vrot.lane.b32.xlu0 %v8125_v35, %s7957_s15 }
 0x89f   : > { %7762 = vrcp.f32 %v3498_v49  ;;  %4360 = vrot.lane.b32.xlu1 %v8151_v57, %s7957_s15  ;;  %v11251_v49 = vld [vmem:[#allocation4_spill] sm:$0xff] }
 0x8a0   : > { %v3516_v48 = vpop.xlane.xlu0 %3515 }
 0x8a2   : > { %v3513_v43 = vpop.xlane.xlu1 %3512  ;;  %4259 = vrot.lane.b32.xlu0 %v8139_v46, %s7957_s15 }
 0x8a3   : > { %4364 = vrot.lane.b32.xlu1 %v8163_v7, %s7957_s15  ;;  %7764 = vrcp.f32 %v3513_v43 }
 0x8a5   : > { %v7757_v13 = vpop.eup %7756 }
 0x8a6   : > { %v3507_v51 = vpop.xlane.xlu1 %3506  ;;  %4374 = vrot.lane.b32.xlu0 %v11188_v0, %s7956_s14  ;;  %v7759_v23 = vpop.eup %7758  ;;  %v3648_v53 = vmul.f32 %v7757_v13, %v9717_v14 }
 0x8a7   : > { %4867 = vrot.lane.b32.xlu1 %v11249_v55, %s7958_s16  ;;  %v7761_v18 = vpop.eup %7760  ;;  %v3525_v10 = vpop.xlane.xlu0 %3524  ;;  %7766 = vrcp.f32 %v3507_v51  ;;  %v3645_v22 = vmul.f32 %v7759_v23, %v9720_v58 }
 0x8a8   : > { %7768 = vrcp.f32 %v3516_v48  ;;  %v3647_v62 = vmul.f32 %v7761_v18, %v9712_v2 }
 0x8a9   : > { %v7763_v8 = vpop.eup %7762 }
 0x8aa   : > { %v3510_v44 = vpop.xlane.xlu1 %3509  ;;  %4362 = vrot.lane.b32.xlu0 %v8149_v56, %s7957_s15  ;;  %v3646_v61 = vmul.f32 %v7763_v8, %v9726_v52  ;;  %v3676_v40 = vpack.c.bf16 %v3648_v53, %v3647_v62  ;;  %v11250_v52 = vld [vmem:[#allocation3_spill] sm:$0xff] }
 0x8ab   : > { %7770 = vrcp.f32 %v3510_v44  ;;  %4954 = vrot.lane.b32.xlu1 %v8101_v16, %s7958_s16  ;;  %v11253_v44 = vld [vmem:[#allocation70_spill] sm:$0xff] }
 0x8ac   : > { %v3522_v37 = vpop.xlane.xlu0 %3521  ;;  %v3675_v12 = vpack.c.bf16 %v3646_v61, %v3645_v22  ;;  %v11254_v61 = vld [vmem:[#allocation71_spill] sm:$0xff] }
 0x8ad   : > { %7772 = vrcp.f32 %v3522_v37  ;;  %v7765_v16 = vpop.eup %7764 }
 0x8ae   : > { %v3519_v14 = vpop.xlane.xlu1 %3518  ;;  %4366 = vrot.lane.b32.xlu0 %v11188_v0, %s7957_s15  ;;  %6882 = vmatprep.mubr.msk.bf16.mxu1 %vm936_vm2, %v3675_v12  ;;  %v3651_v20 = vmul.f32 %v7765_v16, %v9731_v47 }
 0x8af   : > { %7774 = vrcp.f32 %v3519_v14  ;;  %4956 = vrot.lane.b32.xlu1 %v8099_v15, %s7958_s16  ;;  %6883 = vmatmul.mubr.msk.bf16.gmra.mrb[76].mxu1 %vm936_vm2, %v3676_v40  ;;  %v11255_v14 = vld [vmem:[#allocation72_spill] sm:$0xff] }
 0x8b0   : > { %v3540_v58 = vpop.xlane.xlu0 %3539  ;;  %7776 = vrcp.f32 %v3525_v10 }
 0x8b1   : > { %v7767_v9 = vpop.eup %7766 }
 0x8b2   : > { %v3528_v2 = vpop.xlane.xlu1 %3527  ;;  %4865 = vrot.lane.b32.xlu0 %v11250_v52, %s7958_s16  ;;  %v7769_v27 = vpop.eup %7768  ;;  %v3649_v43 = vmul.f32 %v7767_v9, %v9743_v60 }
 0x8b3   : > { %7778 = vrcp.f32 %v3528_v2  ;;  %4960 = vrot.lane.b32.xlu1 %v8113_v25, %s7958_s16  ;;  %v3652_v51 = vmul.f32 %v7769_v27, %v9735_v21 }
 0x8b4   : > { %v3534_v63 = vpop.xlane.xlu0 %3533 }
 0x8b5   : > { %v7771_v1 = vpop.eup %7770  ;;  %v3678_v18 = vpack.c.bf16 %v3652_v51, %v3651_v20 }
 0x8b6   : > { %v3537_v15 = vpop.xlane.xlu1 %3536  ;;  %4869 = vrot.lane.b32.xlu0 %v11251_v49, %s7958_s16  ;;  %v3650_v48 = vmul.f32 %v7771_v1, %v9753_v39  ;;  %v11256_v1 = vld [vmem:[#allocation74_spill] sm:$0xff]  ;;  %v11257_v49 = vld [vmem:[#allocation73_spill] sm:$0xff] }
 0x8b7   : > { %v7773_v13 = vpop.eup %7772  ;;  %5045 = vrot.lane.b32.xlu1 %v8125_v35, %s7958_s16  ;;  %7780 = vrcp.f32 %v3537_v15  ;;  %v11252_v35 = vld [vmem:[#allocation5_spill] sm:$0xff] }
 0x8b8   : > { %v3549_v25 = vpop.xlane.xlu0 %3548  ;;  %v3677_v23 = vpack.c.bf16 %v3650_v48, %v3649_v43  ;;  %7782 = vrcp.f32 %v3534_v63  ;;  %v3654_v21 = vmul.f32 %v7773_v13, %v9760_v4 }
 0x8b9   : > { %v7775_v55 = vpop.eup %7774  ;;  %7784 = vrcp.f32 %v3540_v58 }
 0x8ba   : > { %6894 = vmatprep.mubr.msk.bf16.mxu0 %vm936_vm2, %v3677_v23  ;;  %v3531_v47 = vpop.xlane.xlu1 %3530  ;;  %4871 = vrot.lane.b32.xlu0 %v8087_v5, %s7958_s16  ;;  %v3653_v60 = vmul.f32 %v7775_v55, %v9756_v38  ;;  %v7777_v39 = vpop.eup %7776  ;;  %v11258_v55 = vld [vmem:[#allocation78_spill] sm:$0xff] }
 0x8bb   : > { %7786 = vrcp.f32 %v3531_v47  ;;  %5049 = vrot.lane.b32.xlu1 %v8137_v45, %s7958_s16  ;;  %6895 = vmatmul.mubr.msk.bf16.vlgmr.msra.gmra.mrb[120].mxu0 %vm936_vm2, %v3678_v18  ;;  %v3655_v38 = vmul.f32 %v7777_v39, %v9745_v19  ;;  %v11259_v18 = vld [vmem:[#allocation83_spill] sm:$0xff]  ;;  %v4179_v39 = vsel %vm543_vm1, %v11256_v1, 0 }
 0x8bc   : > { %6919 = vmatpush3.bf16.msra.mxu0 %v11252_v35  ;;  %v3543_v10 = vpop.xlane.xlu0 %3542  ;;  %v3679_v8 = vpack.c.bf16 %v3654_v21, %v3653_v60  ;;  %v11260_v60 = vld [vmem:[#allocation75_spill] sm:$0xff]  ;;  %v11261_v35 = vld [vmem:[#allocation77_spill] sm:$0xff] }
 0x8bd   : > { %v7779_v53 = vpop.eup %7778  ;;  %6920 = vmatprep.subr.bf16.mxu0 %v11253_v44  ;;  %7788 = vrcp.f32 %v3543_v10  ;;  %v4182_v10 = vsel %vm543_vm1, %v11261_v35, 0 }
 0x8be   : > { %v3546_v5 = vpop.xlane.xlu1 %3545  ;;  %4958 = vrot.lane.b32.xlu0 %v11187_v34, %s7958_s16  ;;  %6898 = vmatprep.mubr.msk.bf16.mxu0 %vm936_vm2, %v3679_v8  ;;  %v3656_v45 = vmul.f32 %v7779_v53, %v9767_v6  ;;  %v11263_v8 = vld [vmem:[#allocation80_spill] sm:$0xff] }
 0x8bf   : > { %7790 = vrcp.f32 %v3546_v5  ;;  %v4185_v5 = vsel %vm543_vm1, %v11263_v8, 0 }
 0x8c0   : > { %6921 = vmatpush3.bf16.msra.mxu0 %v11253_v44  ;;  %v3552_v4 = vpop.xlane.xlu0 %3551  ;;  %v3680_v22 = vpack.c.bf16 %v3656_v45, %v3655_v38  ;;  %v11264_v44 = vld [vmem:[#allocation81_spill] sm:$0xff]  ;;  %v11265_v45 = vld [vmem:[#allocation79_spill] sm:$0xff] }
 0x8c1   : > { %6922 = vmatprep.subr.bf16.mxu0 %v11254_v61  ;;  %7792 = vrcp.f32 %v3552_v4  ;;  %v7781_v62 = vpop.eup %7780  ;;  %v4284_v4 = vsel %vm543_vm1, %v11264_v44, 0 }
 0x8c2   : > { %7794 = vrcp.f32 %v3549_v25  ;;  %v3564_v37 = vpop.xlane.xlu1 %3563  ;;  %5043 = vrot.lane.b32.xlu0 %v8127_v36, %s7958_s16  ;;  %v7783_v34 = vpop.eup %7782  ;;  %v3659_v40 = vmul.f32 %v7781_v62, %v9777_v29 }
 0x8c3   : > { %6899 = vmatmul.mubr.msk.bf16.gmra.mrb[124].mxu0 %vm936_vm2, %v3680_v22  ;;  %v7785_v19 = vpop.eup %7784  ;;  %v3658_v36 = vmul.f32 %v7783_v34, %v9781_v54  ;;  %v11266_v22 = vld [vmem:[#allocation82_spill] sm:$0xff] }
 0x8c4   : > { %6923 = vmatpush3.bf16.msra.mxu0 %v11254_v61  ;;  %v3561_v6 = vpop.xlane.xlu0 %3560  ;;  %v3660_v52 = vmul.f32 %v7785_v19, %v9771_v41  ;;  %v4074_v41 = vsel %vm543_vm1, %v9657_v26, 0  ;;  %v4077_v26 = vsel %vm543_vm1, %v11257_v49, 0 }
 0x8c5   : > { %v7787_v12 = vpop.eup %7786  ;;  %6924 = vmatprep.subr.bf16.mxu0 %v11255_v14  ;;  %7796 = vrcp.f32 %v3561_v6 }
 0x8c6   : > { %v3558_v58 = vpop.xlane.xlu1 %3557  ;;  %5047 = vrot.lane.b32.xlu0 %v8139_v46, %s7958_s16  ;;  %v3657_v16 = vmul.f32 %v7787_v12, %v9791_v59  ;;  %v3682_v63 = vpack.c.bf16 %v3660_v52, %v3659_v40 }
 0x8c7   : > { %v7789_v2 = vpop.eup %7788  ;;  %7798 = vrcp.f32 %v3558_v58 }
 0x8c8   : > { %7800 = vrcp.f32 %v3564_v37  ;;  %6925 = vmatpush3.bf16.msra.mxu0 %v11255_v14  ;;  %v3555_v9 = vpop.xlane.xlu0 %3554  ;;  %v3681_v29 = vpack.c.bf16 %v3658_v36, %v3657_v16  ;;  %v3661_v46 = vmul.f32 %v7789_v2, %v9795_v31 }
 0x8c9   : > { %v7791_v27 = vpop.eup %7790  ;;  %7150 = vmatprep.subr.msk.bf16.mxu0 %vm543_vm1, %v11256_v1  ;;  %7802 = vrcp.f32 %v3555_v9 }
 0x8ca   : > { %6910 = vmatprep.mubr.msk.bf16.mxu1 %vm936_vm2, %v3681_v29  ;;  %v3662_v54 = vmul.f32 %v7791_v27, %v9799_v42  ;;  %v4165_v38 = vpop.permute.xlu1 %4164 }
 0x8cb   : > { %v7793_v59 = vpop.eup %7792  ;;  %6911 = vmatmul.mubr.msk.bf16.vlgmr.msra.gmra.mrb[80].mxu1 %vm936_vm2, %v3682_v63  ;;  %v4188_v61 = vsel %vm543_vm1, %v4165_v38, 0 }
 0x8cc   : > { %v7795_v20 = vpop.eup %7794  ;;  %6935 = vmatpush3.bf16.xpose.msra.mxu1 %v4074_v41  ;;  %v3683_v15 = vpack.c.bf16 %v3662_v54, %v3661_v46  ;;  %v3664_v43 = vmul.f32 %v7793_v59, %v9803_v17  ;;  %v4052_v62 = vpop.permute.xlu0 %4051 }
 0x8cd   : > { %7147 = vmatprep.subr.msk.bf16.mxu1 %vm543_vm1, %v11257_v49  ;;  %v3663_v31 = vmul.f32 %v7795_v20, %v9786_v24 }
 0x8ce   : > { %6914 = vmatprep.mubr.msk.bf16.mxu1 %vm936_vm2, %v3683_v15 }
 0x8cf   : > { %v7797_v48 = vpop.eup %7796  ;;  %v3684_v13 = vpack.c.bf16 %v3664_v43, %v3663_v31 }
 0x8d0   : > { %v3667_v23 = vmul.f32 %v7797_v48, %v9811_v30 }
 0x8d1   : > { %v7799_v42 = vpop.eup %7798 }
 0x8d2   : > { %v7801_v51 = vpop.eup %7800  ;;  %v3666_v24 = vmul.f32 %v7799_v42, %v9815_v33  ;;  %v4080_v33 = vsel %vm543_vm1, %v11260_v60, 0 }
 0x8d3   : > { %v7803_v25 = vpop.eup %7802  ;;  %6915 = vmatmul.mubr.msk.bf16.gmra.mrb[84].mxu1 %vm936_vm2, %v3684_v13  ;;  %v3668_v47 = vmul.f32 %v7801_v51, %v11259_v18 }
 0x8d4   : > { %6937 = vmatpush3.bf16.xpose.msra.mxu1 %v4077_v26  ;;  %6942 = vmatprep.mubr.msk.bf16.mxu1 %vm543_vm1, %v11258_v55  ;;  %v3665_v17 = vmul.f32 %v7803_v25, %v9819_v28  ;;  %v11262_v28 = vld [vmem:[#allocation76_spill] sm:$0xff] }
 0x8d5   : > { %7148 = vmatprep.subr.msk.bf16.mxu1 %vm543_vm1, %v11260_v60  ;;  %v3686_v30 = vpack.c.bf16 %v3668_v47, %v3667_v23  ;;  %v4083_v53 = vsel %vm543_vm1, %v11262_v28, 0 }
 0x8d6   : > { %v3685_v21 = vpack.c.bf16 %v3666_v24, %v3665_v17 }
 0x8d8   : > { %6926 = vmatprep.mubr.msk.bf16.mxu0 %vm936_vm2, %v3685_v21 }
 0x8d9   : > { %6927 = vmatmul.mubr.msk.bf16.vlgmr.msra.gmra.mrb[128].mxu0 %vm936_vm2, %v3686_v30 }
 0x8da   : > { %6951 = vmatpush3.bf16.xpose.msra.mxu0 %v4179_v39 }
 0x8db   : > { %7151 = vmatprep.subr.msk.bf16.mxu0 %vm543_vm1, %v11261_v35 }
 0x8dc   : > { %6939 = vmatpush3.bf16.xpose.msra.mxu1 %v4080_v33 }
 0x8dd   : > { %7149 = vmatprep.subr.msk.bf16.mxu1 %vm543_vm1, %v11262_v28 }
 0x8e2   : > { %6953 = vmatpush3.bf16.xpose.msra.mxu0 %v4182_v10 }
 0x8e3   : > { %7152 = vmatprep.subr.msk.bf16.mxu0 %vm543_vm1, %v11263_v8 }
 0x8e4   : > { %6941 = vmatpush3.bf16.xpose.msra.mxu1 %v4083_v53 }
 0x8e5   : > { %7154 = vmatprep.subr.msk.bf16.mxu1 %vm543_vm1, %v11264_v44 }
 0x8ea   : > { %6955 = vmatpush3.bf16.xpose.msra.mxu0 %v4185_v5 }
 0x8eb   : > { %6943 = vmatmul.mubr.msk.bf16.vlgmr.msra.gmra.mrb[88].mxu1 %vm543_vm1, %v11265_v45  ;;  %7153 = vmatprep.subr.msk.bf16.mxu0 %vm543_vm1, %v4165_v38 }
 0x8ec   : > { %6946 = vmatprep.mubr.msk.bf16.mxu1 %vm543_vm1, %v11266_v22  ;;  %6967 = vmatpush3.bf16.xpose.msra.mxu1 %v4284_v4 }
 0x8f2   : > { %6957 = vmatpush3.bf16.xpose.msra.mxu0 %v4188_v61 }
 0x8f3   : > { %6947 = vmatmul.mubr.msk.bf16.gmra.mrb[92].mxu1 %vm543_vm1, %v4052_v62 }
 0x8fb   : > { %v3567_v37 = vpop.xlane.xlu1 %3566 }
 0x8fc   : > { %7804 = vrcp.f32 %v3567_v37 }
 0x8fd   : > { %v3573_v34 = vpop.xlane.xlu0 %3572 }
 0x8ff   : > { %v3576_v19 = vpop.xlane.xlu1 %3575 }
 0x900   : > { %7806 = vrcp.f32 %v3576_v19 }
 0x901   : > { %7808 = vrcp.f32 %v3573_v34  ;;  %v3570_v6 = vpop.xlane.xlu0 %3569 }
 0x902   : > { %7810 = vrcp.f32 %v3570_v6 }
 0x903   : > { %v4151_v12 = vpop.permute.xlu1 %4150 }
 0x905   : > { %v4266_v40 = vpop.permute.xlu0 %4265 }
 0x906   : > { %7155 = vmatprep.subr.msk.bf16.mxu1 %vm543_vm1, %v4266_v40  ;;  %v4287_v14 = vsel %vm543_vm1, %v4266_v40, 0  ;;  %v7805_v16 = vpop.eup %7804 }
 0x907   : > { %v4268_v58 = vpop.permute.xlu1 %4267  ;;  %6969 = vmatpush3.bf16.xpose.msra.mxu1 %v4287_v14  ;;  %v3669_v1 = vmul.f32 %v7805_v16, %v9833_v32 }
 0x908   : > { %7156 = vmatprep.subr.msk.bf16.mxu1 %vm543_vm1, %v4268_v58  ;;  %v4290_v54 = vsel %vm543_vm1, %v4268_v58, 0 }
 0x909   : > { %v4153_v36 = vpop.permute.xlu0 %4152 }
 0x90a   : > { %v7807_v2 = vpop.eup %7806 }
 0x90b   : > { %v7809_v52 = vpop.eup %7808  ;;  %v4155_v9 = vpop.permute.xlu1 %4154  ;;  %v3672_v27 = vmul.f32 %v7807_v2, %v9839_v50 }
 0x90c   : > { %v7811_v29 = vpop.eup %7810  ;;  %v3671_v59 = vmul.f32 %v7809_v52, %v9835_v3 }
 0x90d   : > { %v4369_v63 = vpop.permute.xlu0 %4368  ;;  %v3670_v46 = vmul.f32 %v7811_v29, %v9843_v11 }
 0x90e   : > { %7158 = vmatprep.subr.msk.bf16.mxu0 %vm543_vm1, %v4369_v63  ;;  %v3688_v15 = vpack.c.bf16 %v3672_v27, %v3671_v59  ;;  %v4389_v31 = vsel %vm543_vm1, %v4369_v63, 0 }
 0x90f   : > { %v4270_v41 = vpop.permute.xlu1 %4269  ;;  %6971 = vmatpush3.bf16.xpose.msra.mxu1 %v4290_v54  ;;  %v3687_v20 = vpack.c.bf16 %v3670_v46, %v3669_v1 }
 0x910   : > { %7157 = vmatprep.subr.msk.bf16.mxu1 %vm543_vm1, %v4270_v41  ;;  %v4293_v49 = vsel %vm543_vm1, %v4270_v41, 0 }
 0x911   : > { %6930 = vmatprep.mubr.msk.bf16.mxu0 %vm936_vm2, %v3687_v20  ;;  %v4157_v50 = vpop.permute.xlu0 %4156 }
 0x912   : > { %6931 = vmatmul.mubr.msk.bf16.gmra.mrb[132].mxu0 %vm936_vm2, %v3688_v15 }
 0x913   : > { %v4256_v32 = vpop.permute.xlu1 %4255  ;;  %6958 = vmatprep.mubr.msk.bf16.mxu0 %vm543_vm1, %v4151_v12 }
 0x914   : > { %6974 = vmatprep.mubr.msk.bf16.mxu1 %vm543_vm1, %v4256_v32 }
 0x915   : > { %v4371_v11 = vpop.permute.xlu0 %4370 }
 0x916   : > { %v4392_v25 = vsel %vm543_vm1, %v4371_v11, 0 }
 0x917   : > { %v4373_v3 = vpop.permute.xlu1 %4372  ;;  %6973 = vmatpush3.bf16.xpose.msra.mxu1 %v4293_v49 }
 0x918   : > { %v4395_v17 = vsel %vm543_vm1, %v4373_v3, 0 }
 0x919   : > { %v4258_v43 = vpop.permute.xlu0 %4257 }
 0x91a   : > { %6959 = vmatmul.mubr.msk.bf16.vlgmr.msra.gmra.mrb[136].mxu0 %vm543_vm1, %v4153_v36 }
 0x91b   : > { %6983 = vmatpush3.bf16.xpose.msra.mxu0 %v4389_v31  ;;  %v4262_v48 = vpop.permute.xlu1 %4261  ;;  %6962 = vmatprep.mubr.msk.bf16.mxu0 %vm543_vm1, %v4155_v9 }
 0x91c   : > { %7159 = vmatprep.subr.msk.bf16.mxu0 %vm543_vm1, %v4371_v11 }
 0x91d   : > { %v4260_v42 = vpop.permute.xlu0 %4259 }
 0x91e   : > { %6975 = vmatmul.mubr.msk.bf16.vlgmr.msra.gmra.mrb[96].mxu1 %vm543_vm1, %v4258_v43 }
 0x91f   : > { %6978 = vmatprep.mubr.msk.bf16.mxu1 %vm543_vm1, %v4260_v42  ;;  %v4361_v13 = vpop.permute.xlu1 %4360 }
 0x921   : > { %v4375_v51 = vpop.permute.xlu0 %4374 }
 0x922   : > { %6963 = vmatmul.mubr.msk.bf16.gmra.mrb[140].mxu0 %vm543_vm1, %v4157_v50  ;;  %v4398_v60 = vsel %vm543_vm1, %v4375_v51, 0 }
 0x923   : > { %6985 = vmatpush3.bf16.xpose.msra.mxu0 %v4392_v25  ;;  %6990 = vmatprep.mubr.msk.bf16.mxu0 %vm543_vm1, %v4361_v13  ;;  %v4365_v26 = vpop.permute.xlu1 %4364 }
 0x924   : > { %7160 = vmatprep.subr.msk.bf16.mxu0 %vm543_vm1, %v4373_v3 }
 0x925   : > { %v4363_v23 = vpop.permute.xlu0 %4362 }
 0x926   : > { %6979 = vmatmul.mubr.msk.bf16.gmra.mrb[100].mxu1 %vm543_vm1, %v4262_v48 }
 0x927   : > { %v4868_v24 = vpop.permute.xlu1 %4867 }
 0x929   : > { %v4367_v55 = vpop.permute.xlu0 %4366 }
 0x92b   : > { %6987 = vmatpush3.bf16.xpose.msra.mxu0 %v4395_v17  ;;  %v4955_v21 = vpop.permute.xlu1 %4954 }
 0x92c   : > { %7161 = vmatprep.subr.msk.bf16.mxu0 %vm543_vm1, %v4375_v51 }
 0x92d   : > { %v4866_v18 = vpop.permute.xlu0 %4865 }
 0x92e   : > { %6998 = vmatprep.subr.bf16.mxu1 %v4866_v18 }
 0x92f   : > { %6999 = vmatpush3.bf16.msra.mxu1 %v4866_v18  ;;  %v4957_v35 = vpop.permute.xlu1 %4956 }
 0x930   : > { %7000 = vmatprep.subr.bf16.mxu1 %v4868_v24 }
 0x931   : > { %v4870_v47 = vpop.permute.xlu0 %4869 }
 0x933   : > { %6989 = vmatpush3.bf16.xpose.msra.mxu0 %v4398_v60  ;;  %7001 = vmatpush3.bf16.msra.mxu1 %v4868_v24  ;;  %v4961_v28 = vpop.permute.xlu1 %4960 }
 0x934   : > { %7014 = vmatprep.subr.bf16.mxu0 %v4955_v21  ;;  %7002 = vmatprep.subr.bf16.mxu1 %v4870_v47 }
 0x935   : > { %v4872_v30 = vpop.permute.xlu0 %4871 }
 0x937   : > { %7003 = vmatpush3.bf16.msra.mxu1 %v4870_v47 }
 0x938   : > { %7004 = vmatprep.subr.bf16.mxu1 %v4872_v30 }
 0x939   : > { %v4959_v39 = vpop.permute.xlu0 %4958 }
 0x93a   : > { %6991 = vmatmul.mubr.msk.bf16.vlgmr.msra.gmra.mrb[144].mxu0 %vm543_vm1, %v4363_v23 }
 0x93b   : > { %6994 = vmatprep.mubr.msk.bf16.mxu0 %vm543_vm1, %v4365_v26  ;;  %7015 = vmatpush3.bf16.msra.mxu0 %v4955_v21 }
 0x93c   : > { %7005 = vmatpush3.bf16.msra.mxu1 %v4872_v30  ;;  %7016 = vmatprep.subr.bf16.mxu0 %v4957_v35 }
 0x93d   : > { %v10039_v33 = vpop.permute.xlu0 %5043 }
 0x93e   : > { %11267 = vst [vmem:[#allocation2_spill] sm:$0xff] %v10039_v33  ;;  %7030 = vmatprep.subr.bf16.mxu1 %v10039_v33 }
 0x93f   : > { %7017 = vmatpush3.bf16.msra.mxu0 %v4957_v35 }
 0x940   : > { %7018 = vmatprep.subr.bf16.mxu0 %v4959_v39 }
 0x942   : > { %6995 = vmatmul.mubr.msk.bf16.gmra.mrb[148].mxu0 %vm543_vm1, %v4367_v55 }
 0x943   : > { %7019 = vmatpush3.bf16.msra.mxu0 %v4959_v39 }
 0x944   : > { %7020 = vmatprep.subr.bf16.mxu0 %v4961_v28 }
 0x947   : > { %7021 = vmatpush3.bf16.msra.mxu0 %v4961_v28 }
 0x955   : > { %v10043_v10 = vpop.f32.mrb[72].mxu1 }
 0x956   : > { %v10045_v8 = vpop.f32.mrb[73].mxu1 }
 0x957   : > { %v10047_v53 = vpop.f32.mrb[74].mxu1 }
 0x958   : > { %v10051_v5 = vpop.f32.mrb[75].mxu1 }
 0x982   : > { %v10055_v45 = vpop.f32.mrb[76].mxu1 }
 0x983   : > { %v10057_v4 = vpop.f32.mrb[77].mxu1 }
 0x984   : > { %v10059_v22 = vpop.f32.mrb[78].mxu1 }
 0x985   : > { %v10063_v62 = vpop.f32.mrb[79].mxu1 }
 0x98e   : > { %v10067_v34 = vpop.f32.mrb[120].mxu0 }
 0x98f   : > { %v10069_v19 = vpop.f32.mrb[121].mxu0 }
 0x990   : > { %v10071_v6 = vpop.f32.mrb[122].mxu0 }
 0x991   : > { %v10075_v40 = vpop.f32.mrb[123].mxu0 }
 0x996   : > { %v10079_v58 = vpop.f32.mrb[124].mxu0 }
 0x997   : > { %v10081_v16 = vpop.f32.mrb[125].mxu0 }
 0x998   : > { %v10083_v36 = vpop.f32.mrb[126].mxu0 }
 0x999   : > { %v10087_v52 = vpop.f32.mrb[127].mxu0 }
 0x99e   : > { %v10091_v29 = vpop.f32.mrb[80].mxu1 }
 0x99f   : > { %11268 = vst [vmem:[#allocation3_spill] sm:$0xff] %v10091_v29  ;;  %v10093_v27 = vpop.f32.mrb[81].mxu1 }
 0x9a0   : > { %11269 = vst [vmem:[#allocation4_spill] sm:$0xff] %v10093_v27  ;;  %v10095_v63 = vpop.f32.mrb[82].mxu1 }
 0x9a1   : > { %11270 = vst [vmem:[#allocation5_spill] sm:$0xff] %v10095_v63  ;;  %v10099_v46 = vpop.f32.mrb[83].mxu1 }
 0x9a2   : > { %11271 = vst [vmem:[#allocation70_spill] sm:$0xff] %v10099_v46 }
 0x9a6   : > { %v10103_v59 = vpop.f32.mrb[84].mxu1 }
 0x9a7   : > { %11272 = vst [vmem:[#allocation71_spill] sm:$0xff] %v10103_v59  ;;  %v10105_v41 = vpop.f32.mrb[85].mxu1 }
 0x9a8   : > { %11273 = vst [vmem:[#allocation72_spill] sm:$0xff] %v10105_v41  ;;  %v10107_v20 = vpop.f32.mrb[86].mxu1 }
 0x9a9   : > { %11274 = vst [vmem:[#allocation74_spill] sm:$0xff] %v10107_v20  ;;  %v10111_v50 = vpop.f32.mrb[87].mxu1 }
 0x9aa   : > { %11275 = vst [vmem:[#allocation73_spill] sm:$0xff] %v10111_v50  ;;  %v10273_v50 = vpop.permute.xlu0 %5047 }
 0x9ab   : > { %11285 = vst [vmem:[#allocation84_spill] sm:$0xff] %v10273_v50 }
 0x9ac   : > { %v10115_v11 = vpop.f32.mrb[128].mxu0 }
 0x9ad   : > { %11276 = vst [vmem:[#allocation78_spill] sm:$0xff] %v10115_v11  ;;  %v10117_v49 = vpop.f32.mrb[129].mxu0 }
 0x9ae   : > { %11277 = vst [vmem:[#allocation83_spill] sm:$0xff] %v10117_v49  ;;  %v10119_v3 = vpop.f32.mrb[130].mxu0 }
 0x9af   : > { %11278 = vst [vmem:[#allocation75_spill] sm:$0xff] %v10119_v3  ;;  %v10123_v31 = vpop.f32.mrb[131].mxu0 }
 0x9b0   : > { %11279 = vst [vmem:[#allocation77_spill] sm:$0xff] %v10123_v31 }
 0x9be   : > { %v10127_v42 = vpop.f32.mrb[88].mxu1 }
 0x9bf   : > { %v10129_v13 = vpop.f32.mrb[89].mxu1  ;;  %v4471_v51 = vsel %vm936_vm2, %v10127_v42, -inf }
 0x9c0   : > { %4472 = vmax.xlane.f32.xlu0 %v4471_v51  ;;  %v10133_v25 = vpop.f32.mrb[90].mxu1  ;;  %v4465_v23 = vsel %vm936_vm2, %v10129_v13, -inf }
 0x9c1   : > { %4466 = vmax.xlane.f32.xlu1 %v4465_v23  ;;  %v10137_v26 = vpop.f32.mrb[91].mxu1  ;;  %v4474_v17 = vsel %vm936_vm2, %v10133_v25, -inf }
 0x9c2   : > { %v4468_v55 = vsel %vm936_vm2, %v10137_v26, -inf }
 0x9c4   : > { %4469 = vmax.xlane.f32.xlu0 %v4468_v55 }
 0x9c5   : > { %4475 = vmax.xlane.f32.xlu1 %v4474_v17 }
 0x9c6   : > { %v10143_v24 = vpop.f32.mrb[92].mxu1 }
 0x9c7   : > { %v10145_v18 = vpop.f32.mrb[93].mxu1  ;;  %v4483_v47 = vsel %vm936_vm2, %v10143_v24, -inf }
 0x9c8   : > { %4484 = vmax.xlane.f32.xlu0 %v4483_v47  ;;  %v10149_v60 = vpop.f32.mrb[94].mxu1  ;;  %v4477_v39 = vsel %vm936_vm2, %v10145_v18, -inf }
 0x9c9   : > { %v10151_v21 = vpop.f32.mrb[95].mxu1  ;;  %v4486_v30 = vsel %vm936_vm2, %v10149_v60, -inf }
 0x9ca   : > { %4487 = vmax.xlane.f32.xlu1 %v4486_v30  ;;  %v4480_v35 = vsel %vm936_vm2, %v10151_v21, -inf }
 0x9cc   : > { %4478 = vmax.xlane.f32.xlu0 %v4477_v39 }
 0x9ce   : > { %4481 = vmax.xlane.f32.xlu1 %v4480_v35 }
 0x9e5   : > { %v10159_v28 = vpop.f32.mrb[132].mxu0 }
 0x9e6   : > { %11280 = vst [vmem:[#allocation76_spill] sm:$0xff] %v10159_v28  ;;  %v10161_v51 = vpop.f32.mrb[133].mxu0 }
 0x9e7   : > { %11281 = vst [vmem:[#allocation80_spill] sm:$0xff] %v10161_v51  ;;  %v10163_v23 = vpop.f32.mrb[134].mxu0 }
 0x9e8   : > { %11282 = vst [vmem:[#allocation81_spill] sm:$0xff] %v10163_v23  ;;  %v10167_v17 = vpop.f32.mrb[135].mxu0 }
 0x9e9   : > { %11283 = vst [vmem:[#allocation79_spill] sm:$0xff] %v10167_v17 }
 0x9ed   : > { %v10171_v30 = vpop.f32.mrb[136].mxu0 }
 0x9ee   : > { %v10173_v39 = vpop.f32.mrb[137].mxu0  ;;  %v4495_v35 = vsel %vm936_vm2, %v10171_v30, -inf }
 0x9ef   : > { %4496 = vmax.xlane.f32.xlu0 %v4495_v35  ;;  %v10177_v48 = vpop.f32.mrb[138].mxu0  ;;  %v4489_v47 = vsel %vm936_vm2, %v10173_v39, -inf }
 0x9f0   : > { %v10179_v43 = vpop.f32.mrb[139].mxu0  ;;  %v4498_v55 = vsel %vm936_vm2, %v10177_v48, -inf }
 0x9f1   : > { %4499 = vmax.xlane.f32.xlu1 %v4498_v55  ;;  %v10183_v32 = vpop.f32.mrb[96].mxu1  ;;  %v4492_v35 = vsel %vm936_vm2, %v10179_v43, -inf }
 0x9f2   : > { %v10185_v15 = vpop.f32.mrb[97].mxu1  ;;  %v4519_v51 = vsel %vm936_vm2, %v10183_v32, -inf }
 0x9f3   : > { %4490 = vmax.xlane.f32.xlu0 %v4489_v47  ;;  %v10189_v54 = vpop.f32.mrb[98].mxu1  ;;  %v4513_v17 = vsel %vm936_vm2, %v10185_v15, -inf }
 0x9f4   : > { %v10191_v1 = vpop.f32.mrb[99].mxu1 }
 0x9f5   : > { %4493 = vmax.xlane.f32.xlu1 %v4492_v35  ;;  %v10195_v2 = vpop.f32.mrb[140].mxu0 }
 0x9f6   : > { %v10197_v12 = vpop.f32.mrb[141].mxu0  ;;  %v4507_v55 = vsel %vm936_vm2, %v10195_v2, -inf }
 0x9f7   : > { %4508 = vmax.xlane.f32.xlu0 %v4507_v55  ;;  %v10201_v9 = vpop.f32.mrb[142].mxu0  ;;  %v4501_v35 = vsel %vm936_vm2, %v10197_v12, -inf }
 0x9f8   : > { %v10203_v61 = vpop.f32.mrb[143].mxu0  ;;  %v4510_v47 = vsel %vm936_vm2, %v10201_v9, -inf }
 0x9f9   : > { %4511 = vmax.xlane.f32.xlu1 %v4510_v47  ;;  %v10207_v14 = vpop.f32.mrb[100].mxu1  ;;  %v4504_v55 = vsel %vm936_vm2, %v10203_v61, -inf  ;;  %v4522_v47 = vsel %vm936_vm2, %v10189_v54, -inf }
 0x9fa   : > { %v10209_v44 = vpop.f32.mrb[101].mxu1  ;;  %v4531_v28 = vsel %vm936_vm2, %v10207_v14, -inf }
 0x9fb   : > { %4502 = vmax.xlane.f32.xlu0 %v4501_v35  ;;  %v10213_v37 = vpop.f32.mrb[102].mxu1  ;;  %v4516_v35 = vsel %vm936_vm2, %v10191_v1, -inf }
 0x9fc   : > { %v10215_v38 = vpop.f32.mrb[103].mxu1 }
 0x9fd   : > { %4505 = vmax.xlane.f32.xlu1 %v4504_v55  ;;  %v4534_v55 = vsel %vm936_vm2, %v10213_v37, -inf }
 0x9ff   : > { %4520 = vmax.xlane.f32.xlu0 %v4519_v51  ;;  %v4525_v51 = vsel %vm936_vm2, %v10209_v44, -inf }
 0xa01   : > { %4523 = vmax.xlane.f32.xlu1 %v4522_v47  ;;  %v4528_v47 = vsel %vm936_vm2, %v10215_v38, -inf }
 0xa03   : > { %4514 = vmax.xlane.f32.xlu0 %v4513_v17 }
 0xa05   : > { %4517 = vmax.xlane.f32.xlu1 %v4516_v35 }
 0xa07   : > { %4532 = vmax.xlane.f32.xlu0 %v4531_v28 }
 0xa09   : > { %4535 = vmax.xlane.f32.xlu1 %v4534_v55 }
 0xa0b   : > { %4526 = vmax.xlane.f32.xlu0 %v4525_v51 }
 0xa0d   : > { %v10235_v17 = vpop.f32.mrb[144].mxu0  ;;  %4529 = vmax.xlane.f32.xlu1 %v4528_v47 }
 0xa0e   : > { %v10237_v23 = vpop.f32.mrb[145].mxu0  ;;  %v4543_v35 = vsel %vm936_vm2, %v10235_v17, -inf }
 0xa0f   : > { %v10241_v28 = vpop.f32.mrb[146].mxu0  ;;  %4544 = vmax.xlane.f32.xlu0 %v4543_v35  ;;  %v4537_v51 = vsel %vm936_vm2, %v10237_v23, -inf }
 0xa10   : > { %v10243_v49 = vpop.f32.mrb[147].mxu0  ;;  %v4546_v55 = vsel %vm936_vm2, %v10241_v28, -inf }
 0xa11   : > { %4547 = vmax.xlane.f32.xlu1 %v4546_v55  ;;  %v4540_v47 = vsel %vm936_vm2, %v10243_v49, -inf }
 0xa13   : > { %4538 = vmax.xlane.f32.xlu0 %v4537_v51 }
 0xa15   : > { %v10251_v31 = vpop.f32.mrb[148].mxu0  ;;  %4541 = vmax.xlane.f32.xlu1 %v4540_v47 }
 0xa16   : > { %v10253_v11 = vpop.f32.mrb[149].mxu0  ;;  %v4555_v35 = vsel %vm936_vm2, %v10251_v31, -inf }
 0xa17   : > { %v10257_v3 = vpop.f32.mrb[150].mxu0  ;;  %4556 = vmax.xlane.f32.xlu0 %v4555_v35  ;;  %v4549_v51 = vsel %vm936_vm2, %v10253_v11, -inf  ;;  %v10271_v35 = vpop.permute.xlu1 %5045 }
 0xa18   : > { %v10259_v41 = vpop.f32.mrb[151].mxu0  ;;  %v4558_v55 = vsel %vm936_vm2, %v10257_v3, -inf  ;;  %11284 = vst [vmem:[#allocation82_spill] sm:$0xff] %v10271_v35 }
 0xa19   : > { %4559 = vmax.xlane.f32.xlu1 %v4558_v55  ;;  %v4552_v47 = vsel %vm936_vm2, %v10259_v41, -inf }
 0xa1b   : > { %4550 = vmax.xlane.f32.xlu0 %v4549_v51  ;;  %v10275_v59 = vpop.permute.xlu1 %5049 }
 0xa1c   : > { %11286 = vst [vmem:[#allocation85_spill] sm:$0xff] %v10275_v59 }
 0xa1d   : > { %4553 = vmax.xlane.f32.xlu1 %v4552_v47 }
 0xa2e   : > { %5134 = vrot.lane.b32.xlu1 %v8149_v56, %s7958_s16 }
 0xa31   : > { %5132 = vrot.lane.b32.xlu0 %v8151_v57, %s7958_s16 }
 0xa4d   : > { %v4473_v55 = vpop.xlane.xlu0 %4472 }
 0xa4e   : > { %v4563_v20 = vsub.f32 %v10127_v42, %v4473_v55  ;;  %v4467_v51 = vpop.xlane.xlu1 %4466 }
 0xa4f   : > { %v4561_v27 = vsub.f32 %v10129_v13, %v4467_v51 }
 0xa50   : > { %v4597_v46 = vmul.f32 1.442695, %v4563_v20 }
 0xa51   : > { %v4593_v47 = vmul.f32 1.442695, %v4561_v27  ;;  %v4470_v29 = vpop.xlane.xlu0 %4469 }
 0xa52   : > { %7812 = vpow2.f32 %v4597_v46  ;;  %v4562_v56 = vsub.f32 %v10137_v26, %v4470_v29  ;;  %v4476_v63 = vpop.xlane.xlu1 %4475 }
 0xa53   : > { %v4564_v57 = vsub.f32 %v10133_v25, %v4476_v63  ;;  %7814 = vpow2.f32 %v4593_v47 }
 0xa54   : > { %v4595_v35 = vmul.f32 1.442695, %v4562_v56 }
 0xa55   : > { %v4599_v50 = vmul.f32 1.442695, %v4564_v57  ;;  %v4485_v33 = vpop.xlane.xlu0 %4484 }
 0xa56   : > { %v4567_v59 = vsub.f32 %v10143_v24, %v4485_v33 }
 0xa57   : > { %7816 = vpow2.f32 %v4599_v50  ;;  %v4488_v42 = vpop.xlane.xlu1 %4487 }
 0xa58   : > { %v4605_v55 = vmul.f32 1.442695, %v4567_v59  ;;  %v4568_v13 = vsub.f32 %v10149_v60, %v4488_v42  ;;  %7818 = vpow2.f32 %v4595_v35 }
 0xa59   : > { %v4479_v27 = vpop.xlane.xlu0 %4478 }
 0xa5a   : > { %7820 = vpow2.f32 %v4605_v55  ;;  %v4607_v46 = vmul.f32 1.442695, %v4568_v13  ;;  %v4565_v29 = vsub.f32 %v10145_v18, %v4479_v27 }
 0xa5b   : > { %v4482_v20 = vpop.xlane.xlu1 %4481 }
 0xa5c   : > { %v10284_v26 = vpop.eup %7812  ;;  %v4601_v63 = vmul.f32 1.442695, %v4565_v29  ;;  %v4566_v25 = vsub.f32 %v10151_v21, %v4482_v20  ;;  %7822 = vpow2.f32 %v4607_v46 }
 0xa5d   : > { %v4663_v33 = vsel %vm936_vm2, %v10284_v26, 0.0  ;;  %v10289_v50 = vpop.eup %7814 }
 0xa5e   : > { %7824 = vpow2.f32 %v4601_v63  ;;  %v4603_v59 = vmul.f32 1.442695, %v4566_v25  ;;  %4664 = vadd.xlane.f32.xlu0 %v4663_v33  ;;  %v4657_v18 = vsel %vm936_vm2, %v10289_v50, 0.0 }
 0xa60   : > { %7826 = vpow2.f32 %v4603_v59 }
 0xa61   : > { %v10291_v24 = vpop.eup %7816 }
 0xa62   : > { %4658 = vadd.xlane.f32.xlu0 %v4657_v18  ;;  %v4666_v60 = vsel %vm936_vm2, %v10291_v24, 0.0  ;;  %v10297_v21 = vpop.eup %7818 }
 0xa63   : > { %4667 = vadd.xlane.f32.xlu1 %v4666_v60  ;;  %v4660_v47 = vsel %vm936_vm2, %v10297_v21, 0.0 }
 0xa64   : > { %v10299_v35 = vpop.eup %7820 }
 0xa65   : > { %v4675_v51 = vsel %vm936_vm2, %v10299_v35, 0.0 }
 0xa66   : > { %4676 = vadd.xlane.f32.xlu0 %v4675_v51  ;;  %v10305_v56 = vpop.eup %7822 }
 0xa67   : > { %4661 = vadd.xlane.f32.xlu1 %v4660_v47  ;;  %v4678_v55 = vsel %vm936_vm2, %v10305_v56, 0.0 }
 0xa68   : > { %v10307_v57 = vpop.eup %7824 }
 0xa69   : > { %v4669_v42 = vsel %vm936_vm2, %v10307_v57, 0.0 }
 0xa6a   : > { %4670 = vadd.xlane.f32.xlu0 %v4669_v42  ;;  %v10313_v13 = vpop.eup %7826 }
 0xa6b   : > { %4679 = vadd.xlane.f32.xlu1 %v4678_v55  ;;  %v4672_v27 = vsel %vm936_vm2, %v10313_v13, 0.0 }
 0xa6f   : > { %4673 = vadd.xlane.f32.xlu1 %v4672_v27 }
 0xa7c   : > { %v4497_v46 = vpop.xlane.xlu0 %4496 }
 0xa7d   : > { %v4571_v29 = vsub.f32 %v10171_v30, %v4497_v46 }
 0xa7e   : > { %v4500_v20 = vpop.xlane.xlu1 %4499 }
 0xa7f   : > { %v4613_v63 = vmul.f32 1.442695, %v4571_v29  ;;  %v4572_v25 = vsub.f32 %v10177_v48, %v4500_v20 }
 0xa80   : > { %v4491_v33 = vpop.xlane.xlu0 %4490 }
 0xa81   : > { %7828 = vpow2.f32 %v4613_v63  ;;  %v4569_v59 = vsub.f32 %v10173_v39, %v4491_v33  ;;  %v4615_v60 = vmul.f32 1.442695, %v4572_v25 }
 0xa82   : > { %v4494_v18 = vpop.xlane.xlu1 %4493 }
 0xa83   : > { %v4609_v51 = vmul.f32 1.442695, %v4569_v59  ;;  %v4570_v47 = vsub.f32 %v10179_v43, %v4494_v18 }
 0xa84   : > { %v4509_v42 = vpop.xlane.xlu0 %4508 }
 0xa85   : > { %7830 = vpow2.f32 %v4609_v51  ;;  %v4575_v55 = vsub.f32 %v10195_v2, %v4509_v42  ;;  %v4611_v30 = vmul.f32 1.442695, %v4570_v47 }
 0xa86   : > { %v4512_v27 = vpop.xlane.xlu1 %4511  ;;  %7832 = vpow2.f32 %v4615_v60 }
 0xa87   : > { %v4621_v46 = vmul.f32 1.442695, %v4575_v55  ;;  %v4576_v29 = vsub.f32 %v10201_v9, %v4512_v27 }
 0xa88   : > { %v4503_v48 = vpop.xlane.xlu0 %4502 }
 0xa89   : > { %7834 = vpow2.f32 %v4621_v46  ;;  %v4573_v20 = vsub.f32 %v10197_v12, %v4503_v48  ;;  %v4623_v39 = vmul.f32 1.442695, %v4576_v29 }
 0xa8a   : > { %v4506_v63 = vpop.xlane.xlu1 %4505  ;;  %7836 = vpow2.f32 %v4611_v30 }
 0xa8b   : > { %v10324_v25 = vpop.eup %7828  ;;  %v4617_v43 = vmul.f32 1.442695, %v4573_v20  ;;  %v4574_v33 = vsub.f32 %v10203_v61, %v4506_v63 }
 0xa8c   : > { %v4521_v59 = vpop.xlane.xlu0 %4520  ;;  %v4687_v2 = vsel %vm936_vm2, %v10324_v25, 0.0 }
 0xa8d   : > { %7838 = vpow2.f32 %v4617_v43  ;;  %v4619_v18 = vmul.f32 1.442695, %v4574_v33  ;;  %v4579_v9 = vsub.f32 %v10183_v32, %v4521_v59  ;;  %4688 = vadd.xlane.f32.xlu1 %v4687_v2 }
 0xa8e   : > { %7840 = vpow2.f32 %v4623_v39  ;;  %v4524_v60 = vpop.xlane.xlu1 %4523 }
 0xa8f   : > { %v10330_v12 = vpop.eup %7830  ;;  %7842 = vpow2.f32 %v4619_v18  ;;  %v4629_v51 = vmul.f32 1.442695, %v4579_v9  ;;  %v4580_v32 = vsub.f32 %v10189_v54, %v4524_v60 }
 0xa90   : > { %v4515_v47 = vpop.xlane.xlu0 %4514  ;;  %v4681_v42 = vsel %vm936_vm2, %v10330_v12, 0.0  ;;  %v10334_v61 = vpop.eup %7832 }
 0xa91   : > { %v4577_v55 = vsub.f32 %v10185_v15, %v4515_v47  ;;  %4682 = vadd.xlane.f32.xlu1 %v4681_v42  ;;  %7844 = vpow2.f32 %v4629_v51  ;;  %v4690_v20 = vsel %vm936_vm2, %v10334_v61, 0.0  ;;  %v4631_v59 = vmul.f32 1.442695, %v4580_v32 }
 0xa92   : > { %v4518_v27 = vpop.xlane.xlu1 %4517 }
 0xa93   : > { %v10337_v30 = vpop.eup %7834  ;;  %v4625_v46 = vmul.f32 1.442695, %v4577_v55  ;;  %v4578_v29 = vsub.f32 %v10191_v1, %v4518_v27 }
 0xa94   : > { %v4533_v48 = vpop.xlane.xlu0 %4532  ;;  %v4699_v39 = vsel %vm936_vm2, %v10337_v30, 0.0  ;;  %v10345_v63 = vpop.eup %7836 }
 0xa95   : > { %v4627_v15 = vmul.f32 1.442695, %v4578_v29  ;;  %v4583_v43 = vsub.f32 %v10207_v14, %v4533_v48  ;;  %4691 = vadd.xlane.f32.xlu1 %v4690_v20  ;;  %4700 = vadd.xlane.f32.xlu0 %v4699_v39  ;;  %7846 = vpow2.f32 %v4625_v46  ;;  %v4684_v60 = vsel %vm936_vm2, %v10345_v63, 0.0 }
 0xa96   : > { %v4536_v33 = vpop.xlane.xlu1 %4535 }
 0xa97   : > { %v10348_v54 = vpop.eup %7838  ;;  %7848 = vpow2.f32 %v4627_v15  ;;  %v4637_v1 = vmul.f32 1.442695, %v4583_v43  ;;  %v4584_v2 = vsub.f32 %v10213_v37, %v4536_v33 }
 0xa98   : > { %v10351_v18 = vpop.eup %7840  ;;  %v4527_v9 = vpop.xlane.xlu0 %4526  ;;  %v4693_v14 = vsel %vm936_vm2, %v10348_v54, 0.0 }
 0xa99   : > { %v10357_v51 = vpop.eup %7842  ;;  %7850 = vpow2.f32 %v4637_v1  ;;  %v4581_v47 = vsub.f32 %v10209_v44, %v4527_v9  ;;  %4685 = vadd.xlane.f32.xlu1 %v4684_v60  ;;  %4694 = vadd.xlane.f32.xlu0 %v4693_v14  ;;  %v4639_v55 = vmul.f32 1.442695, %v4584_v2  ;;  %v4702_v29 = vsel %vm936_vm2, %v10351_v18, 0.0 }
 0xa9a   : > { %v4530_v42 = vpop.xlane.xlu1 %4529  ;;  %7852 = vpow2.f32 %v4631_v59  ;;  %v4696_v46 = vsel %vm936_vm2, %v10357_v51, 0.0 }
 0xa9b   : > { %v4633_v37 = vmul.f32 1.442695, %v4581_v47  ;;  %v4582_v27 = vsub.f32 %v10215_v38, %v4530_v42  ;;  %v10365_v48 = vpop.eup %7844 }
 0xa9c   : > { %v4545_v32 = vpop.xlane.xlu0 %4544  ;;  %v4711_v59 = vsel %vm936_vm2, %v10365_v48, 0.0 }
 0xa9d   : > { %7854 = vpow2.f32 %v4633_v37  ;;  %v4587_v44 = vsub.f32 %v10235_v17, %v4545_v32  ;;  %4697 = vadd.xlane.f32.xlu1 %v4696_v46  ;;  %4703 = vadd.xlane.f32.xlu0 %v4702_v29  ;;  %v4635_v39 = vmul.f32 1.442695, %v4582_v27 }
 0xa9e   : > { %v4548_v20 = vpop.xlane.xlu1 %4547  ;;  %7856 = vpow2.f32 %v4639_v55 }
 0xa9f   : > { %v4645_v15 = vmul.f32 1.442695, %v4587_v44  ;;  %v4588_v38 = vsub.f32 %v10241_v28, %v4548_v20  ;;  %v10369_v43 = vpop.eup %7846 }
 0xaa0   : > { %v4539_v33 = vpop.xlane.xlu0 %4538  ;;  %v4705_v55 = vsel %vm936_vm2, %v10369_v43, 0.0 }
 0xaa1   : > { %v10373_v1 = vpop.eup %7848  ;;  %7858 = vpow2.f32 %v4645_v15  ;;  %v4585_v2 = vsub.f32 %v10237_v23, %v4539_v33  ;;  %4712 = vadd.xlane.f32.xlu0 %v4711_v59  ;;  %v4647_v28 = vmul.f32 1.442695, %v4588_v38 }
 0xaa2   : > { %v4542_v17 = vpop.xlane.xlu1 %4541  ;;  %v4708_v9 = vsel %vm936_vm2, %v10373_v1, 0.0  ;;  %7860 = vpow2.f32 %v4635_v39 }
 0xaa3   : > { %v10378_v60 = vpop.eup %7850  ;;  %v4641_v14 = vmul.f32 1.442695, %v4585_v2  ;;  %v4586_v47 = vsub.f32 %v10243_v49, %v4542_v17  ;;  %4709 = vadd.xlane.f32.xlu1 %v4708_v9 }
 0xaa4   : > { %v4557_v42 = vpop.xlane.xlu0 %4556  ;;  %v10383_v37 = vpop.eup %7852  ;;  %v4723_v32 = vsel %vm936_vm2, %v10378_v60, 0.0 }
 0xaa5   : > { %7862 = vpow2.f32 %v4641_v14  ;;  %v4591_v23 = vsub.f32 %v10251_v31, %v4557_v42  ;;  %4706 = vadd.xlane.f32.xlu0 %v4705_v55  ;;  %v4643_v29 = vmul.f32 1.442695, %v4586_v47  ;;  %v4714_v39 = vsel %vm936_vm2, %v10383_v37, 0.0 }
 0xaa6   : > { %v4560_v27 = vpop.xlane.xlu1 %4559  ;;  %7864 = vpow2.f32 %v4647_v28 }
 0xaa7   : > { %v10388_v46 = vpop.eup %7854  ;;  %v4653_v49 = vmul.f32 1.442695, %v4591_v23  ;;  %v4592_v44 = vsub.f32 %v10257_v3, %v4560_v27  ;;  %4724 = vadd.xlane.f32.xlu1 %v4723_v32 }
 0xaa8   : > { %v4551_v20 = vpop.xlane.xlu0 %4550  ;;  %v10393_v15 = vpop.eup %7856  ;;  %v4717_v33 = vsel %vm936_vm2, %v10388_v46, 0.0 }
 0xaa9   : > { %7866 = vpow2.f32 %v4653_v49  ;;  %v4589_v31 = vsub.f32 %v10253_v11, %v4551_v20  ;;  %4715 = vadd.xlane.f32.xlu0 %v4714_v39  ;;  %v4655_v2 = vmul.f32 1.442695, %v4592_v44  ;;  %v4726_v28 = vsel %vm936_vm2, %v10393_v15, 0.0 }
 0xaaa   : > { %v4554_v38 = vpop.xlane.xlu1 %4553  ;;  %7868 = vpow2.f32 %v4643_v29 }
 0xaab   : > { %v10398_v59 = vpop.eup %7858  ;;  %v4649_v3 = vmul.f32 1.442695, %v4589_v31  ;;  %v4590_v17 = vsub.f32 %v10259_v41, %v4554_v38  ;;  %4718 = vadd.xlane.f32.xlu1 %v4717_v33 }
 0xaac   : > { %v10401_v9 = vpop.permute.xlu0 %5132  ;;  %v10405_v14 = vpop.eup %7860  ;;  %v4735_v11 = vsel %vm936_vm2, %v10398_v59, 0.0 }
 0xaad   : > { %7870 = vpow2.f32 %v4649_v3  ;;  %4727 = vadd.xlane.f32.xlu0 %v4726_v28  ;;  %7046 = vmatprep.subr.bf16.mxu0 %v10401_v9  ;;  %v4651_v42 = vmul.f32 1.442695, %v4590_v17  ;;  %v4720_v41 = vsel %vm936_vm2, %v10405_v14, 0.0  ;;  %v11287_v3 = vld [vmem:[#allocation41_spill] sm:$0xff]  ;;  %v11288_v17 = vld [vmem:[#allocation7_spill] sm:$0xff] }
 0xaae   : > { %7872 = vpow2.f32 %v4655_v2  ;;  %v11289_v28 = vpack.i.bf16 %v11287_v3, %v11288_v17 }
 0xaaf   : > { %v10410_v47 = vpop.eup %7862  ;;  %4736 = vadd.xlane.f32.xlu1 %v4735_v11  ;;  %7874 = vpow2.f32 %v4651_v42  ;;  %v11290_v11 = vpack.i.bf16 %v10051_v5, %v10045_v8  ;;  %v11291_v42 = vld [vmem:[#allocation48_spill] sm:$0xff]  ;;  %v11298_v8 = vpack.i.bf16 %v10047_v53, %v10043_v10  ;;  %v11300_v5 = vld [vmem:[#allocation45_spill] sm:$0xff]  ;;  %v11306_v10 = vpack.i.bf16 %v10059_v22, %v10055_v45 }
 0xab0   : > { %v10414_v55 = vpop.eup %7864  ;;  %v4729_v23 = vsel %vm936_vm2, %v10410_v47, 0.0  ;;  %v11307_v53 = vld [vmem:[#allocation53_spill] sm:$0xff]  ;;  %v11314_v22 = vpack.i.bf16 %v10071_v6, %v10067_v34  ;;  %v11321_v34 = vpack.i.bf16 %v10083_v36, %v10079_v58 }
 0xab1   : > { %4721 = vadd.xlane.f32.xlu0 %v4720_v41  ;;  %v4738_v32 = vsel %vm936_vm2, %v10414_v55, 0.0  ;;  %v11292_v41 = vld [vmem:[#allocation46_spill] sm:$0xff] }
 0xab3   : > { %v10418_v27 = vpop.eup %7866  ;;  %4730 = vadd.xlane.f32.xlu1 %v4729_v23  ;;  %v11293_v23 = vpack.i.bf16 %v11291_v42, %v11292_v41  ;;  %v11311_v42 = vld [vmem:[#allocation43_spill] sm:$0xff] }
 0xab4   : > { %v10422_v29 = vpop.eup %7868  ;;  %v4747_v49 = vsel %vm936_vm2, %v10418_v27, 0.0 }
 0xab5   : > { %4739 = vadd.xlane.f32.xlu0 %v4738_v32  ;;  %v4732_v20 = vsel %vm936_vm2, %v10422_v29, 0.0  ;;  %v11295_v32 = vld [vmem:[#allocation6_spill] sm:$0xff] }
 0xab7   : > { %v10426_v44 = vpop.eup %7870  ;;  %4748 = vadd.xlane.f32.xlu1 %v4747_v49 }
 0xab8   : > { %v10430_v39 = vpop.eup %7872  ;;  %v4741_v31 = vsel %vm936_vm2, %v10426_v44, 0.0 }
 0xab9   : > { %4733 = vadd.xlane.f32.xlu0 %v4732_v20  ;;  %v4750_v38 = vsel %vm936_vm2, %v10430_v39, 0.0  ;;  %v10436_v33 = vpop.eup %7874  ;;  %v11297_v20 = vpack.i.bf16 %v10063_v62, %v10057_v4  ;;  %v11305_v4 = vpack.i.bf16 %v10075_v40, %v10069_v19  ;;  %v11308_v62 = vld [vmem:[#allocation51_spill] sm:$0xff]  ;;  %v11313_v19 = vpack.i.bf16 %v10087_v52, %v10081_v16 }
 0xaba   : > { %v4744_v2 = vsel %vm936_vm2, %v10436_v33, 0.0  ;;  %v11309_v17 = vpack.i.bf16 %v11307_v53, %v11308_v62 }
 0xabb   : > { %4742 = vadd.xlane.f32.xlu1 %v4741_v31 }
 0xabd   : > { %4751 = vadd.xlane.f32.xlu0 %v4750_v38  ;;  %v11302_v38 = vld [vmem:[#allocation44_spill] sm:$0xff] }
 0xac1   : > { %4745 = vadd.xlane.f32.xlu0 %v4744_v2  ;;  %v11303_v2 = vld [vmem:[#allocation42_spill] sm:$0xff] }
 0xac2   : > { %v11304_v3 = vpack.i.bf16 %v11302_v38, %v11303_v2  ;;  %v11323_v38 = vld [vmem:[#allocation54_spill] sm:$0xff] }
 0xacc   : > { %5136 = vrot.lane.b32.xlu1 %v8163_v7, %s7958_s16  ;;  %v11294_v7 = vld [vmem:[#allocation40_spill] sm:$0xff] }
 0xacd   : > { %v11296_v49 = vpack.i.bf16 %v11294_v7, %v11295_v32  ;;  %v11315_v7 = vld [vmem:[#allocation57_spill] sm:$0xff]  ;;  %v11316_v32 = vld [vmem:[#allocation55_spill] sm:$0xff] }
 0xad0   : > { %7185 = vrot.lane.b32.xlu1 %v11289_v28, %s7959_s17 }
 0xad4   : > { %7195 = vrot.lane.b32.xlu1 %v11290_v11, %s7960_s19  ;;  %v11310_v11 = vld [vmem:[#allocation47_spill] sm:$0xff] }
 0xad5   : > { %v11312_v41 = vpack.i.bf16 %v11310_v11, %v11311_v42 }
 0xad7   : > { %5138 = vrot.lane.b32.xlu0 %v11188_v0, %s7958_s16  ;;  %v11299_v0 = vld [vmem:[#allocation50_spill] sm:$0xff] }
 0xad8   : > { %7205 = vrot.lane.b32.xlu1 %v11293_v23, %s7959_s17  ;;  %v11301_v31 = vpack.i.bf16 %v11299_v0, %v11300_v5  ;;  %v10492_v23 = vpop.permute.xlu1 %5134  ;;  %v11319_v0 = vld [vmem:[#allocation49_spill] sm:$0xff] }
 0xadb   : > { %7190 = vrot.lane.b32.xlu0 %v11296_v49, %s7959_s17  ;;  %v11317_v49 = vpack.i.bf16 %v11315_v7, %v11316_v32  ;;  %v11326_v7 = vld [vmem:[#allocation82_spill] sm:$0xff] }
 0xadc   : > { %7215 = vrot.lane.b32.xlu1 %v11297_v20, %s7960_s19 }
 0xadf   : > { %7200 = vrot.lane.b32.xlu0 %v11298_v8, %s7960_s19  ;;  %v11318_v8 = vld [vmem:[#allocation52_spill] sm:$0xff] }
 0xae0   : > { %7225 = vrot.lane.b32.xlu1 %v11301_v31, %s7959_s17  ;;  %v11320_v16 = vpack.i.bf16 %v11318_v8, %v11319_v0  ;;  %v11322_v31 = vld [vmem:[#allocation56_spill] sm:$0xff]  ;;  %v11328_v8 = vld [vmem:[#allocation85_spill] sm:$0xff] }
 0xae1   : > { %v11324_v2 = vpack.i.bf16 %v11322_v31, %v11323_v38 }
 0xae3   : > { %7210 = vrot.lane.b32.xlu0 %v11304_v3, %s7959_s17 }
 0xae4   : > { %7235 = vrot.lane.b32.xlu1 %v11305_v4, %s7960_s19 }
 0xae7   : > { %7220 = vrot.lane.b32.xlu0 %v11306_v10, %s7960_s19 }
 0xae8   : > { %7245 = vrot.lane.b32.xlu1 %v11309_v17, %s7959_s17 }
 0xaeb   : > { %v4665_v28 = vpop.xlane.xlu0 %4664  ;;  %7230 = vrot.lane.b32.xlu0 %v11312_v41, %s7959_s17 }
 0xaec   : > { %7255 = vrot.lane.b32.xlu1 %v11313_v19, %s7960_s19 }
 0xaef   : > { %v4659_v45 = vpop.xlane.xlu0 %4658  ;;  %7240 = vrot.lane.b32.xlu0 %v11314_v22, %s7960_s19  ;;  %v11325_v22 = vld [vmem:[#allocation2_spill] sm:$0xff] }
 0xaf0   : > { %v4668_v40 = vpop.xlane.xlu1 %4667  ;;  %7265 = vrot.lane.b32.xlu1 %v11317_v49, %s7959_s17  ;;  %v11327_v49 = vld [vmem:[#allocation84_spill] sm:$0xff] }
 0xaf1   : > { %7876 = vrcp.f32 %v4668_v40 }
 0xaf2   : > { %7878 = vrcp.f32 %v4659_v45 }
 0xaf3   : > { %v4677_v20 = vpop.xlane.xlu0 %4676  ;;  %7250 = vrot.lane.b32.xlu0 %v11320_v16, %s7959_s17  ;;  %7880 = vrcp.f32 %v4665_v28 }
 0xaf4   : > { %v4662_v52 = vpop.xlane.xlu1 %4661 }
 0xaf5   : > { %7882 = vrcp.f32 %v4662_v52 }
 0xaf7   : > { %7260 = vrot.lane.b32.xlu0 %v11321_v34, %s7960_s19  ;;  %v4671_v6 = vpop.xlane.xlu0 %4670 }
 0xaf8   : > { %v4680_v5 = vpop.xlane.xlu1 %4679 }
 0xaf9   : > { %7884 = vrcp.f32 %v4680_v5 }
 0xafa   : > { %7886 = vrcp.f32 %v4671_v6 }
 0xafb   : > { %7270 = vrot.lane.b32.xlu0 %v11324_v2, %s7959_s17  ;;  %v7877_v3 = vpop.eup %7876  ;;  %7888 = vrcp.f32 %v4677_v20 }
 0xafc   : > { %v4674_v4 = vpop.xlane.xlu1 %4673  ;;  %v7879_v10 = vpop.eup %7878  ;;  %v4820_v17 = vmul.f32 %v7877_v3, %v10291_v24 }
 0xafd   : > { %7890 = vrcp.f32 %v4674_v4  ;;  %v7881_v53 = vpop.eup %7880  ;;  %v4817_v58 = vmul.f32 %v7879_v10, %v10289_v50 }
 0xafe   : > { %v4819_v28 = vmul.f32 %v7881_v53, %v10284_v26 }
 0xaff   : > { %v7883_v62 = vpop.eup %7882 }
 0xb00   : > { %v4818_v36 = vmul.f32 %v7883_v62, %v10297_v21  ;;  %v4850_v42 = vpack.c.bf16 %v4820_v17, %v4819_v28 }
 0xb02   : > { %v4849_v11 = vpack.c.bf16 %v4818_v36, %v4817_v58 }
 0xb03   : > { %v7885_v41 = vpop.eup %7884 }
 0xb04   : > { %7006 = vmatprep.mubr.msk.bf16.mxu1 %vm936_vm2, %v4849_v11  ;;  %v7887_v19 = vpop.eup %7886  ;;  %v4824_v50 = vmul.f32 %v7885_v41, %v10305_v56 }
 0xb05   : > { %7007 = vmatmul.mubr.msk.bf16.vlgmr.msra.gmra.mrb[104].mxu1 %vm936_vm2, %v4850_v42  ;;  %v7889_v45 = vpop.eup %7888  ;;  %v4821_v24 = vmul.f32 %v7887_v19, %v10307_v57 }
 0xb06   : > { %7031 = vmatpush3.bf16.msra.mxu1 %v11325_v22  ;;  %v4823_v21 = vmul.f32 %v7889_v45, %v10299_v35 }
 0xb07   : > { %v7891_v40 = vpop.eup %7890  ;;  %7032 = vmatprep.subr.bf16.mxu1 %v11326_v7 }
 0xb08   : > { %v4822_v26 = vmul.f32 %v7891_v40, %v10313_v13  ;;  %v4852_v20 = vpack.c.bf16 %v4824_v50, %v4823_v21 }
 0xb0a   : > { %7033 = vmatpush3.bf16.msra.mxu1 %v11326_v7  ;;  %v4851_v32 = vpack.c.bf16 %v4822_v26, %v4821_v24 }
 0xb0b   : > { %7034 = vmatprep.subr.bf16.mxu1 %v11327_v49 }
 0xb0c   : > { %7010 = vmatprep.mubr.msk.bf16.mxu1 %vm936_vm2, %v4851_v32 }
 0xb0d   : > { %7011 = vmatmul.mubr.msk.bf16.gmra.mrb[108].mxu1 %vm936_vm2, %v4852_v20 }
 0xb0e   : > { %7035 = vmatpush3.bf16.msra.mxu1 %v11327_v49 }
 0xb0f   : > { %7036 = vmatprep.subr.bf16.mxu1 %v11328_v8 }
 0xb12   : > { %7037 = vmatpush3.bf16.msra.mxu1 %v11328_v8 }
 0xb1a   : > { %v4689_v56 = vpop.xlane.xlu1 %4688 }
 0xb1e   : > { %v4683_v57 = vpop.xlane.xlu1 %4682 }
 0xb22   : > { %v4692_v13 = vpop.xlane.xlu1 %4691  ;;  %v4701_v35 = vpop.xlane.xlu0 %4700 }
 0xb23   : > { %7892 = vrcp.f32 %v4692_v13 }
 0xb24   : > { %7894 = vrcp.f32 %v4683_v57 }
 0xb25   : > { %7896 = vrcp.f32 %v4689_v56 }
 0xb26   : > { %v4686_v0 = vpop.xlane.xlu1 %4685  ;;  %v4695_v16 = vpop.xlane.xlu0 %4694 }
 0xb27   : > { %7898 = vrcp.f32 %v4686_v0 }
 0xb28   : > { %7900 = vrcp.f32 %v4695_v16 }
 0xb2a   : > { %v4698_v52 = vpop.xlane.xlu1 %4697  ;;  %v4704_v34 = vpop.xlane.xlu0 %4703 }
 0xb2b   : > { %7902 = vrcp.f32 %v4698_v52 }
 0xb2c   : > { %7904 = vrcp.f32 %v4704_v34 }
 0xb2d   : > { %v7893_v6 = vpop.eup %7892  ;;  %7906 = vrcp.f32 %v4701_v35 }
 0xb2e   : > { %v4713_v5 = vpop.xlane.xlu0 %4712  ;;  %v7895_v31 = vpop.eup %7894  ;;  %v4828_v4 = vmul.f32 %v7893_v6, %v10334_v61 }
 0xb2f   : > { %v7897_v38 = vpop.eup %7896  ;;  %v4825_v53 = vmul.f32 %v7895_v31, %v10330_v12 }
 0xb30   : > { %v4710_v2 = vpop.xlane.xlu1 %4709  ;;  %v4827_v58 = vmul.f32 %v7897_v38, %v10324_v25 }
 0xb31   : > { %v7899_v3 = vpop.eup %7898  ;;  %7908 = vrcp.f32 %v4710_v2 }
 0xb32   : > { %v4707_v10 = vpop.xlane.xlu0 %4706  ;;  %v4826_v62 = vmul.f32 %v7899_v3, %v10345_v63  ;;  %v7901_v17 = vpop.eup %7900  ;;  %v4854_v42 = vpack.c.bf16 %v4828_v4, %v4827_v58 }
 0xb33   : > { %7910 = vrcp.f32 %v4707_v10  ;;  %v4829_v61 = vmul.f32 %v7901_v17, %v10348_v54 }
 0xb34   : > { %v4725_v36 = vpop.xlane.xlu1 %4724  ;;  %v4853_v28 = vpack.c.bf16 %v4826_v62, %v4825_v53  ;;  %7912 = vrcp.f32 %v4713_v5 }
 0xb35   : > { %v7903_v11 = vpop.eup %7902 }
 0xb36   : > { %v7905_v41 = vpop.eup %7904  ;;  %7022 = vmatprep.mubr.msk.bf16.mxu0 %vm936_vm2, %v4853_v28  ;;  %v4716_v19 = vpop.xlane.xlu0 %4715  ;;  %v4830_v45 = vmul.f32 %v7903_v11, %v10357_v51 }
 0xb37   : > { %7914 = vrcp.f32 %v4716_v19  ;;  %7023 = vmatmul.mubr.msk.bf16.vlgmr.msra.gmra.mrb[152].mxu0 %vm936_vm2, %v4854_v42  ;;  %v7907_v12 = vpop.eup %7906  ;;  %v4832_v22 = vmul.f32 %v7905_v41, %v10351_v18 }
 0xb38   : > { %7047 = vmatpush3.bf16.msra.mxu0 %v10401_v9  ;;  %v4719_v25 = vpop.xlane.xlu1 %4718  ;;  %v4855_v63 = vpack.c.bf16 %v4830_v45, %v4829_v61  ;;  %v4831_v54 = vmul.f32 %v7907_v12, %v10337_v30 }
 0xb39   : > { %7048 = vmatprep.subr.bf16.mxu0 %v10492_v23 }
 0xb3a   : > { %7026 = vmatprep.mubr.msk.bf16.mxu0 %vm936_vm2, %v4855_v63  ;;  %v4728_v40 = vpop.xlane.xlu0 %4727  ;;  %v4856_v24 = vpack.c.bf16 %v4832_v22, %v4831_v54 }
 0xb3b   : > { %v7909_v7 = vpop.eup %7908  ;;  %7916 = vrcp.f32 %v4728_v40 }
 0xb3c   : > { %7049 = vmatpush3.bf16.msra.mxu0 %v10492_v23  ;;  %v4737_v51 = vpop.xlane.xlu1 %4736  ;;  %7918 = vrcp.f32 %v4719_v25  ;;  %v4834_v21 = vmul.f32 %v7909_v7, %v10373_v1 }
 0xb3d   : > { %v7911_v50 = vpop.eup %7910  ;;  %7920 = vrcp.f32 %v4725_v36 }
 0xb3e   : > { %v4722_v9 = vpop.xlane.xlu0 %4721  ;;  %v4833_v26 = vmul.f32 %v7911_v50, %v10369_v43  ;;  %v7913_v18 = vpop.eup %7912  ;;  %v11330_v50 = vld [vmem:[#allocation14_spill] sm:$0xff] }
 0xb3f   : > { %7922 = vrcp.f32 %v4722_v9  ;;  %7027 = vmatmul.mubr.msk.bf16.gmra.mrb[156].mxu0 %vm936_vm2, %v4856_v24  ;;  %v4835_v20 = vmul.f32 %v7913_v18, %v10365_v48 }
 0xb40   : > { %v4731_v32 = vpop.xlane.xlu1 %4730  ;;  %v4857_v49 = vpack.c.bf16 %v4834_v21, %v4833_v26 }
 0xb41   : > { %v7915_v30 = vpop.eup %7914 }
 0xb42   : > { %v4836_v23 = vmul.f32 %v7915_v30, %v10383_v37  ;;  %7038 = vmatprep.mubr.msk.bf16.mxu1 %vm936_vm2, %v4857_v49  ;;  %v4740_v8 = vpop.xlane.xlu0 %4739 }
 0xb43   : > { %7924 = vrcp.f32 %v4740_v8 }
 0xb44   : > { %v4858_v56 = vpack.c.bf16 %v4836_v23, %v4835_v20  ;;  %v4749_v57 = vpop.xlane.xlu1 %4748  ;;  %7926 = vrcp.f32 %v4731_v32  ;;  %v11331_v23 = vld [vmem:[#allocation15_spill] sm:$0xff] }
 0xb45   : > { %v7917_v43 = vpop.eup %7916  ;;  %7928 = vrcp.f32 %v4737_v51 }
 0xb46   : > { %7039 = vmatmul.mubr.msk.bf16.vlgmr.msra.gmra.mrb[112].mxu1 %vm936_vm2, %v4858_v56  ;;  %v4734_v1 = vpop.xlane.xlu0 %4733  ;;  %v7919_v13 = vpop.eup %7918  ;;  %v4840_v48 = vmul.f32 %v7917_v43, %v10393_v15  ;;  %v11332_v56 = vld [vmem:[#allocation19_spill] sm:$0xff] }
 0xb47   : > { %7930 = vrcp.f32 %v4734_v1  ;;  %v7921_v35 = vpop.eup %7920  ;;  %v4837_v52 = vmul.f32 %v7919_v13, %v10388_v46 }
 0xb48   : > { %v4743_v0 = vpop.xlane.xlu1 %4742  ;;  %v4839_v6 = vmul.f32 %v7921_v35, %v10378_v60  ;;  %v11333_v35 = vld [vmem:[#allocation23_spill] sm:$0xff] }
 0xb49   : > { %v7923_v16 = vpop.eup %7922 }
 0xb4a   : > { %v4752_v37 = vpop.xlane.xlu0 %4751  ;;  %v4838_v34 = vmul.f32 %v7923_v16, %v10405_v14  ;;  %v4860_v38 = vpack.c.bf16 %v4840_v48, %v4839_v6  ;;  %v11334_v16 = vld [vmem:[#allocation21_spill] sm:$0xff] }
 0xb4b   : > { %7932 = vrcp.f32 %v4752_v37 }
 0xb4c   : > { %v5137_v5 = vpop.permute.xlu1 %5136  ;;  %v4859_v31 = vpack.c.bf16 %v4838_v34, %v4837_v52  ;;  %7934 = vrcp.f32 %v4743_v0 }
 0xb4d   : > { %7050 = vmatprep.subr.bf16.mxu0 %v5137_v5  ;;  %v7925_v2 = vpop.eup %7924  ;;  %7936 = vrcp.f32 %v4749_v57 }
 0xb4e   : > { %7042 = vmatprep.mubr.msk.bf16.mxu1 %vm936_vm2, %v4859_v31  ;;  %7051 = vmatpush3.bf16.msra.mxu0 %v5137_v5  ;;  %v4746_v3 = vpop.xlane.xlu0 %4745  ;;  %v7927_v15 = vpop.eup %7926  ;;  %v4844_v4 = vmul.f32 %v7925_v2, %v10414_v55 }
 0xb4f   : > { %7938 = vrcp.f32 %v4746_v3  ;;  %7043 = vmatmul.mubr.msk.bf16.gmra.mrb[116].mxu1 %vm936_vm2, %v4860_v38  ;;  %v7929_v46 = vpop.eup %7928  ;;  %v4841_v53 = vmul.f32 %v7927_v15, %v10410_v47 }
 0xb50   : > { %v10564_v14 = vpop.permute.xlu1 %7185  ;;  %v4843_v17 = vmul.f32 %v7929_v46, %v10398_v59 }
 0xb51   : > { %v7931_v60 = vpop.eup %7930 }
 0xb52   : > { %v5139_v10 = vpop.permute.xlu0 %5138  ;;  %v4842_v62 = vmul.f32 %v7931_v60, %v10422_v29  ;;  %v4862_v28 = vpack.c.bf16 %v4844_v4, %v4843_v17  ;;  %v11335_v4 = vld [vmem:[#allocation22_spill] sm:$0xff] }
 0xb53   : > { %7052 = vmatprep.subr.bf16.mxu0 %v5139_v10 }
 0xb54   : > { %v10570_v58 = vpop.permute.xlu1 %7195  ;;  %7053 = vmatpush3.bf16.msra.mxu0 %v5139_v10  ;;  %v4861_v36 = vpack.c.bf16 %v4842_v62, %v4841_v53  ;;  %v11336_v53 = vld [vmem:[#allocation18_spill] sm:$0xff] }
 0xb55   : > { %v7933_v11 = vpop.eup %7932 }
 0xb56   : > { %7054 = vmatprep.mubr.msk.bf16.mxu0 %vm936_vm2, %v4861_v36  ;;  %v10573_v42 = vpop.permute.xlu0 %7190  ;;  %v7935_v41 = vpop.eup %7934  ;;  %v4848_v59 = vmul.f32 %v7933_v11, %v10430_v39 }
 0xb57   : > { %7055 = vmatmul.mubr.msk.bf16.vlgmr.msra.gmra.mrb[160].mxu0 %vm936_vm2, %v4862_v28  ;;  %v7937_v55 = vpop.eup %7936  ;;  %v4845_v61 = vmul.f32 %v7935_v41, %v10426_v44  ;;  %v11329_v44 = vld [vmem:[#allocation16_spill] sm:$0xff] }
 0xb58   : > { %v10576_v47 = vpop.permute.xlu1 %7205  ;;  %v4847_v12 = vmul.f32 %v7937_v55, %v10418_v27  ;;  %v7426_v55 = vld [vmem:[%s11008_s3] sm:$0xff]  }
 0xb59   : > { %v7939_v29 = vpop.eup %7938  ;;  %7062 = vmatprep.subr.bf16.mxu1 %v7426_v55 }
 0xb5a   : > { %v10579_v19 = vpop.permute.xlu0 %7200  ;;  %v4846_v45 = vmul.f32 %v7939_v29, %v10436_v33  ;;  %v4864_v22 = vpack.c.bf16 %v4848_v59, %v4847_v12  ;;  %7063 = vmatpush3.bf16.msra.mxu1 %v7426_v55  ;;  %v7427_v29 = vld [vmem:[%s11008_s3 + $0x8] sm:$0xff]  }
 0xb5b   : > { %7064 = vmatprep.subr.bf16.mxu1 %v7427_v29 }
 0xb5c   : > { %v10584_v25 = vpop.permute.xlu1 %7215  ;;  %v4863_v63 = vpack.c.bf16 %v4846_v45, %v4845_v61 }
 0xb5e   : > { %7058 = vmatprep.mubr.msk.bf16.mxu0 %vm936_vm2, %v4863_v63  ;;  %v10587_v40 = vpop.permute.xlu0 %7210  ;;  %7065 = vmatpush3.bf16.msra.mxu1 %v7427_v29 }
 0xb5f   : > { %7059 = vmatmul.mubr.msk.bf16.gmra.mrb[164].mxu0 %vm936_vm2, %v4864_v22 }
 0xb60   : > { %v7226_v7 = vpop.permute.xlu1 %7225 }
 0xb61   : > { %v7228_v39 = vunpack.i.h.bf16 %v7226_v7  ;;  %v7227_v54 = vunpack.i.l.bf16 %v7226_v7 }
 0xb62   : > { %v10590_v51 = vpop.permute.xlu0 %7220 }
 0xb63   : > { %v5614_v33 = vsel %vm543_vm1, %v11329_v44, %v7228_v39  ;;  %v5613_v27 = vsel %vm543_vm1, %v11330_v50, %v7227_v54  ;;  %v11337_v39 = vld [vmem:[#allocation5_spill] sm:$0xff]  ;;  %v11338_v54 = vld [vmem:[#allocation3_spill] sm:$0xff]  ;;  %v11340_v50 = vld [vmem:[#allocation70_spill] sm:$0xff] }
 0xb64   : > { %v7236_v24 = vpop.permute.xlu1 %7235  ;;  %v11339_v44 = vpack.i.bf16 %v11337_v39, %v11338_v54  ;;  %v11361_v39 = vld [vmem:[#allocation75_spill] sm:$0xff]  ;;  %v11362_v54 = vld [vmem:[#allocation78_spill] sm:$0xff] }
 0xb65   : > { %v7238_v9 = vunpack.i.h.bf16 %v7236_v24  ;;  %v7237_v26 = vunpack.i.l.bf16 %v7236_v24 }
 0xb66   : > { %v7231_v21 = vpop.permute.xlu0 %7230 }
 0xb67   : > { %v10597_v18 = vsel %vm5637_vm3, %v5613_v27, %v7237_v26  ;;  %v10600_v32 = vsel %vm5637_vm3, %v5614_v33, %v7238_v9  ;;  %v7233_v49 = vunpack.i.h.bf16 %v7231_v21  ;;  %v7232_v30 = vunpack.i.l.bf16 %v7231_v21  ;;  %v11341_v27 = vld [vmem:[#allocation4_spill] sm:$0xff] }
 0xb68   : > { %v7246_v20 = vpop.permute.xlu1 %7245  ;;  %v11342_v24 = vpack.i.bf16 %v11340_v50, %v11341_v27  ;;  %v11364_v50 = vld [vmem:[#allocation77_spill] sm:$0xff]  ;;  %v11365_v27 = vld [vmem:[#allocation83_spill] sm:$0xff] }
 0xb69   : > { %v5616_v8 = vsel %vm543_vm1, %v11331_v23, %v7233_v49  ;;  %v5615_v57 = vsel %vm543_vm1, %v11332_v56, %v7232_v30  ;;  %v7248_v43 = vunpack.i.h.bf16 %v7246_v20  ;;  %v7247_v1 = vunpack.i.l.bf16 %v7246_v20  ;;  %v11343_v30 = vld [vmem:[#allocation60_spill] sm:$0xff]  ;;  %v11344_v20 = vld [vmem:[#allocation58_spill] sm:$0xff]  ;;  %v11347_v56 = vld [vmem:[#allocation59_spill] sm:$0xff] }
 0xb6a   : > { %v7241_v13 = vpop.permute.xlu0 %7240  ;;  %v11345_v23 = vpack.i.bf16 %v11343_v30, %v11344_v20  ;;  %v11367_v20 = vld [vmem:[#allocation68_spill] sm:$0xff] }
 0xb6b   : > { %v5618_v0 = vsel %vm543_vm1, %v11333_v35, %v7248_v43  ;;  %v5617_v48 = vsel %vm543_vm1, %v11334_v16, %v7247_v1  ;;  %v7243_v37 = vunpack.i.h.bf16 %v7241_v13  ;;  %v7242_v52 = vunpack.i.l.bf16 %v7241_v13 }
 0xb6c   : > { %v7256_v34 = vpop.permute.xlu1 %7255 }
 0xb6d   : > { %v10611_v6 = vsel %vm5637_vm3, %v5615_v57, %v7242_v52  ;;  %v10614_v5 = vsel %vm5637_vm3, %v5616_v8, %v7243_v37  ;;  %v7258_v31 = vunpack.i.h.bf16 %v7256_v34  ;;  %v7257_v38 = vunpack.i.l.bf16 %v7256_v34  ;;  %v11346_v8 = vld [vmem:[#allocation61_spill] sm:$0xff]  ;;  %v11349_v37 = vld [vmem:[#allocation74_spill] sm:$0xff]  ;;  %v11350_v52 = vld [vmem:[#allocation71_spill] sm:$0xff] }
 0xb6e   : > { %v7251_v2 = vpop.permute.xlu0 %7250  ;;  %v11348_v57 = vpack.i.bf16 %v11346_v8, %v11347_v56  ;;  %v11351_v34 = vpack.i.bf16 %v11349_v37, %v11350_v52  ;;  %v11373_v37 = vld [vmem:[#allocation81_spill] sm:$0xff]  ;;  %v11374_v52 = vld [vmem:[#allocation76_spill] sm:$0xff] }
 0xb6f   : > { %v10617_v3 = vsel %vm5637_vm3, %v5617_v48, %v7257_v38  ;;  %v10620_v15 = vsel %vm5637_vm3, %v5618_v0, %v7258_v31  ;;  %v7253_v46 = vunpack.i.h.bf16 %v7251_v2  ;;  %v7252_v60 = vunpack.i.l.bf16 %v7251_v2  ;;  %v11352_v38 = vld [vmem:[#allocation73_spill] sm:$0xff]  ;;  %v11353_v2 = vld [vmem:[#allocation72_spill] sm:$0xff] }
 0xb71   : > { %v5620_v10 = vsel %vm543_vm1, %v11335_v4, %v7253_v46  ;;  %v5619_v62 = vsel %vm543_vm1, %v11336_v53, %v7252_v60  ;;  %v11354_v46 = vpack.i.bf16 %v11352_v38, %v11353_v2  ;;  %v11376_v38 = vld [vmem:[#allocation79_spill] sm:$0xff]  ;;  %v11377_v2 = vld [vmem:[#allocation80_spill] sm:$0xff] }
 0xb72   : > { %v7261_v17 = vpop.permute.xlu0 %7260 }
 0xb73   : > { %v7263_v36 = vunpack.i.h.bf16 %v7261_v17  ;;  %v7262_v28 = vunpack.i.l.bf16 %v7261_v17 }
 0xb75   : > { %v10627_v11 = vsel %vm5637_vm3, %v5619_v62, %v7262_v28  ;;  %v10630_v41 = vsel %vm5637_vm3, %v5620_v10, %v7263_v36  ;;  %v11355_v36 = vld [vmem:[#allocation64_spill] sm:$0xff]  ;;  %v11356_v28 = vld [vmem:[#allocation62_spill] sm:$0xff] }
 0xb76   : > { %v11357_v55 = vpack.i.bf16 %v11355_v36, %v11356_v28  ;;  %v7197_v36 = vunpack.i.l.bf16 %v10570_v58  ;;  %v10713_v28 = vpop.permute.xlu0 %7270 }
 0xbd8   : > { %v7008_v59 = vpop.f32.mrb[104].mxu1 }
 0xbd9   : > { %v4923_v61 = vpop.f32.mrb[105].mxu1 }
 0xbda   : > { %v7009_v45 = vpop.f32.mrb[106].mxu1 }
 0xbdb   : > { %v7274_v12 = vpack.i.bf16 %v7009_v45, %v7008_v59  ;;  %v4926_v63 = vpop.f32.mrb[107].mxu1  ;;  %v11359_v45 = vld [vmem:[#allocation63_spill] sm:$0xff] }
 0xbdc   : > { %v7279_v22 = vpack.i.bf16 %v4926_v63, %v4923_v61  ;;  %v11358_v61 = vld [vmem:[#allocation65_spill] sm:$0xff] }
 0xbdd   : > { %7275 = vrot.lane.b32.xlu0 %v7274_v12, %s7961_s26  ;;  %v11360_v12 = vpack.i.bf16 %v11358_v61, %v11359_v45  ;;  %v7203_v61 = vunpack.i.h.bf16 %v10579_v19  ;;  %v7202_v45 = vunpack.i.l.bf16 %v10579_v19 }
 0xbde   : > { %7280 = vrot.lane.b32.xlu1 %v7279_v22, %s7961_s26 }
 0xbe0   : > { %v7012_v7 = vpop.f32.mrb[108].mxu1 }
 0xbe1   : > { %7290 = vrot.lane.b32.xlu0 %v11339_v44, %s7960_s19  ;;  %v4939_v33 = vpop.f32.mrb[109].mxu1  ;;  %v11363_v44 = vpack.i.bf16 %v11361_v39, %v11362_v54 }
 0xbe2   : > { %7285 = vrot.lane.b32.xlu1 %v11342_v24, %s7960_s19  ;;  %v7013_v9 = vpop.f32.mrb[110].mxu1  ;;  %v11366_v24 = vpack.i.bf16 %v11364_v50, %v11365_v27 }
 0xbe3   : > { %v7294_v26 = vpack.i.bf16 %v7013_v9, %v7012_v7  ;;  %v4942_v21 = vpop.f32.mrb[111].mxu1 }
 0xbe4   : > { %v7299_v49 = vpack.i.bf16 %v4942_v21, %v4939_v33 }
 0xbe5   : > { %7295 = vrot.lane.b32.xlu0 %v7294_v26, %s7961_s26 }
 0xbe6   : > { %7300 = vrot.lane.b32.xlu1 %v7299_v49, %s7961_s26 }
 0xbe9   : > { %7310 = vrot.lane.b32.xlu0 %v11345_v23, %s7959_s17  ;;  %v11368_v23 = vld [vmem:[#allocation66_spill] sm:$0xff] }
 0xbea   : > { %7305 = vrot.lane.b32.xlu1 %v11348_v57, %s7959_s17  ;;  %v11369_v8 = vpack.i.bf16 %v11367_v20, %v11368_v23  ;;  %v11370_v57 = vld [vmem:[#allocation69_spill] sm:$0xff] }
 0xc0a   : > { %v7024_v43 = vpop.f32.mrb[152].mxu0 }
 0xc0b   : > { %v5012_v1 = vpop.f32.mrb[153].mxu0 }
 0xc0c   : > { %v7025_v13 = vpop.f32.mrb[154].mxu0 }
 0xc0d   : > { %v7314_v35 = vpack.i.bf16 %v7025_v13, %v7024_v43  ;;  %v5015_v0 = vpop.f32.mrb[155].mxu0  ;;  %v11371_v43 = vld [vmem:[#allocation67_spill] sm:$0xff] }
 0xc0e   : > { %v7319_v16 = vpack.i.bf16 %v5015_v0, %v5012_v1  ;;  %v11372_v1 = vpack.i.bf16 %v11370_v57, %v11371_v43 }
 0xc0f   : > { %7315 = vrot.lane.b32.xlu0 %v7314_v35, %s7961_s26 }
 0xc10   : > { %7320 = vrot.lane.b32.xlu1 %v7319_v16, %s7961_s26 }
 0xc12   : > { %v7028_v48 = vpop.f32.mrb[156].mxu0 }
 0xc13   : > { %7330 = vrot.lane.b32.xlu0 %v11351_v34, %s7960_s19  ;;  %v5028_v31 = vpop.f32.mrb[157].mxu0  ;;  %v11375_v34 = vpack.i.bf16 %v11373_v37, %v11374_v52  ;;  %v7222_v37 = vunpack.i.l.bf16 %v10590_v51  ;;  %v7217_v52 = vunpack.i.l.bf16 %v10584_v25 }
 0xc14   : > { %7325 = vrot.lane.b32.xlu1 %v11354_v46, %s7960_s19  ;;  %v7029_v60 = vpop.f32.mrb[158].mxu0  ;;  %v11378_v46 = vpack.i.bf16 %v11376_v38, %v11377_v2  ;;  %v11384_v38 = vld [vmem:[#allocation17_spill] sm:$0xff] }
 0xc15   : > { %v7334_v4 = vpack.i.bf16 %v7029_v60, %v7028_v48  ;;  %v5031_v10 = vpop.f32.mrb[159].mxu0 }
 0xc16   : > { %v7339_v53 = vpack.i.bf16 %v5031_v10, %v5028_v31 }
 0xc17   : > { %7335 = vrot.lane.b32.xlu0 %v7334_v4, %s7961_s26 }
 0xc18   : > { %7340 = vrot.lane.b32.xlu1 %v7339_v53, %s7961_s26 }
 0xc19   : > { %v7040_v62 = vpop.f32.mrb[112].mxu1 }
 0xc1a   : > { %v5101_v17 = vpop.f32.mrb[113].mxu1 }
 0xc1b   : > { %7350 = vrot.lane.b32.xlu0 %v11357_v55, %s7959_s17  ;;  %v7041_v29 = vpop.f32.mrb[114].mxu1  ;;  %v7193_v55 = vunpack.i.h.bf16 %v10573_v42 }
 0xc1c   : > { %v7354_v59 = vpack.i.bf16 %v7041_v29, %v7040_v62  ;;  %7345 = vrot.lane.b32.xlu1 %v11360_v12, %s7959_s17  ;;  %v5104_v63 = vpop.f32.mrb[115].mxu1  ;;  %v7187_v62 = vunpack.i.l.bf16 %v10564_v14  ;;  %v7192_v29 = vunpack.i.l.bf16 %v10573_v42  ;;  %v11379_v12 = vld [vmem:[#allocation9_spill] sm:$0xff] }
 0xc1d   : > { %v7359_v22 = vpack.i.bf16 %v5104_v63, %v5101_v17  ;;  %v7188_v17 = vunpack.i.h.bf16 %v10564_v14  ;;  %v11380_v14 = vld [vmem:[#allocation20_spill] sm:$0xff] }
 0xc1e   : > { %v5605_v63 = vsel %vm543_vm1, %v11379_v12, %v7187_v62 }
 0xc1f   : > { %7355 = vrot.lane.b32.xlu0 %v7354_v59, %s7961_s26  ;;  %v10717_v59 = vpop.permute.xlu1 %7265  ;;  %v5638_v39 = vsel %vm5637_vm3, %v5605_v63, %v7197_v36 }
 0xc20   : > { %7360 = vrot.lane.b32.xlu1 %v7359_v22, %s7961_s26  ;;  %v7198_v22 = vunpack.i.h.bf16 %v10570_v58 }
 0xc22   : > { %v7044_v7 = vpop.f32.mrb[116].mxu1 }
 0xc23   : > { %7370 = vrot.lane.b32.xlu0 %v11363_v44, %s7960_s19  ;;  %v5117_v33 = vpop.f32.mrb[117].mxu1  ;;  %v11381_v44 = vld [vmem:[#allocation11_spill] sm:$0xff] }
 0xc24   : > { %7365 = vrot.lane.b32.xlu1 %v11366_v24, %s7960_s19  ;;  %v7045_v9 = vpop.f32.mrb[118].mxu1  ;;  %v5608_v42 = vsel %vm543_vm1, %v11381_v44, %v7193_v55 }
 0xc25   : > { %v7374_v26 = vpack.i.bf16 %v7045_v9, %v7044_v7  ;;  %v5120_v21 = vpop.f32.mrb[119].mxu1  ;;  %v5606_v7 = vsel %vm543_vm1, %v11380_v14, %v7188_v17  ;;  %v5641_v58 = vsel %vm5637_vm3, %v5608_v42, %v7203_v61 }
 0xc26   : > { %v7379_v49 = vpack.i.bf16 %v5120_v21, %v5117_v33  ;;  %v11382_v33 = vld [vmem:[#allocation8_spill] sm:$0xff] }
 0xc27   : > { %7375 = vrot.lane.b32.xlu0 %v7374_v26, %s7961_s26  ;;  %v5607_v50 = vsel %vm543_vm1, %v11382_v33, %v7192_v29 }
 0xc28   : > { %7380 = vrot.lane.b32.xlu1 %v7379_v49, %s7961_s26  ;;  %v5640_v9 = vsel %vm5637_vm3, %v5607_v50, %v7202_v45  ;;  %v5639_v49 = vsel %vm5637_vm3, %v5606_v7, %v7198_v22 }
 0xc2a   : > { %v7056_v30 = vpop.f32.mrb[160].mxu0 }
 0xc2b   : > { %7390 = vrot.lane.b32.xlu0 %v11369_v8, %s7959_s17  ;;  %v5190_v56 = vpop.f32.mrb[161].mxu0  ;;  %v7207_v8 = vunpack.i.l.bf16 %v10576_v47 }
 0xc2c   : > { %7385 = vrot.lane.b32.xlu1 %v11372_v1, %s7959_s17  ;;  %v7057_v13 = vpop.f32.mrb[162].mxu0 }
 0xc2d   : > { %v7394_v35 = vpack.i.bf16 %v7057_v13, %v7056_v30  ;;  %v5193_v0 = vpop.f32.mrb[163].mxu0  ;;  %v7208_v30 = vunpack.i.h.bf16 %v10576_v47  ;;  %v7213_v13 = vunpack.i.h.bf16 %v10587_v40  ;;  %v7218_v47 = vunpack.i.h.bf16 %v10584_v25 }
 0xc2e   : > { %v7399_v16 = vpack.i.bf16 %v5193_v0, %v5190_v56  ;;  %v5609_v2 = vsel %vm543_vm1, %v11384_v38, %v7207_v8  ;;  %v11387_v38 = vld [vmem:[#allocation24_spill] sm:$0xff] }
 0xc2f   : > { %7395 = vrot.lane.b32.xlu0 %v7394_v35, %s7961_s26  ;;  %v7212_v35 = vunpack.i.l.bf16 %v10587_v40  ;;  %v5642_v29 = vsel %vm5637_vm3, %v5609_v2, %v7217_v52 }
 0xc30   : > { %7400 = vrot.lane.b32.xlu1 %v7399_v16, %s7961_s26 }
 0xc32   : > { %v7060_v48 = vpop.f32.mrb[164].mxu0 }
 0xc33   : > { %7410 = vrot.lane.b32.xlu0 %v11375_v34, %s7960_s19  ;;  %v5206_v31 = vpop.f32.mrb[165].mxu0  ;;  %v11383_v34 = vld [vmem:[#allocation13_spill] sm:$0xff] }
 0xc34   : > { %7405 = vrot.lane.b32.xlu1 %v11378_v46, %s7960_s19  ;;  %v7061_v60 = vpop.f32.mrb[166].mxu0  ;;  %v11385_v46 = vld [vmem:[#allocation10_spill] sm:$0xff] }
 0xc35   : > { %v7419_v4 = vpack.i.bf16 %v7061_v60, %v7060_v48  ;;  %v5209_v10 = vpop.f32.mrb[167].mxu0  ;;  %v7223_v48 = vunpack.i.h.bf16 %v10590_v51  ;;  %v5612_v60 = vsel %vm543_vm1, %v11385_v46, %v7213_v13  ;;  %v7272_v13 = vunpack.i.l.bf16 %v10713_v28 }
 0xc36   : > { %v7414_v53 = vpack.i.bf16 %v5209_v10, %v5206_v31  ;;  %v5610_v31 = vsel %vm543_vm1, %v11383_v34, %v7208_v30 }
 0xc37   : > { %7420 = vrot.lane.b32.xlu0 %v7419_v4, %s7961_s26  ;;  %v11386_v4 = vld [vmem:[#allocation12_spill] sm:$0xff]  ;;  %v5645_v17 = vsel %vm5637_vm3, %v5612_v60, %v7223_v48  ;;  %v5643_v61 = vsel %vm5637_vm3, %v5610_v31, %v7218_v47  ;;  %v5623_v2 = vsel %vm543_vm1, %v11387_v38, %v7272_v13  ;;  %v11390_v60 = vld [vmem:[#allocation26_spill] sm:$0xff] }
 0xc38   : > { %7415 = vrot.lane.b32.xlu1 %v7414_v53, %s7961_s26  ;;  %v5611_v51 = vsel %vm543_vm1, %v11386_v4, %v7212_v35 }
 0xc39   : > { %v5644_v62 = vsel %vm5637_vm3, %v5611_v51, %v7222_v37 }
 0xc4f   : > { %v7276_v54 = vpop.permute.xlu0 %7275 }
 0xc50   : > { %v7278_v27 = vunpack.i.h.bf16 %v7276_v54  ;;  %v7277_v19 = vunpack.i.l.bf16 %v7276_v54  ;;  %v7281_v24 = vpop.permute.xlu1 %7280 }
 0xc51   : > { %v7283_v26 = vunpack.i.h.bf16 %v7281_v24  ;;  %v7282_v21 = vunpack.i.l.bf16 %v7281_v24 }
 0xc52   : > { %v5673_v20 = vsel %vm5670_vm4, %v5640_v9, %v7277_v19  ;;  %v5674_v23 = vsel %vm5670_vm4, %v5641_v58, %v7278_v27 }
 0xc53   : > { %v5704_v56 = vpack.c.bf16 %v5674_v23, %v5673_v20  ;;  %v5672_v57 = vsel %vm5670_vm4, %v5639_v49, %v7283_v26  ;;  %v5671_v43 = vsel %vm5670_vm4, %v5638_v39, %v7282_v21  ;;  %v10740_v1 = vpop.permute.xlu0 %7290 }
 0xc54   : > { %v5703_v0 = vpack.c.bf16 %v5672_v57, %v5671_v43  ;;  %v10744_v16 = vpop.permute.xlu1 %7285  ;;  %v7292_v48 = vunpack.i.l.bf16 %v10740_v1  ;;  %v7293_v34 = vunpack.i.h.bf16 %v10740_v1 }
 0xc56   : > { %7066 = vmatprep.mubr.msk.bf16.mxu1 %vm305_vm0, %v5703_v0  ;;  %v5656_v4 = vsel %vm5637_vm3, %v5623_v2, %v7292_v48 }
 0xc57   : > { %v7296_v40 = vpop.permute.xlu0 %7295  ;;  %7067 = vmatmul.mubr.msk.bf16.vlgmr.msra.gmra.mrb[120].mxu1 %vm305_vm0, %v5704_v56  ;;  %v7268_v56 = vunpack.i.h.bf16 %v10717_v59 }
 0xc58   : > { %v7298_v10 = vunpack.i.h.bf16 %v7296_v40  ;;  %v7297_v53 = vunpack.i.l.bf16 %v7296_v40  ;;  %v7301_v25 = vpop.permute.xlu1 %7300 }
 0xc59   : > { %v7303_v36 = vunpack.i.h.bf16 %v7301_v25  ;;  %v7302_v55 = vunpack.i.l.bf16 %v7301_v25 }
 0xc5a   : > { %v5677_v45 = vsel %vm5670_vm4, %v5644_v62, %v7297_v53  ;;  %v5678_v12 = vsel %vm5670_vm4, %v5645_v17, %v7298_v10 }
 0xc5b   : > { %v5706_v63 = vpack.c.bf16 %v5678_v12, %v5677_v45  ;;  %v5676_v22 = vsel %vm5670_vm4, %v5643_v61, %v7303_v36  ;;  %v5675_v14 = vsel %vm5670_vm4, %v5642_v29, %v7302_v55  ;;  %v10770_v39 = vpop.permute.xlu0 %7310 }
 0xc5c   : > { %v5705_v7 = vpack.c.bf16 %v5676_v22, %v5675_v14  ;;  %v10772_v54 = vpop.permute.xlu1 %7305  ;;  %v7313_v36 = vunpack.i.h.bf16 %v10770_v39  ;;  %v7312_v61 = vunpack.i.l.bf16 %v10770_v39 }
 0xc5d   : > { %v7308_v45 = vunpack.i.h.bf16 %v10772_v54  ;;  %v7307_v22 = vunpack.i.l.bf16 %v10772_v54 }
 0xc5e   : > { %7070 = vmatprep.mubr.msk.bf16.mxu1 %vm305_vm0, %v5705_v7 }
 0xc5f   : > { %7071 = vmatmul.mubr.msk.bf16.gmra.mrb[124].mxu1 %vm305_vm0, %v5706_v63 }
 0xc81   : > { %v7316_v44 = vpop.permute.xlu0 %7315 }
 0xc82   : > { %v7318_v42 = vunpack.i.h.bf16 %v7316_v44  ;;  %v7317_v33 = vunpack.i.l.bf16 %v7316_v44  ;;  %v7321_v50 = vpop.permute.xlu1 %7320 }
 0xc83   : > { %v7323_v27 = vunpack.i.h.bf16 %v7321_v50  ;;  %v7322_v19 = vunpack.i.l.bf16 %v7321_v50 }
 0xc84   : > { %v5681_v24 = vsel %vm5670_vm4, %v10611_v6, %v7317_v33  ;;  %v5682_v9 = vsel %vm5670_vm4, %v10614_v5, %v7318_v42 }
 0xc85   : > { %v5708_v58 = vpack.c.bf16 %v5682_v9, %v5681_v24  ;;  %v5680_v26 = vsel %vm5670_vm4, %v10600_v32, %v7323_v27  ;;  %v5679_v21 = vsel %vm5670_vm4, %v10597_v18, %v7322_v19  ;;  %v10782_v49 = vpop.permute.xlu0 %7330  ;;  %v7267_v32 = vunpack.i.l.bf16 %v10717_v59  ;;  %v11391_v9 = vld [vmem:[#allocation30_spill] sm:$0xff] }
 0xc86   : > { %v5707_v30 = vpack.c.bf16 %v5680_v26, %v5679_v21  ;;  %v10784_v20 = vpop.permute.xlu1 %7325  ;;  %v7273_v18 = vunpack.i.h.bf16 %v10713_v28  ;;  %v7288_v28 = vunpack.i.h.bf16 %v10744_v16  ;;  %v7333_v33 = vunpack.i.h.bf16 %v10782_v49  ;;  %v11393_v21 = vld [vmem:[#allocation31_spill] sm:$0xff] }
 0xc87   : > { %v7332_v50 = vunpack.i.l.bf16 %v10782_v49  ;;  %v7328_v19 = vunpack.i.h.bf16 %v10784_v20  ;;  %v7327_v24 = vunpack.i.l.bf16 %v10784_v20  ;;  %v5628_v54 = vsel %vm543_vm1, %v11391_v9, %v7313_v36 }
 0xc88   : > { %7074 = vmatprep.mubr.msk.bf16.mxu1 %vm305_vm0, %v5707_v30  ;;  %v5624_v1 = vsel %vm543_vm1, %v11390_v60, %v7273_v18  ;;  %v5626_v30 = vsel %vm543_vm1, %v11393_v21, %v7308_v45  ;;  %v5661_v20 = vsel %vm5637_vm3, %v5628_v54, %v7333_v33  ;;  %v11399_v21 = vld [vmem:[#allocation38_spill] sm:$0xff] }
 0xc89   : > { %v7336_v23 = vpop.permute.xlu0 %7335  ;;  %7075 = vmatmul.mubr.msk.bf16.gmra.mrb[128].mxu1 %vm305_vm0, %v5708_v58  ;;  %v11392_v58 = vld [vmem:[#allocation28_spill] sm:$0xff] }
 0xc8a   : > { %v7338_v6 = vunpack.i.h.bf16 %v7336_v23  ;;  %v7337_v8 = vunpack.i.l.bf16 %v7336_v23  ;;  %v7341_v5 = vpop.permute.xlu1 %7340  ;;  %v5627_v26 = vsel %vm543_vm1, %v11392_v58, %v7312_v61  ;;  %v11394_v23 = vld [vmem:[#allocation29_spill] sm:$0xff] }
 0xc8b   : > { %v7343_v57 = vunpack.i.h.bf16 %v7341_v5  ;;  %v7342_v43 = vunpack.i.l.bf16 %v7341_v5  ;;  %v5625_v49 = vsel %vm543_vm1, %v11394_v23, %v7307_v22  ;;  %v11400_v23 = vld [vmem:[#allocation36_spill] sm:$0xff] }
 0xc8c   : > { %v5685_v35 = vsel %vm5670_vm4, %v10627_v11, %v7337_v8  ;;  %v5686_v0 = vsel %vm5670_vm4, %v10630_v41, %v7338_v6  ;;  %v7287_v41 = vunpack.i.l.bf16 %v10744_v16  ;;  %v5657_v16 = vsel %vm5637_vm3, %v5624_v1, %v7293_v34  ;;  %v11396_v1 = vld [vmem:[#allocation32_spill] sm:$0xff] }
 0xc8d   : > { %v5710_v37 = vpack.c.bf16 %v5686_v0, %v5685_v35  ;;  %v5684_v47 = vsel %vm5670_vm4, %v10620_v15, %v7343_v57  ;;  %v5683_v59 = vsel %vm5670_vm4, %v10617_v3, %v7342_v43  ;;  %v10801_v52 = vpop.permute.xlu0 %7350  ;;  %v11388_v15 = vld [vmem:[#allocation27_spill] sm:$0xff]  ;;  %v11389_v3 = vld [vmem:[#allocation25_spill] sm:$0xff]  ;;  %v5660_v8 = vsel %vm5637_vm3, %v5627_v26, %v7332_v50 }
 0xc8e   : > { %v5709_v31 = vpack.c.bf16 %v5684_v47, %v5683_v59  ;;  %v10805_v11 = vpop.permute.xlu1 %7345  ;;  %v5622_v40 = vsel %vm543_vm1, %v11388_v15, %v7268_v56  ;;  %v5621_v46 = vsel %vm543_vm1, %v11389_v3, %v7267_v32  ;;  %v5658_v57 = vsel %vm5637_vm3, %v5625_v49, %v7327_v24 }
 0xc8f   : > { %v5655_v10 = vsel %vm5637_vm3, %v5622_v40, %v7288_v28  ;;  %v5654_v17 = vsel %vm5637_vm3, %v5621_v46, %v7287_v41  ;;  %v5659_v43 = vsel %vm5637_vm3, %v5626_v30, %v7328_v19  ;;  %v7353_v35 = vunpack.i.h.bf16 %v10801_v52  ;;  %v11395_v46 = vld [vmem:[#allocation34_spill] sm:$0xff] }
 0xc90   : > { %7078 = vmatprep.mubr.msk.bf16.mxu1 %vm305_vm0, %v5709_v31  ;;  %v7352_v0 = vunpack.i.l.bf16 %v10801_v52  ;;  %v7348_v47 = vunpack.i.h.bf16 %v10805_v11  ;;  %v7347_v41 = vunpack.i.l.bf16 %v10805_v11  ;;  %v11398_v11 = vld [vmem:[#allocation33_spill] sm:$0xff] }
 0xc91   : > { %v7356_v51 = vpop.permute.xlu0 %7355  ;;  %7079 = vmatmul.mubr.msk.bf16.gmra.mrb[132].mxu1 %vm305_vm0, %v5710_v37  ;;  %v5632_v60 = vsel %vm543_vm1, %v11395_v46, %v7353_v35 }
 0xc92   : > { %v7358_v53 = vunpack.i.h.bf16 %v7356_v51  ;;  %v7357_v25 = vunpack.i.l.bf16 %v7356_v51  ;;  %v7361_v62 = vpop.permute.xlu1 %7360  ;;  %v11397_v51 = vld [vmem:[#allocation35_spill] sm:$0xff] }
 0xc93   : > { %v7363_v55 = vunpack.i.h.bf16 %v7361_v62  ;;  %v7362_v29 = vunpack.i.l.bf16 %v7361_v62 }
 0xc94   : > { %v5689_v12 = vsel %vm5670_vm4, %v5656_v4, %v7357_v25  ;;  %v5690_v63 = vsel %vm5670_vm4, %v5657_v16, %v7358_v53  ;;  %v5631_v4 = vsel %vm543_vm1, %v11396_v1, %v7352_v0  ;;  %v5630_v16 = vsel %vm543_vm1, %v11397_v51, %v7348_v47 }
 0xc95   : > { %v5712_v14 = vpack.c.bf16 %v5690_v63, %v5689_v12  ;;  %v5688_v7 = vsel %vm5670_vm4, %v5655_v10, %v7363_v55  ;;  %v5687_v44 = vsel %vm5670_vm4, %v5654_v17, %v7362_v29  ;;  %v7371_v42 = vpop.permute.xlu0 %7370  ;;  %v5629_v53 = vsel %vm543_vm1, %v11398_v11, %v7347_v41 }
 0xc96   : > { %v5711_v27 = vpack.c.bf16 %v5688_v7, %v5687_v44  ;;  %v7366_v39 = vpop.permute.xlu1 %7365  ;;  %v7372_v38 = vunpack.i.l.bf16 %v7371_v42  ;;  %v7373_v40 = vunpack.i.h.bf16 %v7371_v42 }
 0xc97   : > { %v7368_v3 = vunpack.i.h.bf16 %v7366_v39  ;;  %v7367_v52 = vunpack.i.l.bf16 %v7366_v39 }
 0xc98   : > { %7082 = vmatprep.mubr.msk.bf16.mxu1 %vm305_vm0, %v5711_v27  ;;  %v5664_v25 = vsel %vm5637_vm3, %v5631_v4, %v7372_v38  ;;  %v5665_v55 = vsel %vm5637_vm3, %v5632_v60, %v7373_v40  ;;  %v10897_v38 = vld [vmem:[%s11009_s4] ss:$0 sm:$0xff] }
 0xc99   : > { %v7376_v6 = vpop.permute.xlu0 %7375  ;;  %7083 = vmatmul.mubr.msk.bf16.gmra.mrb[136].mxu1 %vm305_vm0, %v5712_v14  ;;  %v5663_v29 = vsel %vm5637_vm3, %v5630_v16, %v7368_v3  ;;  %v5662_v12 = vsel %vm5637_vm3, %v5629_v53, %v7367_v52 }
 0xc9a   : > { %v7378_v5 = vunpack.i.h.bf16 %v7376_v6  ;;  %v7377_v56 = vunpack.i.l.bf16 %v7376_v6  ;;  %v7381_v32 = vpop.permute.xlu1 %7380 }
 0xc9b   : > { %v7383_v18 = vunpack.i.h.bf16 %v7381_v32  ;;  %v7382_v13 = vunpack.i.l.bf16 %v7381_v32 }
 0xc9c   : > { %v5693_v48 = vsel %vm5670_vm4, %v5660_v8, %v7377_v56  ;;  %v5694_v37 = vsel %vm5670_vm4, %v5661_v20, %v7378_v5  ;;  %v11401_v8 = vld [vmem:[#allocation39_spill] sm:$0xff]  ;;  %v11402_v5 = vld [vmem:[#allocation37_spill] sm:$0xff] }
 0xc9d   : > { %v5714_v59 = vpack.c.bf16 %v5694_v37, %v5693_v48  ;;  %v5692_v34 = vsel %vm5670_vm4, %v5659_v43, %v7383_v18  ;;  %v5691_v28 = vsel %vm5670_vm4, %v5658_v57, %v7382_v13  ;;  %v7391_v31 = vpop.permute.xlu0 %7390 }
 0xc9e   : > { %v5713_v2 = vpack.c.bf16 %v5692_v34, %v5691_v28  ;;  %v7386_v15 = vpop.permute.xlu1 %7385  ;;  %v7393_v63 = vunpack.i.h.bf16 %v7391_v31  ;;  %v7392_v7 = vunpack.i.l.bf16 %v7391_v31 }
 0xc9f   : > { %v7388_v27 = vunpack.i.h.bf16 %v7386_v15  ;;  %v7387_v39 = vunpack.i.l.bf16 %v7386_v15 }
 0xca0   : > { %7086 = vmatprep.mubr.msk.bf16.mxu1 %vm305_vm0, %v5713_v2  ;;  %v5636_v30 = vsel %vm543_vm1, %v11399_v21, %v7393_v63  ;;  %v5635_v49 = vsel %vm543_vm1, %v11400_v23, %v7392_v7 }
 0xca1   : > { %v7396_v10 = vpop.permute.xlu0 %7395  ;;  %7087 = vmatmul.mubr.msk.bf16.gmra.mrb[140].mxu1 %vm305_vm0, %v5714_v59  ;;  %v5634_v20 = vsel %vm543_vm1, %v11401_v8, %v7388_v27  ;;  %v5633_v56 = vsel %vm543_vm1, %v11402_v5, %v7387_v39 }
 0xca2   : > { %v7398_v62 = vunpack.i.h.bf16 %v7396_v10  ;;  %v7397_v17 = vunpack.i.l.bf16 %v7396_v10  ;;  %v7401_v36 = vpop.permute.xlu1 %7400 }
 0xca3   : > { %v7403_v61 = vunpack.i.h.bf16 %v7401_v36  ;;  %v7402_v45 = vunpack.i.l.bf16 %v7401_v36 }
 0xca4   : > { %v5697_v22 = vsel %vm5670_vm4, %v5664_v25, %v7397_v17  ;;  %v5698_v14 = vsel %vm5670_vm4, %v5665_v55, %v7398_v62 }
 0xca5   : > { %v5716_v44 = vpack.c.bf16 %v5698_v14, %v5697_v22  ;;  %v5696_v42 = vsel %vm5670_vm4, %v5663_v29, %v7403_v61  ;;  %v5695_v33 = vsel %vm5670_vm4, %v5662_v12, %v7402_v45  ;;  %v7411_v50 = vpop.permute.xlu0 %7410 }
 0xca6   : > { %v5715_v19 = vpack.c.bf16 %v5696_v42, %v5695_v33  ;;  %v7406_v24 = vpop.permute.xlu1 %7405  ;;  %v7413_v9 = vunpack.i.h.bf16 %v7411_v50  ;;  %v7412_v54 = vunpack.i.l.bf16 %v7411_v50 }
 0xca7   : > { %v7408_v58 = vunpack.i.h.bf16 %v7406_v24  ;;  %v7407_v26 = vunpack.i.l.bf16 %v7406_v24 }
 0xca8   : > { %7090 = vmatprep.mubr.msk.bf16.mxu1 %vm305_vm0, %v5715_v19  ;;  %v5668_v18 = vsel %vm5637_vm3, %v5635_v49, %v7412_v54  ;;  %v5669_v13 = vsel %vm5637_vm3, %v5636_v30, %v7413_v9 }
 0xca9   : > { %v7421_v6 = vpop.permute.xlu0 %7420  ;;  %7091 = vmatmul.mubr.msk.bf16.gmra.mrb[144].mxu1 %vm305_vm0, %v5716_v44  ;;  %v5667_v48 = vsel %vm5637_vm3, %v5634_v20, %v7408_v58  ;;  %v5666_v37 = vsel %vm5637_vm3, %v5633_v56, %v7407_v26 }
 0xcaa   : > { %v7423_v32 = vunpack.i.h.bf16 %v7421_v6  ;;  %v7422_v57 = vunpack.i.l.bf16 %v7421_v6  ;;  %v7416_v43 = vpop.permute.xlu1 %7415 }
 0xcab   : > { %v7418_v35 = vunpack.i.h.bf16 %v7416_v43  ;;  %v7417_v0 = vunpack.i.l.bf16 %v7416_v43 }
 0xcac   : > { %v5701_v47 = vsel %vm5670_vm4, %v5668_v18, %v7422_v57  ;;  %v5702_v59 = vsel %vm5670_vm4, %v5669_v13, %v7423_v32 }
 0xcad   : > { %v5718_v34 = vpack.c.bf16 %v5702_v59, %v5701_v47  ;;  %v5700_v28 = vsel %vm5670_vm4, %v5667_v48, %v7418_v35  ;;  %v5699_v31 = vsel %vm5670_vm4, %v5666_v37, %v7417_v0 }
 0xcae   : > { %v5717_v41 = vpack.c.bf16 %v5700_v28, %v5699_v31 }
 0xcb0   : > { %7094 = vmatprep.mubr.msk.bf16.mxu1 %vm305_vm0, %v5717_v41 }
 0xcb1   : > { %7095 = vmatmul.mubr.msk.bf16.gmra.mrb[148].mxu1 %vm305_vm0, %v5718_v34 }
 0xd2a   : > { %v7068_v2 = vpop.f32.mrb[120].mxu1 }
 0xd2b   : > { %v5833_v15 = vadd.f32 %v7068_v2, %v10897_v38  ;;  %v5824_v40 = vpop.f32.mrb[121].mxu1 }
 0xd2c   : > { %v5825_v3 = vadd.f32 %v10897_v38, %v5824_v40  ;;  %v7069_v52 = vpop.f32.mrb[122].mxu1 }
 0xd2d   : > { %5953 = vst.msk [vmem:[%s10904_s6 + $0x10] sm:$0xff] %vm305_vm0, %v5833_v15  ;;  %v5836_v46 = vadd.f32 %v7069_v52, %v10897_v38  ;;  %v5827_v60 = vpop.f32.mrb[123].mxu1 }
 0xd2e   : > { %5951 = vst.msk [vmem:[%s10904_s6] sm:$0xff] %vm305_vm0, %v5825_v3  ;;  %v5828_v1 = vadd.f32 %v10897_v38, %v5827_v60 }
 0xd2f   : > { %5954 = vst.msk [vmem:[%s10904_s6 + $0x18] sm:$0xff] %vm305_vm0, %v5836_v46 }
 0xd30   : > { %5952 = vst.msk [vmem:[%s10904_s6 + $0x8] sm:$0xff] %vm305_vm0, %v5828_v1 }
 0xd32   : > { %v7072_v4 = vpop.f32.mrb[124].mxu1 }
 0xd33   : > { %v5849_v51 = vadd.f32 %v7072_v4, %v10897_v38  ;;  %v5840_v16 = vpop.f32.mrb[125].mxu1 }
 0xd34   : > { %v5841_v10 = vadd.f32 %v10897_v38, %v5840_v16  ;;  %v7073_v11 = vpop.f32.mrb[126].mxu1 }
 0xd35   : > { %5957 = vst.msk [vmem:[%s10904_s6 + $0x30] sm:$0xff] %vm305_vm0, %v5849_v51  ;;  %v5852_v53 = vadd.f32 %v7073_v11, %v10897_v38  ;;  %v5843_v25 = vpop.f32.mrb[127].mxu1 }
 0xd36   : > { %5955 = vst.msk [vmem:[%s10904_s6 + $0x20] sm:$0xff] %vm305_vm0, %v5841_v10  ;;  %v5844_v62 = vadd.f32 %v10897_v38, %v5843_v25 }
 0xd37   : > { %5958 = vst.msk [vmem:[%s10904_s6 + $0x38] sm:$0xff] %vm305_vm0, %v5852_v53 }
 0xd38   : > { %5956 = vst.msk [vmem:[%s10904_s6 + $0x28] sm:$0xff] %vm305_vm0, %v5844_v62 }
 0xd5c   : > { %v7076_v17 = vpop.f32.mrb[128].mxu1 }
 0xd5d   : > { %v5865_v36 = vadd.f32 %v7076_v17, %v10897_v38  ;;  %v5856_v55 = vpop.f32.mrb[129].mxu1 }
 0xd5e   : > { %v5857_v29 = vadd.f32 %v10897_v38, %v5856_v55  ;;  %v7077_v61 = vpop.f32.mrb[130].mxu1 }
 0xd5f   : > { %5961 = vst.msk [vmem:[%s10904_s6 + $0x50] sm:$0xff] %vm305_vm0, %v5865_v36  ;;  %v5868_v45 = vadd.f32 %v7077_v61, %v10897_v38  ;;  %v5859_v12 = vpop.f32.mrb[131].mxu1 }
 0xd60   : > { %5959 = vst.msk [vmem:[%s10904_s6 + $0x40] sm:$0xff] %vm305_vm0, %v5857_v29  ;;  %v5860_v63 = vadd.f32 %v10897_v38, %v5859_v12 }
 0xd61   : > { %5962 = vst.msk [vmem:[%s10904_s6 + $0x58] sm:$0xff] %vm305_vm0, %v5868_v45 }
 0xd62   : > { %5960 = vst.msk [vmem:[%s10904_s6 + $0x48] sm:$0xff] %vm305_vm0, %v5860_v63 }
 0xd64   : > { %v7080_v22 = vpop.f32.mrb[132].mxu1 }
 0xd65   : > { %v5881_v14 = vadd.f32 %v7080_v22, %v10897_v38  ;;  %v5872_v7 = vpop.f32.mrb[133].mxu1 }
 0xd66   : > { %v5873_v44 = vadd.f32 %v10897_v38, %v5872_v7  ;;  %v7081_v42 = vpop.f32.mrb[134].mxu1 }
 0xd67   : > { %5965 = vst.msk [vmem:[%s10904_s6 + $0x70] sm:$0xff] %vm305_vm0, %v5881_v14  ;;  %v5884_v33 = vadd.f32 %v7081_v42, %v10897_v38  ;;  %v5875_v50 = vpop.f32.mrb[135].mxu1 }
 0xd68   : > { %5963 = vst.msk [vmem:[%s10904_s6 + $0x60] sm:$0xff] %vm305_vm0, %v5873_v44  ;;  %v5876_v27 = vadd.f32 %v10897_v38, %v5875_v50 }
 0xd69   : > { %5966 = vst.msk [vmem:[%s10904_s6 + $0x78] sm:$0xff] %vm305_vm0, %v5884_v33 }
 0xd6a   : > { %5964 = vst.msk [vmem:[%s10904_s6 + $0x68] sm:$0xff] %vm305_vm0, %v5876_v27 }
 0xd6c   : > { %v7084_v39 = vpop.f32.mrb[136].mxu1 }
 0xd6d   : > { %v5897_v19 = vadd.f32 %v7084_v39, %v10897_v38  ;;  %v5888_v24 = vpop.f32.mrb[137].mxu1 }
 0xd6e   : > { %v5889_v9 = vadd.f32 %v10897_v38, %v5888_v24  ;;  %v7085_v54 = vpop.f32.mrb[138].mxu1 }
 0xd6f   : > { %5969 = vst.msk [vmem:[%s10904_s6 + $0x90] sm:$0xff] %vm305_vm0, %v5897_v19  ;;  %v5900_v58 = vadd.f32 %v7085_v54, %v10897_v38  ;;  %v5891_v26 = vpop.f32.mrb[139].mxu1 }
 0xd70   : > { %5967 = vst.msk [vmem:[%s10904_s6 + $0x80] sm:$0xff] %vm305_vm0, %v5889_v9  ;;  %v5892_v21 = vadd.f32 %v10897_v38, %v5891_v26 }
 0xd71   : > { %5970 = vst.msk [vmem:[%s10904_s6 + $0x98] sm:$0xff] %vm305_vm0, %v5900_v58 }
 0xd72   : > { %5968 = vst.msk [vmem:[%s10904_s6 + $0x88] sm:$0xff] %vm305_vm0, %v5892_v21 }
 0xd74   : > { %v7088_v30 = vpop.f32.mrb[140].mxu1 }
 0xd75   : > { %v5913_v23 = vadd.f32 %v7088_v30, %v10897_v38  ;;  %v5904_v49 = vpop.f32.mrb[141].mxu1 }
 0xd76   : > { %v5905_v6 = vadd.f32 %v10897_v38, %v5904_v49  ;;  %v7089_v8 = vpop.f32.mrb[142].mxu1 }
 0xd77   : > { %5973 = vst.msk [vmem:[%s10904_s6 + $0xb0] sm:$0xff] %vm305_vm0, %v5913_v23  ;;  %v5916_v20 = vadd.f32 %v7089_v8, %v10897_v38  ;;  %v5907_v5 = vpop.f32.mrb[143].mxu1 }
 0xd78   : > { %5971 = vst.msk [vmem:[%s10904_s6 + $0xa0] sm:$0xff] %vm305_vm0, %v5905_v6  ;;  %v5908_v56 = vadd.f32 %v10897_v38, %v5907_v5 }
 0xd79   : > { %5974 = vst.msk [vmem:[%s10904_s6 + $0xb8] sm:$0xff] %vm305_vm0, %v5916_v20 }
 0xd7a   : > { %5972 = vst.msk [vmem:[%s10904_s6 + $0xa8] sm:$0xff] %vm305_vm0, %v5908_v56 }
 0xd7c   : > { %v7092_v32 = vpop.f32.mrb[144].mxu1 }
 0xd7d   : > { %v5929_v57 = vadd.f32 %v7092_v32, %v10897_v38  ;;  %v5920_v43 = vpop.f32.mrb[145].mxu1 }
 0xd7e   : > { %v5921_v18 = vadd.f32 %v10897_v38, %v5920_v43  ;;  %v7093_v13 = vpop.f32.mrb[146].mxu1 }
 0xd7f   : > { %5977 = vst.msk [vmem:[%s10904_s6 + $0xd0] sm:$0xff] %vm305_vm0, %v5929_v57  ;;  %v5932_v35 = vadd.f32 %v7093_v13, %v10897_v38  ;;  %v5923_v0 = vpop.f32.mrb[147].mxu1 }
 0xd80   : > { %5975 = vst.msk [vmem:[%s10904_s6 + $0xc0] sm:$0xff] %vm305_vm0, %v5921_v18  ;;  %v5924_v48 = vadd.f32 %v10897_v38, %v5923_v0 }
 0xd81   : > { %5978 = vst.msk [vmem:[%s10904_s6 + $0xd8] sm:$0xff] %vm305_vm0, %v5932_v35 }
 0xd82   : > { %5976 = vst.msk [vmem:[%s10904_s6 + $0xc8] sm:$0xff] %vm305_vm0, %v5924_v48 }
 0xd84   : > { %v7096_v37 = vpop.f32.mrb[148].mxu1 }
 0xd85   : > { %v5945_v47 = vadd.f32 %v7096_v37, %v10897_v38  ;;  %v5936_v59 = vpop.f32.mrb[149].mxu1 }
 0xd86   : > { %v5937_v34 = vadd.f32 %v10897_v38, %v5936_v59  ;;  %v7097_v28 = vpop.f32.mrb[150].mxu1 }
 0xd87   : > { %5981 = vst.msk [vmem:[%s10904_s6 + $0xf0] sm:$0xff] %vm305_vm0, %v5945_v47  ;;  %v5948_v31 = vadd.f32 %v7097_v28, %v10897_v38  ;;  %v5939_v41 = vpop.f32.mrb[151].mxu1 }
 0xd88   : > { %5979 = vst.msk [vmem:[%s10904_s6 + $0xe0] sm:$0xff] %vm305_vm0, %v5937_v34  ;;  %v5940_v2 = vadd.f32 %v10897_v38, %v5939_v41 }
 0xd89   : > { %5982 = vst.msk [vmem:[%s10904_s6 + $0xf8] sm:$0xff] %vm305_vm0, %v5948_v31 }
 0xd8a   : > { %5980 = vst.msk [vmem:[%s10904_s6 + $0xe8] sm:$0xff] %vm305_vm0, %v5940_v2 }
 0xd8b PF: > { %s15_s18 = sadd.s32 1, %s7946_s18  }
 0xd8c   : > { %p12_p4 = scmp.ge.s32.totalorder %s15_s18, 4  }
 0xd8e   :  { %14 = sbr.rel (!%p12_p4) target bundleno = 1 (0x1), region = 70 }

</bundles_post_ra>
